<compile_context>
chip_gen: v5e
topology: v5e:2x2
jax: 0.10.0
libtpu: 0.0.40
codegen_flags: <defaults>
</compile_context>

<pallas_src>
import functools

import jax
import jax.numpy as jnp
import numpy as np
from jax.experimental import pallas as pl
from jax.experimental.pallas import tpu as pltpu


def _ceil8(n):
    return ((n + 7) // 8) * 8


# ---------------------------------------------------------------------------
# One-time weight packing (hoisted out of the hot path; rebuild only when the
# parameters change).  Slab rows (every block starts 8-sublane aligned):
#   [0            : K   )  w1 rows for the taskKnowledgeNecessity columns
#   [K8           : +R  )  w1 rows for the taskRationality columns
#   [K8+R8        : +H  )  w2
#   [off_e + 0 ]           w1 row 0 (taskStepSize column)
#   [off_e + 8 ]           b2
#   [off_e + 16]           w3^T
# b3 is dropped: softmax over dim 0 is shift-invariant and logits are never
# returned.
# ---------------------------------------------------------------------------
def pack_weights(params, k_size, r_size):
    w1, w2, b2, w3, b3 = params
    del b3
    h = w1.shape[1]
    k8, r8, h8 = _ceil8(k_size), _ceil8(r_size), _ceil8(h)
    off_e = k8 + r8 + h8
    slab = jnp.zeros((off_e + 24, h), jnp.float32)
    slab = slab.at[0:k_size].set(w1[1:1 + k_size].astype(jnp.float32))
    slab = slab.at[k8:k8 + r_size].set(
        w1[1 + k_size:1 + k_size + r_size].astype(jnp.float32))
    slab = slab.at[k8 + r8:k8 + r8 + h].set(w2.astype(jnp.float32))
    slab = slab.at[off_e].set(w1[0].astype(jnp.float32))
    slab = slab.at[off_e + 8].set(b2.reshape(h).astype(jnp.float32))
    slab = slab.at[off_e + 16].set(w3.reshape(h).astype(jnp.float32))
    return slab


def scheduler_kernel(tss_ref, tkn_ref, tr_ref, w_ref, out_ref, *, tasks_per_call):
    """One grid step = Mb/tasks_per_call independent scheduler invocations.

    tss_ref: (Mb, 1)    raw taskStepSize, rows grouped per invocation
    tkn_ref: (Mb, K)    raw taskKnowledgeNecessity
    tr_ref:  (Mb, R)    raw taskRationality
    w_ref:   (Wrows, H) packed weight slab (VMEM-resident, constant index_map)
    out_ref: (Mb, 2)    cols = [z, taskStepSize_normalized]
    """
    mb, k = tkn_ref.shape
    r = tr_ref.shape[1]
    h = w_ref.shape[1]
    b = tasks_per_call
    g = mb // b                      # invocations handled by this grid step

    k8, r8, h8 = _ceil8(k), _ceil8(r), _ceil8(h)
    off_r, off_2 = k8, k8 + r8
    off_e = off_2 + h8

    tss = tss_ref[...]
    tkn = tkn_ref[...]
    tr = tr_ref[...]

    # ---- nn.LayerNorm over each invocation's whole taskStepSize vector
    #      (biased variance, eps=1e-5, fresh weight=1 / bias=0).  One-pass.
    t3 = tss.reshape(g, b, 1)
    s1 = jnp.sum(t3, axis=1, keepdims=True)
    s2 = jnp.sum(t3 * t3, axis=1, keepdims=True)
    mu = s1 * (1.0 / b)
    var = s2 * (1.0 / b) - mu * mu
    tss_n = ((t3 - mu) * jax.lax.rsqrt(var + 1e-5)).reshape(mb, 1)

    # ---- self.layer_norm: per-row mean, UNBIASED variance, eps=1e-8. One-pass.
    def row_ln(x, n):
        rs1 = jnp.sum(x, axis=1, keepdims=True)
        rs2 = jnp.sum(x * x, axis=1, keepdims=True)
        rmu = rs1 * (1.0 / n)
        rvar = (rs2 - rs1 * rmu) * (1.0 / (n - 1))
        return (x - rmu) * jax.lax.rsqrt(rvar + 1e-8)

    tkn_n = row_ln(tkn, k)
    tr_n = row_ln(tr, r)

    # ---- MLP: Linear(D,H,bias=False) -> ReLU -> Linear(H,H) -> Tanh
    #           -> Linear(H,1) -> Softmax(dim=0, per invocation)
    w1_k = w_ref[0:k, :]                       # (K, H)
    w1_r = w_ref[off_r:off_r + r, :]           # (R, H)
    w2 = w_ref[off_2:off_2 + h, :]             # (H, H)
    w1_0 = w_ref[off_e:off_e + 1, :]           # (1, H)  8-aligned 1-row slices
    b2 = w_ref[off_e + 8:off_e + 9, :]         # (1, H)
    w3t = w_ref[off_e + 16:off_e + 17, :]      # (1, H)

    h1 = (jnp.dot(tkn_n, w1_k, preferred_element_type=jnp.float32)
          + jnp.dot(tr_n, w1_r, preferred_element_type=jnp.float32)
          + tss_n * w1_0)                      # step-size column: VPU outer product
    h1 = jnp.maximum(h1, 0.0)
    h2 = jnp.tanh(jnp.dot(h1, w2, preferred_element_type=jnp.float32) + b2)
    # Final Linear(H,1): VPU multiply + lane reduce.  b3 omitted (exact, since
    # softmax over dim 0 is shift-invariant and logits are never returned).
    logits = jnp.sum(h2 * w3t, axis=1, keepdims=True)          # (Mb, 1)

    # ---- Softmax over dim=0 within each invocation (group of b rows).
    lg = logits.reshape(g, b, 1)
    m = jnp.max(lg, axis=1, keepdims=True)
    e = jnp.exp(lg - m)
    z = (e * pl.reciprocal(jnp.sum(e, axis=1, keepdims=True),
                           approx=False)).reshape(mb, 1)

    # ---- Fused output: one dense (Mb, 2) store, cols = [z, tss_n].
    col = jax.lax.broadcasted_iota(jnp.int32, (mb, 2), 1)
    out_ref[...] = jnp.where(col == 0, z, tss_n)


def task_aware_weight_scheduler_batched(taskid, task_step_size,
                                        task_knowledge_necessity,
                                        task_rationality, wslab, *,
                                        invocations_per_step=16):
    """N independent TaskAwareWeightScheduler forwards under one pallas_call.

    taskid: (N, B) int;  task_step_size: (N, B);
    task_knowledge_necessity: (N, B, K);  task_rationality: (N, B, R);
    wslab: pre-packed weights from pack_weights() (hoisted out of the hot path).

    Returns z: (N, B, 1) and recorder: (N, 5, B) — per invocation identical to
    the PyTorch module's (z, recorder).
    """
    n, b = task_step_size.shape
    k = task_knowledge_necessity.shape[-1]
    r = task_rationality.shape[-1]
    assert k > 1 and r > 1, "unbiased variance requires feature width > 1"

    nblk = max(1, min(invocations_per_step, n))
    while (nblk * b) % 8 != 0:        # block row count must be sublane aligned
        nblk += 1
    n_pad = ((n + nblk - 1) // nblk) * nblk

    tss = task_step_size.astype(jnp.float32)
    tkn = task_knowledge_necessity.astype(jnp.float32)
    tr = task_rationality.astype(jnp.float32)
    if n_pad != n:
        pad = n_pad - n
        tss = jnp.pad(tss, ((0, pad), (0, 0)))
        tkn = jnp.pad(tkn, ((0, pad), (0, 0), (0, 0)))
        tr = jnp.pad(tr, ((0, pad), (0, 0), (0, 0)))

    mb = nblk * b
    out = pl.pallas_call(
        functools.partial(scheduler_kernel, tasks_per_call=b),
        out_shape=jax.ShapeDtypeStruct((n_pad * b, 2), jnp.float32),
        grid=(n_pad // nblk,),
        in_specs=[
            pl.BlockSpec((mb, 1), lambda i: (i, 0)),
            pl.BlockSpec((mb, k), lambda i: (i, 0)),
            pl.BlockSpec((mb, r), lambda i: (i, 0)),
            pl.BlockSpec(wslab.shape, lambda i: (0, 0)),  # DMA'd once, resident
        ],
        out_specs=pl.BlockSpec((mb, 2), lambda i: (i, 0)),
        compiler_params=pltpu.CompilerParams(
            dimension_semantics=("parallel",)),           # v7x: 2 TCs split grid
    )(tss.reshape(n_pad * b, 1),
      tkn.reshape(n_pad * b, k),
      tr.reshape(n_pad * b, r),
      wslab)

    out = out[:n * b]
    z = out[:, 0].reshape(n, b, 1)
    tss_n = out[:, 1].reshape(n, b)
    # Mean of the row-normalized tkn / tr blocks is analytically 0 (no affine
    # scale/bias), so recorder rows 3/4 are exact zeros.
    zeros = jnp.zeros((n, b), jnp.float32)
    recorder = jnp.stack(
        [taskid.astype(jnp.float32), z[:, :, 0], tss_n, zeros, zeros], axis=1)
    return z, recorder


def reference_single(taskid, tss, tkn, tr, params):
    """Pure-JAX reference mirroring the PyTorch forward (MLP branch), one call."""
    w1, w2, b2, w3, b3 = params
    mu = jnp.mean(tss)
    var = jnp.mean((tss - mu) ** 2)
    tss_n = (tss - mu) / jnp.sqrt(var + 1e-5)

    def ln(x):
        m = jnp.mean(x, axis=1, keepdims=True)
        v = jnp.var(x, axis=1, keepdims=True, ddof=1)
        return (x - m) / jnp.sqrt(v + 1e-8)

    tkn_n, tr_n = ln(tkn), ln(tr)
    x = jnp.concatenate([tss_n[:, None], tkn_n, tr_n], axis=1)
    h1 = jax.nn.relu(x @ w1)
    h2 = jnp.tanh(h1 @ w2 + b2)
    logits = h2 @ w3 + b3
    z = jax.nn.softmax(logits, axis=0)
    rec = jnp.stack([taskid.astype(jnp.float32), z[:, 0], tss_n,
                     jnp.mean(tkn_n, axis=1), jnp.mean(tr_n, axis=1)], axis=0)
    return z, rec


if __name__ == "__main__":
    # Module hyper-parameters (synthetic, small).
    embedding_table_size = 32
    user_aware_adapter_size = 16
    K = user_aware_adapter_size                                  # tkn width
    R = embedding_table_size + user_aware_adapter_size           # tr width
    D = 1 + embedding_table_size + user_aware_adapter_size * 2   # mlp input_dim
    H = 64
    B = 8     # tasks per scheduler invocation
    N = 32    # independent invocations batched under one pallas_call

    key = jax.random.PRNGKey(0)
    keys = jax.random.split(key, 8)

    taskid = jnp.tile(jnp.arange(B, dtype=jnp.int32)[None, :], (N, 1))
    task_step_size = jax.random.uniform(keys[0], (N, B), jnp.float32, 0.1, 1.0)
    task_knowledge_necessity = jax.random.normal(keys[1], (N, B, K), jnp.float32)
    task_rationality = jax.random.normal(keys[2], (N, B, R), jnp.float32)

    # Deterministic MLP parameters (Linear weights stored as (in, out)).
    w1 = jax.random.uniform(keys[3], (D, H), jnp.float32, -0.1, 0.1)  # bias=False
    w2 = jax.random.uniform(keys[4], (H, H), jnp.float32, -0.1, 0.1)
    b2 = jax.random.uniform(keys[5], (H,), jnp.float32, -0.1, 0.1)
    w3 = jax.random.uniform(keys[6], (H, 1), jnp.float32, -0.1, 0.1)
    b3 = jax.random.uniform(keys[7], (1,), jnp.float32, -0.1, 0.1)
    params = (w1, w2, b2, w3, b3)

    # One-time packing, outside the per-step hot path (perf review opt #3).
    wslab = jax.block_until_ready(pack_weights(params, K, R))

    run = jax.jit(functools.partial(task_aware_weight_scheduler_batched,
                                    invocations_per_step=16))
    z, recorder = run(taskid, task_step_size, task_knowledge_necessity,
                      task_rationality, wslab)
    jax.block_until_ready((z, recorder))

    z_ref, rec_ref = jax.vmap(functools.partial(reference_single, params=params))(
        taskid, task_step_size, task_knowledge_necessity, task_rationality)

    np.testing.assert_allclose(np.asarray(z), np.asarray(z_ref),
                               rtol=1e-5, atol=1e-5)
    np.testing.assert_allclose(np.asarray(recorder), np.asarray(rec_ref),
                               rtol=1e-5, atol=1e-5)
    assert z.shape == (N, B, 1) and recorder.shape == (N, 5, B)

    print("KERNEL_OK")
</pallas_src>

<mosaic_0001>
module attributes {stable_mosaic.version = 11 : i64} {
  func.func @scheduler_kernel(%arg0: i32, %arg1: memref<128x1xf32, #tpu.memory_space<vmem>>, %arg2: memref<128x16xf32, #tpu.memory_space<vmem>>, %arg3: memref<128x48xf32, #tpu.memory_space<vmem>>, %arg4: memref<152x64xf32, #tpu.memory_space<vmem>>, %arg5: memref<128x2xf32, #tpu.memory_space<vmem>>) attributes {dimension_semantics = [#tpu.dimension_semantics<parallel>], iteration_bounds = array<i64: 2>, scalar_prefetch = 0 : i64, scratch_operands = 0 : i64, tpu.core_type = #tpu.core_type<tc>, window_params = [{transform_indices = @transform_0, window_bounds = array<i64: 128, 1>}, {transform_indices = @transform_1, window_bounds = array<i64: 128, 16>}, {transform_indices = @transform_2, window_bounds = array<i64: 128, 48>}, {pipeline_mode = #tpu.pipeline_mode<synchronous>, transform_indices = @transform_3, window_bounds = array<i64: 152, 64>}, {transform_indices = @transform_4, window_bounds = array<i64: 128, 2>}]} {
    %c0 = arith.constant 0 : index
    %c0_0 = arith.constant 0 : index
    %0 = vector.load %arg1[%c0, %c0_0] : memref<128x1xf32, #tpu.memory_space<vmem>>, vector<128x1xf32>
    %c0_1 = arith.constant 0 : index
    %c0_2 = arith.constant 0 : index
    %1 = vector.load %arg2[%c0_1, %c0_2] : memref<128x16xf32, #tpu.memory_space<vmem>>, vector<128x16xf32>
    %c0_3 = arith.constant 0 : index
    %c0_4 = arith.constant 0 : index
    %2 = vector.load %arg3[%c0_3, %c0_4] : memref<128x48xf32, #tpu.memory_space<vmem>>, vector<128x48xf32>
    %3 = vector.shape_cast %0 : vector<128x1xf32> to vector<16x8x1xf32>
    %cst = arith.constant dense<0.000000e+00> : vector<16x1xf32>
    %4 = vector.multi_reduction <add>, %3, %cst [1] : vector<16x8x1xf32> to vector<16x1xf32>
    %5 = vector.shape_cast %4 : vector<16x1xf32> to vector<16x1x1xf32>
    %6 = arith.mulf %3, %3 : vector<16x8x1xf32>
    %cst_5 = arith.constant dense<0.000000e+00> : vector<16x1xf32>
    %7 = vector.multi_reduction <add>, %6, %cst_5 [1] : vector<16x8x1xf32> to vector<16x1xf32>
    %8 = vector.shape_cast %7 : vector<16x1xf32> to vector<16x1x1xf32>
    %cst_6 = arith.constant 1.250000e-01 : f32
    %9 = vector.broadcast %cst_6 : f32 to vector<16x1x1xf32>
    %10 = arith.mulf %5, %9 : vector<16x1x1xf32>
    %cst_7 = arith.constant 1.250000e-01 : f32
    %11 = vector.broadcast %cst_7 : f32 to vector<16x1x1xf32>
    %12 = arith.mulf %8, %11 : vector<16x1x1xf32>
    %13 = arith.mulf %10, %10 : vector<16x1x1xf32>
    %14 = arith.subf %12, %13 : vector<16x1x1xf32>
    %15 = vector.broadcast %10 : vector<16x1x1xf32> to vector<16x8x1xf32>
    %16 = arith.subf %3, %15 : vector<16x8x1xf32>
    %cst_8 = arith.constant 9.99999974E-6 : f32
    %17 = vector.broadcast %cst_8 : f32 to vector<16x1x1xf32>
    %18 = arith.addf %14, %17 : vector<16x1x1xf32>
    %19 = math.rsqrt %18 : vector<16x1x1xf32>
    %20 = vector.broadcast %19 : vector<16x1x1xf32> to vector<16x8x1xf32>
    %21 = arith.mulf %16, %20 : vector<16x8x1xf32>
    %22 = vector.shape_cast %21 : vector<16x8x1xf32> to vector<128x1xf32>
    %cst_9 = arith.constant dense<0.000000e+00> : vector<128xf32>
    %23 = vector.multi_reduction <add>, %1, %cst_9 [1] : vector<128x16xf32> to vector<128xf32>
    %24 = vector.shape_cast %23 : vector<128xf32> to vector<128x1xf32>
    %25 = arith.mulf %1, %1 : vector<128x16xf32>
    %cst_10 = arith.constant dense<0.000000e+00> : vector<128xf32>
    %26 = vector.multi_reduction <add>, %25, %cst_10 [1] : vector<128x16xf32> to vector<128xf32>
    %27 = vector.shape_cast %26 : vector<128xf32> to vector<128x1xf32>
    %cst_11 = arith.constant 6.250000e-02 : f32
    %28 = vector.broadcast %cst_11 : f32 to vector<128x1xf32>
    %29 = arith.mulf %24, %28 : vector<128x1xf32>
    %30 = arith.mulf %24, %29 : vector<128x1xf32>
    %31 = arith.subf %27, %30 : vector<128x1xf32>
    %cst_12 = arith.constant 0.0666666701 : f32
    %32 = vector.broadcast %cst_12 : f32 to vector<128x1xf32>
    %33 = arith.mulf %31, %32 : vector<128x1xf32>
    %34 = vector.broadcast %29 : vector<128x1xf32> to vector<128x16xf32>
    %35 = arith.subf %1, %34 : vector<128x16xf32>
    %cst_13 = arith.constant 9.99999993E-9 : f32
    %36 = vector.broadcast %cst_13 : f32 to vector<128x1xf32>
    %37 = arith.addf %33, %36 : vector<128x1xf32>
    %38 = math.rsqrt %37 : vector<128x1xf32>
    %39 = vector.broadcast %38 : vector<128x1xf32> to vector<128x16xf32>
    %40 = arith.mulf %35, %39 : vector<128x16xf32>
    %cst_14 = arith.constant dense<0.000000e+00> : vector<128xf32>
    %41 = vector.multi_reduction <add>, %2, %cst_14 [1] : vector<128x48xf32> to vector<128xf32>
    %42 = vector.shape_cast %41 : vector<128xf32> to vector<128x1xf32>
    %43 = arith.mulf %2, %2 : vector<128x48xf32>
    %cst_15 = arith.constant dense<0.000000e+00> : vector<128xf32>
    %44 = vector.multi_reduction <add>, %43, %cst_15 [1] : vector<128x48xf32> to vector<128xf32>
    %45 = vector.shape_cast %44 : vector<128xf32> to vector<128x1xf32>
    %cst_16 = arith.constant 0.020833334 : f32
    %46 = vector.broadcast %cst_16 : f32 to vector<128x1xf32>
    %47 = arith.mulf %42, %46 : vector<128x1xf32>
    %48 = arith.mulf %42, %47 : vector<128x1xf32>
    %49 = arith.subf %45, %48 : vector<128x1xf32>
    %cst_17 = arith.constant 0.0212765951 : f32
    %50 = vector.broadcast %cst_17 : f32 to vector<128x1xf32>
    %51 = arith.mulf %49, %50 : vector<128x1xf32>
    %52 = vector.broadcast %47 : vector<128x1xf32> to vector<128x48xf32>
    %53 = arith.subf %2, %52 : vector<128x48xf32>
    %cst_18 = arith.constant 9.99999993E-9 : f32
    %54 = vector.broadcast %cst_18 : f32 to vector<128x1xf32>
    %55 = arith.addf %51, %54 : vector<128x1xf32>
    %56 = math.rsqrt %55 : vector<128x1xf32>
    %57 = vector.broadcast %56 : vector<128x1xf32> to vector<128x48xf32>
    %58 = arith.mulf %53, %57 : vector<128x48xf32>
    %c0_19 = arith.constant 0 : index
    %c0_20 = arith.constant 0 : index
    %59 = vector.load %arg4[%c0_19, %c0_20] : memref<152x64xf32, #tpu.memory_space<vmem>>, vector<16x64xf32>
    %c16 = arith.constant 16 : index
    %c0_21 = arith.constant 0 : index
    %60 = vector.load %arg4[%c16, %c0_21] : memref<152x64xf32, #tpu.memory_space<vmem>>, vector<48x64xf32>
    %c64 = arith.constant 64 : index
    %c0_22 = arith.constant 0 : index
    %61 = vector.load %arg4[%c64, %c0_22] : memref<152x64xf32, #tpu.memory_space<vmem>>, vector<64x64xf32>
    %c128 = arith.constant 128 : index
    %c0_23 = arith.constant 0 : index
    %62 = vector.load %arg4[%c128, %c0_23] : memref<152x64xf32, #tpu.memory_space<vmem>>, vector<1x64xf32>
    %c136 = arith.constant 136 : index
    %c0_24 = arith.constant 0 : index
    %63 = vector.load %arg4[%c136, %c0_24] : memref<152x64xf32, #tpu.memory_space<vmem>>, vector<1x64xf32>
    %c144 = arith.constant 144 : index
    %c0_25 = arith.constant 0 : index
    %64 = vector.load %arg4[%c144, %c0_25] : memref<152x64xf32, #tpu.memory_space<vmem>>, vector<1x64xf32>
    %cst_26 = arith.constant dense<0.000000e+00> : vector<128x64xf32>
    %65 = tpu.matmul %40, %59, %cst_26 {dimension_numbers = #tpu.dot_dimension_numbers<[1], [0], [0], [1], [0, 0, 1, 1], [], []>} : vector<128x16xf32>, vector<16x64xf32>, vector<128x64xf32> -> vector<128x64xf32>
    %cst_27 = arith.constant dense<0.000000e+00> : vector<128x64xf32>
    %66 = tpu.matmul %58, %60, %cst_27 {dimension_numbers = #tpu.dot_dimension_numbers<[1], [0], [0], [1], [0, 0, 1, 1], [], []>} : vector<128x48xf32>, vector<48x64xf32>, vector<128x64xf32> -> vector<128x64xf32>
    %67 = arith.addf %65, %66 : vector<128x64xf32>
    %68 = vector.broadcast %22 : vector<128x1xf32> to vector<128x64xf32>
    %69 = vector.broadcast %62 : vector<1x64xf32> to vector<128x64xf32>
    %70 = arith.mulf %68, %69 : vector<128x64xf32>
    %71 = arith.addf %67, %70 : vector<128x64xf32>
    %cst_28 = arith.constant 0.000000e+00 : f32
    %72 = vector.broadcast %cst_28 : f32 to vector<128x64xf32>
    %73 = arith.maximumf %71, %72 : vector<128x64xf32>
    %cst_29 = arith.constant dense<0.000000e+00> : vector<128x64xf32>
    %74 = tpu.matmul %73, %61, %cst_29 {dimension_numbers = #tpu.dot_dimension_numbers<[1], [0], [0], [1], [0, 0, 1, 1], [], []>} : vector<128x64xf32>, vector<64x64xf32>, vector<128x64xf32> -> vector<128x64xf32>
    %75 = vector.broadcast %63 : vector<1x64xf32> to vector<128x64xf32>
    %76 = arith.addf %74, %75 : vector<128x64xf32>
    %77 = math.tanh %76 : vector<128x64xf32>
    %78 = vector.broadcast %64 : vector<1x64xf32> to vector<128x64xf32>
    %79 = arith.mulf %77, %78 : vector<128x64xf32>
    %cst_30 = arith.constant dense<0.000000e+00> : vector<128xf32>
    %80 = vector.multi_reduction <add>, %79, %cst_30 [1] : vector<128x64xf32> to vector<128xf32>
    %81 = vector.shape_cast %80 : vector<128xf32> to vector<128x1xf32>
    %82 = vector.shape_cast %81 : vector<128x1xf32> to vector<16x8x1xf32>
    %cst_31 = arith.constant dense<0xFF800000> : vector<16x1xf32>
    %83 = vector.multi_reduction <maximumf>, %82, %cst_31 [1] : vector<16x8x1xf32> to vector<16x1xf32>
    %84 = vector.shape_cast %83 : vector<16x1xf32> to vector<16x1x1xf32>
    %85 = vector.broadcast %84 : vector<16x1x1xf32> to vector<16x8x1xf32>
    %86 = arith.subf %82, %85 : vector<16x8x1xf32>
    %87 = math.exp %86 : vector<16x8x1xf32>
    %cst_32 = arith.constant dense<0.000000e+00> : vector<16x1xf32>
    %88 = vector.multi_reduction <add>, %87, %cst_32 [1] : vector<16x8x1xf32> to vector<16x1xf32>
    %89 = vector.shape_cast %88 : vector<16x1xf32> to vector<16x1x1xf32>
    %90 = tpu.reciprocal %89 : vector<16x1x1xf32> -> vector<16x1x1xf32>
    %91 = vector.broadcast %90 : vector<16x1x1xf32> to vector<16x8x1xf32>
    %92 = arith.mulf %87, %91 : vector<16x8x1xf32>
    %93 = vector.shape_cast %92 : vector<16x8x1xf32> to vector<128x1xf32>
    %94 = tpu.iota {dimensions = array<i32: 1>} : vector<128x2xi32>
    %c0_i32 = arith.constant 0 : i32
    %95 = vector.broadcast %c0_i32 : i32 to vector<128x2xi32>
    %96 = arith.cmpi eq, %94, %95 : vector<128x2xi32>
    %97 = vector.shape_cast %93 : vector<128x1xf32> to vector<128x1xf32>
    %98 = vector.broadcast %97 : vector<128x1xf32> to vector<128x2xf32>
    %99 = vector.shape_cast %22 : vector<128x1xf32> to vector<128x1xf32>
    %100 = vector.broadcast %99 : vector<128x1xf32> to vector<128x2xf32>
    %101 = arith.select %96, %98, %100 : vector<128x2xi1>, vector<128x2xf32>
    %c0_33 = arith.constant 0 : index
    %c0_34 = arith.constant 0 : index
    %102 = vector.load %arg5[%c0_33, %c0_34] : memref<128x2xf32, #tpu.memory_space<vmem>>, vector<128x2xf32>
    tpu.vector_store %arg5[%c0_33, %c0_34], %101 {strides = array<i32>} : memref<128x2xf32, #tpu.memory_space<vmem>>, vector<128x2xf32>,
    return
  }
  func.func @transform_0(%arg0: i32) -> (i32, i32) {
    %c0_i32 = arith.constant 0 : i32
    %c0_i32_0 = arith.constant 0 : i32
    return %arg0, %c0_i32 : i32, i32
  }
  func.func @transform_1(%arg0: i32) -> (i32, i32) {
    %c0_i32 = arith.constant 0 : i32
    %c0_i32_0 = arith.constant 0 : i32
    return %arg0, %c0_i32 : i32, i32
  }
  func.func @transform_2(%arg0: i32) -> (i32, i32) {
    %c0_i32 = arith.constant 0 : i32
    %c0_i32_0 = arith.constant 0 : i32
    return %arg0, %c0_i32 : i32, i32
  }
  func.func @transform_3(%arg0: i32) -> (i32, i32) {
    %c0_i32 = arith.constant 0 : i32
    %c0_i32_0 = arith.constant 0 : i32
    %c0_i32_1 = arith.constant 0 : i32
    return %c0_i32, %c0_i32_0 : i32, i32
  }
  func.func @transform_4(%arg0: i32) -> (i32, i32) {
    %c0_i32 = arith.constant 0 : i32
    %c0_i32_0 = arith.constant 0 : i32
    return %arg0, %c0_i32 : i32, i32
  }
}

</mosaic_0001>

<bundles_post_ra>
// kernel: squeeze.4
= control target key start
LH: loop header
LB: loop body
LE: loop exit
PB: predicated region body
PF: predicated region fallthrough
CT: control target
= control target key end

     0   :  { %s130_s8 = smov 120   ;;  %s131_s9 = smov 88   ;;  %vm7_vm0 = vcmask 64512   ;;  %s221_s0 = inlined_call_operand.vmem [shape: f32[256], index: 0, kind: input, shape index: {}]   ;;  %s222_s1 = inlined_call_operand.vmem [shape: f32[32,1,8], index: 1, kind: output, shape index: {}]  }
   0x1   :  { %v4_v0 = vld [vmem:[%s221_s0] sm:$0x3]  ;;  %s129_s0 = smov 104   ;;  %s132_s10 = smov 96  }
   0x2   :  { %5 = vst [vmem:[#allocation0] sm:$0x3] %v4_v0  ;;  %s133_s11 = smov 112   ;;  %s134_s12 = smov 80  }
   0x3   :  { %s135_s13 = smov 64   ;;  %s136_s14 = smov 72  }
   0x4   :  { %s137_s15 = smov 56   ;;  %s138_s16 = smov 40  }
   0x5   :  { %s139_s17 = smov 48   ;;  %s140_s18 = smov 32  }
   0x6   :  { %s141_s19 = smov 16   ;;  %s142_s20 = smov 24  }
   0x7   :  { %s143_s21 = smov 8  }
   0x9   :  { %v21_v1 = vld [vmem:[#allocation0] sm:$0x3]  }
   0xa   :  { %v9_v2 = vld [vmem:[#allocation0] sm:$0x3]   ;;  %22 = vrot.lane.b32.xlu1 %v21_v1, %s129_s0 }
   0xb   :  { %10 = vrot.lane.b32.xlu0 %v9_v2, %s130_s8  ;;  %v33_v3 = vld [vmem:[#allocation0] sm:$0x3]  }
   0xc   :  { %34 = vrot.lane.b32.xlu2 %v33_v3, %s131_s9  ;;  %v27_v4 = vld [vmem:[#allocation0] sm:$0x3]  }
   0xd   :  { %v15_v5 = vld [vmem:[#allocation0] sm:$0x3]  }
   0xe   :  { %v39_v6 = vld [vmem:[#allocation0] sm:$0x3]  }
   0xf   :  { %v51_v7 = vld [vmem:[#allocation0] sm:$0x3]  }
  0x10   :  { %v45_v8 = vld [vmem:[#allocation0] sm:$0x3]  }
  0x11   :  { %v57_v9 = vld [vmem:[#allocation0] sm:$0x3]  }
  0x12   :  { %28 = vrot.lane.b32.xlu1 %v27_v4, %s132_s10  ;;  %v69_v10 = vld [vmem:[#allocation0] sm:$0x3]  }
  0x13   :  { %16 = vrot.lane.b32.xlu0 %v15_v5, %s133_s11  ;;  %v63_v11 = vld [vmem:[#allocation0] sm:$0x3]  }
  0x14   :  { %40 = vrot.lane.b32.xlu2 %v39_v6, %s134_s12  ;;  %v75_v12 = vld [vmem:[#allocation0] sm:$0x3]  }
  0x15   :  { %v87_v13 = vld [vmem:[#allocation0] sm:$0x3]  }
  0x16   :  { %v81_v14 = vld [vmem:[#allocation0] sm:$0x3]  }
  0x17   :  { %v93_v15 = vld [vmem:[#allocation0] sm:$0x3]  }
  0x18   :  { %v6_v21 = vld [vmem:[#allocation0] sm:$0x3]  }
  0x19   :  { %8 = vst.msk [vmem:[%s222_s1] ss:$16 sm:$0x3] %vm7_vm0, %v6_v21  }
  0x1a   :  { %52 = vrot.lane.b32.xlu1 %v51_v7, %s135_s13 }
  0x1b   :  { %46 = vrot.lane.b32.xlu0 %v45_v8, %s136_s14 }
  0x1c   :  { %58 = vrot.lane.b32.xlu2 %v57_v9, %s137_s15 }
  0x22   :  { %70 = vrot.lane.b32.xlu1 %v69_v10, %s138_s16 }
  0x23   :  { %64 = vrot.lane.b32.xlu0 %v63_v11, %s139_s17 }
  0x24   :  { %76 = vrot.lane.b32.xlu2 %v75_v12, %s140_s18 }
  0x2a   :  { %88 = vrot.lane.b32.xlu1 %v87_v13, %s141_s19 }
  0x2b   :  { %82 = vrot.lane.b32.xlu0 %v81_v14, %s142_s20 }
  0x2c   :  { %94 = vrot.lane.b32.xlu2 %v93_v15, %s143_s21 }
  0x66   :  { %v35_v16 = vpop.permute.xlu2 %34  }
  0x67   :  { %103 = vst.msk [vmem:[%s222_s1 + $0x5] ss:$16 sm:$0x3] %vm7_vm0, %v35_v16  }
  0x6e   :  { %v41_v17 = vpop.permute.xlu2 %40  }
  0x6f   :  { %104 = vst.msk [vmem:[%s222_s1 + $0x6] ss:$16 sm:$0x3] %vm7_vm0, %v41_v17  }
  0x76   :  { %v59_v18 = vpop.permute.xlu2 %58  }
  0x77   :  { %107 = vst.msk [vmem:[%s222_s1 + $0x9] ss:$16 sm:$0x3] %vm7_vm0, %v59_v18  }
  0x7c   :  { %v23_v19 = vpop.permute.xlu1 %22  }
  0x7d   :  { %v11_v20 = vpop.permute.xlu0 %10   ;;  %101 = vst.msk [vmem:[%s222_s1 + $0x3] ss:$16 sm:$0x3] %vm7_vm0, %v23_v19  }
  0x7e   :  { %99 = vst.msk [vmem:[%s222_s1 + $0x1] ss:$16 sm:$0x3] %vm7_vm0, %v11_v20   ;;  %v77_v22 = vpop.permute.xlu2 %76  }
  0x7f   :  { %110 = vst.msk [vmem:[%s222_s1 + $0xc] ss:$16 sm:$0x3] %vm7_vm0, %v77_v22  }
  0x84   :  { %v29_v23 = vpop.permute.xlu1 %28  }
  0x85   :  { %v17_v24 = vpop.permute.xlu0 %16   ;;  %102 = vst.msk [vmem:[%s222_s1 + $0x4] ss:$16 sm:$0x3] %vm7_vm0, %v29_v23  }
  0x86   :  { %100 = vst.msk [vmem:[%s222_s1 + $0x2] ss:$16 sm:$0x3] %vm7_vm0, %v17_v24   ;;  %v95_v25 = vpop.permute.xlu2 %94  }
  0x87   :  { %113 = vst.msk [vmem:[%s222_s1 + $0xf] ss:$16 sm:$0x3] %vm7_vm0, %v95_v25  }
  0x8c   :  { %v53_v26 = vpop.permute.xlu1 %52  }
  0x8d   :  { %v47_v27 = vpop.permute.xlu0 %46   ;;  %106 = vst.msk [vmem:[%s222_s1 + $0x8] ss:$16 sm:$0x3] %vm7_vm0, %v53_v26  }
  0x8e   :  { %105 = vst.msk [vmem:[%s222_s1 + $0x7] ss:$16 sm:$0x3] %vm7_vm0, %v47_v27  }
  0x94   :  { %v71_v28 = vpop.permute.xlu1 %70  }
  0x95   :  { %v65_v29 = vpop.permute.xlu0 %64   ;;  %109 = vst.msk [vmem:[%s222_s1 + $0xb] ss:$16 sm:$0x3] %vm7_vm0, %v71_v28  }
  0x96   :  { %108 = vst.msk [vmem:[%s222_s1 + $0xa] ss:$16 sm:$0x3] %vm7_vm0, %v65_v29  }
  0x9c   :  { %v89_v30 = vpop.permute.xlu1 %88  }
  0x9d   :  { %v83_v31 = vpop.permute.xlu0 %82   ;;  %112 = vst.msk [vmem:[%s222_s1 + $0xe] ss:$16 sm:$0x3] %vm7_vm0, %v89_v30  }
  0x9e   :  { %111 = vst.msk [vmem:[%s222_s1 + $0xd] ss:$16 sm:$0x3] %vm7_vm0, %v83_v31  }

// kernel: squeeze.3
= control target key start
LH: loop header
LB: loop body
LE: loop exit
PB: predicated region body
PF: predicated region fallthrough
CT: control target
= control target key end

     0   :  { %s130_s8 = smov 120   ;;  %s131_s9 = smov 88   ;;  %vm7_vm0 = vcmask 64512   ;;  %s221_s0 = inlined_call_operand.vmem [shape: f32[256], index: 0, kind: input, shape index: {}]   ;;  %s222_s1 = inlined_call_operand.vmem [shape: f32[32,8,1], index: 1, kind: output, shape index: {}]  }
   0x1   :  { %v4_v0 = vld [vmem:[%s221_s0] sm:$0x3]  ;;  %s129_s0 = smov 104   ;;  %s132_s10 = smov 96  }
   0x2   :  { %5 = vst [vmem:[#allocation0] sm:$0x3] %v4_v0  ;;  %s133_s11 = smov 112   ;;  %s134_s12 = smov 80  }
   0x3   :  { %s135_s13 = smov 64   ;;  %s136_s14 = smov 72  }
   0x4   :  { %s137_s15 = smov 56   ;;  %s138_s16 = smov 40  }
   0x5   :  { %s139_s17 = smov 48   ;;  %s140_s18 = smov 32  }
   0x6   :  { %s141_s19 = smov 16   ;;  %s142_s20 = smov 24  }
   0x7   :  { %s143_s21 = smov 8  }
   0x9   :  { %v21_v1 = vld [vmem:[#allocation0] sm:$0x3]  }
   0xa   :  { %v9_v2 = vld [vmem:[#allocation0] sm:$0x3]   ;;  %22 = vrot.lane.b32.xlu1 %v21_v1, %s129_s0 }
   0xb   :  { %10 = vrot.lane.b32.xlu0 %v9_v2, %s130_s8  ;;  %v33_v3 = vld [vmem:[#allocation0] sm:$0x3]  }
   0xc   :  { %34 = vrot.lane.b32.xlu2 %v33_v3, %s131_s9  ;;  %v27_v4 = vld [vmem:[#allocation0] sm:$0x3]  }
   0xd   :  { %v15_v5 = vld [vmem:[#allocation0] sm:$0x3]  }
   0xe   :  { %v39_v6 = vld [vmem:[#allocation0] sm:$0x3]  }
   0xf   :  { %v51_v7 = vld [vmem:[#allocation0] sm:$0x3]  }
  0x10   :  { %v45_v8 = vld [vmem:[#allocation0] sm:$0x3]  }
  0x11   :  { %v57_v9 = vld [vmem:[#allocation0] sm:$0x3]  }
  0x12   :  { %28 = vrot.lane.b32.xlu1 %v27_v4, %s132_s10  ;;  %v69_v10 = vld [vmem:[#allocation0] sm:$0x3]  }
  0x13   :  { %16 = vrot.lane.b32.xlu0 %v15_v5, %s133_s11  ;;  %v63_v11 = vld [vmem:[#allocation0] sm:$0x3]  }
  0x14   :  { %40 = vrot.lane.b32.xlu2 %v39_v6, %s134_s12  ;;  %v75_v12 = vld [vmem:[#allocation0] sm:$0x3]  }
  0x15   :  { %v87_v13 = vld [vmem:[#allocation0] sm:$0x3]  }
  0x16   :  { %v81_v14 = vld [vmem:[#allocation0] sm:$0x3]  }
  0x17   :  { %v93_v15 = vld [vmem:[#allocation0] sm:$0x3]  }
  0x18   :  { %v6_v21 = vld [vmem:[#allocation0] sm:$0x3]  }
  0x19   :  { %8 = vst.msk [vmem:[%s222_s1] ss:$16 sm:$0x3] %vm7_vm0, %v6_v21  }
  0x1a   :  { %52 = vrot.lane.b32.xlu1 %v51_v7, %s135_s13 }
  0x1b   :  { %46 = vrot.lane.b32.xlu0 %v45_v8, %s136_s14 }
  0x1c   :  { %58 = vrot.lane.b32.xlu2 %v57_v9, %s137_s15 }
  0x22   :  { %70 = vrot.lane.b32.xlu1 %v69_v10, %s138_s16 }
  0x23   :  { %64 = vrot.lane.b32.xlu0 %v63_v11, %s139_s17 }
  0x24   :  { %76 = vrot.lane.b32.xlu2 %v75_v12, %s140_s18 }
  0x2a   :  { %88 = vrot.lane.b32.xlu1 %v87_v13, %s141_s19 }
  0x2b   :  { %82 = vrot.lane.b32.xlu0 %v81_v14, %s142_s20 }
  0x2c   :  { %94 = vrot.lane.b32.xlu2 %v93_v15, %s143_s21 }
  0x66   :  { %v35_v16 = vpop.permute.xlu2 %34  }
  0x67   :  { %103 = vst.msk [vmem:[%s222_s1 + $0x5] ss:$16 sm:$0x3] %vm7_vm0, %v35_v16  }
  0x6e   :  { %v41_v17 = vpop.permute.xlu2 %40  }
  0x6f   :  { %104 = vst.msk [vmem:[%s222_s1 + $0x6] ss:$16 sm:$0x3] %vm7_vm0, %v41_v17  }
  0x76   :  { %v59_v18 = vpop.permute.xlu2 %58  }
  0x77   :  { %107 = vst.msk [vmem:[%s222_s1 + $0x9] ss:$16 sm:$0x3] %vm7_vm0, %v59_v18  }
  0x7c   :  { %v23_v19 = vpop.permute.xlu1 %22  }
  0x7d   :  { %v11_v20 = vpop.permute.xlu0 %10   ;;  %101 = vst.msk [vmem:[%s222_s1 + $0x3] ss:$16 sm:$0x3] %vm7_vm0, %v23_v19  }
  0x7e   :  { %99 = vst.msk [vmem:[%s222_s1 + $0x1] ss:$16 sm:$0x3] %vm7_vm0, %v11_v20   ;;  %v77_v22 = vpop.permute.xlu2 %76  }
  0x7f   :  { %110 = vst.msk [vmem:[%s222_s1 + $0xc] ss:$16 sm:$0x3] %vm7_vm0, %v77_v22  }
  0x84   :  { %v29_v23 = vpop.permute.xlu1 %28  }
  0x85   :  { %v17_v24 = vpop.permute.xlu0 %16   ;;  %102 = vst.msk [vmem:[%s222_s1 + $0x4] ss:$16 sm:$0x3] %vm7_vm0, %v29_v23  }
  0x86   :  { %100 = vst.msk [vmem:[%s222_s1 + $0x2] ss:$16 sm:$0x3] %vm7_vm0, %v17_v24   ;;  %v95_v25 = vpop.permute.xlu2 %94  }
  0x87   :  { %113 = vst.msk [vmem:[%s222_s1 + $0xf] ss:$16 sm:$0x3] %vm7_vm0, %v95_v25  }
  0x8c   :  { %v53_v26 = vpop.permute.xlu1 %52  }
  0x8d   :  { %v47_v27 = vpop.permute.xlu0 %46   ;;  %106 = vst.msk [vmem:[%s222_s1 + $0x8] ss:$16 sm:$0x3] %vm7_vm0, %v53_v26  }
  0x8e   :  { %105 = vst.msk [vmem:[%s222_s1 + $0x7] ss:$16 sm:$0x3] %vm7_vm0, %v47_v27  }
  0x94   :  { %v71_v28 = vpop.permute.xlu1 %70  }
  0x95   :  { %v65_v29 = vpop.permute.xlu0 %64   ;;  %109 = vst.msk [vmem:[%s222_s1 + $0xb] ss:$16 sm:$0x3] %vm7_vm0, %v71_v28  }
  0x96   :  { %108 = vst.msk [vmem:[%s222_s1 + $0xa] ss:$16 sm:$0x3] %vm7_vm0, %v65_v29  }
  0x9c   :  { %v89_v30 = vpop.permute.xlu1 %88  }
  0x9d   :  { %v83_v31 = vpop.permute.xlu0 %82   ;;  %112 = vst.msk [vmem:[%s222_s1 + $0xe] ss:$16 sm:$0x3] %vm7_vm0, %v89_v30  }
  0x9e   :  { %111 = vst.msk [vmem:[%s222_s1 + $0xd] ss:$16 sm:$0x3] %vm7_vm0, %v83_v31  }

// kernel: task_aware_weight_scheduler_batched.1
= control target key start
LH: loop header
LB: loop body
LE: loop exit
PB: predicated region body
PF: predicated region fallthrough
CT: control target
= control target key end

     0   :  { %s3085_s15 = smov 0   ;;  %s5147_s0 = inlined_call_operand.vmem [shape: f32[256,1], index: 0, kind: input, shape index: {}]   ;;  %s5148_s1 = inlined_call_operand.vmem [shape: f32[256,16], index: 1, kind: input, shape index: {}]   ;;  %s5149_s2 = inlined_call_operand.vmem [shape: f32[256,48], index: 2, kind: input, shape index: {}]   ;;  %s5150_s3 = inlined_call_operand.vmem [shape: f32[152,64], index: 3, kind: input, shape index: {}]   ;;  %s5151_s4 = inlined_call_operand.vmem [shape: f32[256,2], index: 4, kind: output, shape index: {}]  }
   0x1 LB: > { %s2742_s16 = sadd.s32 4294967295, %s3057_s15   ;;  %p2746_p0 = scmp.ge.s32.totalorder %s3057_s15, 1  ;;  %s3057_s15 = sphi %s3085_s15, %s14_s15  }
   0x2   : > { %p185_p1 = scmp.lt.s32.totalorder %s3057_s15, 3 }
   0x4   : > { %p186_p2 = pnand %p2746_p0, %p185_p1 }
   0x5   : > { %s2747_s17 = sshll.u32 (!%p186_p2), %s2742_s16, 4 }
   0x6   : > { %189 = sbr.rel (%p186_p2) target bundleno = 866 (0x362), region = 36  ;;  %p222_p3 = scmp.lt.s32.totalorder (!%p186_p2), %s2747_s17, 31 }
   0xb   : > { %s5229_s17 = smov (!%p222_p3, %s2747_s17), 31  ;;  %vm806_vm0 = vcmask 130048   ;;  %vm1191_vm1 = vcmask 392192   ;;  %vm293_vm2 = vcmask 7168  }
   0xc   : > { %s3093_s18 = sshll.u32 %s5229_s17, 3 }
   0xd   : > { %s3099_s21 = scalar_lea.vmem %s5148_s1, %s3093_s18  ;;  %s3137_s24 = scalar_lea.vmem %s5149_s2, %s3093_s18 }
   0xe   : > { %v3102_v0 = vld [vmem:[%s3099_s21 + $0x10] sm:$0xff]  ;;  %v3105_v1 = vld [vmem:[%s3099_s21 + $0x8] sm:$0xff]  ;;  %v3108_v2 = vld [vmem:[%s3099_s21] sm:$0xff]  ;;  %s3225_s27 = scalar_lea.vmem %s5147_s0, %s3093_s18  ;;  %s4935_s20 = scalar_lea.vmem %s5151_s4, %s3093_s18 }
   0xf   : > { %v813_v3 = vsel %vm806_vm0, %v3102_v0, 0.0  ;;  %v810_v4 = vsel %vm806_vm0, %v3105_v1, 0.0  ;;  %v807_v5 = vsel %vm806_vm0, %v3108_v2, 0.0  ;;  %v857_v6 = vmul.f32 %v3102_v0, %v3102_v0  ;;  %v3126_v12 = vld [vmem:[%s3099_s21 + $0x18] sm:$0xff]  ;;  %v3131_v14 = vld [vmem:[%s3099_s21 + $0x20] sm:$0xff]  ;;  %v3156_v24 = vld [vmem:[%s3099_s21 + $0x28] sm:$0xff] }
  0x10   : > { %814 = vadd.xlane.f32.xlu2 %v813_v3  ;;  %811 = vadd.xlane.f32.xlu1 %v810_v4  ;;  %v856_v7 = vmul.f32 %v3105_v1, %v3105_v1  ;;  %v855_v8 = vmul.f32 %v3108_v2, %v3108_v2  ;;  %v858_v13 = vmul.f32 %v3126_v12, %v3126_v12  ;;  %v819_v15 = vsel %vm806_vm0, %v3131_v14, 0.0  ;;  %v3145_v18 = vld [vmem:[%s3137_s24] sm:$0xff]  ;;  %v3161_v26 = vld [vmem:[%s3137_s24 + $0x8] sm:$0xff]  ;;  %v3169_v30 = vld [vmem:[%s3137_s24 + $0x10] sm:$0xff] }
  0x11   : > { %808 = vadd.xlane.f32.xlu0 %v807_v5  ;;  %v877_v9 = vsel %vm806_vm0, %v857_v6, 0.0  ;;  %v816_v17 = vsel %vm806_vm0, %v3126_v12, 0.0  ;;  %v1240_v19 = vmul.f32 %v3145_v18, %v3145_v18  ;;  %v859_v20 = vmul.f32 %v3131_v14, %v3131_v14  ;;  %v267_v31 = vld [vmem:[%s3099_s21 + $0x30] sm:$0xff]  ;;  %v268_v37 = vld [vmem:[%s3099_s21 + $0x38] sm:$0xff]  ;;  %v289_v48 = vld [vmem:[%s3137_s24 + $0x60] sm:$0xff] }
  0x12   : > { %v874_v10 = vsel %vm806_vm0, %v856_v7, 0.0  ;;  %v871_v11 = vsel %vm806_vm0, %v855_v8, 0.0  ;;  %v880_v16 = vsel %vm806_vm0, %v858_v13, 0.0  ;;  %v1192_v23 = vsel %vm1191_vm1, %v3145_v18, 0.0  ;;  %v280_v42 = vld [vmem:[%s3137_s24 + $0x18] sm:$0xff]  ;;  %v281_v49 = vld [vmem:[%s3137_s24 + $0x20] sm:$0xff] }
  0x13   : > { %v1256_v21 = vsel %vm1191_vm1, %v1240_v19, 0.0  ;;  %v883_v22 = vsel %vm806_vm0, %v859_v20, 0.0  ;;  %v860_v25 = vmul.f32 %v3156_v24, %v3156_v24  ;;  %v1195_v28 = vsel %vm1191_vm1, %v3161_v26, 0.0  ;;  %v269_v50 = vld [vmem:[%s3099_s21 + $0x40] sm:$0xff]  ;;  %v290_v60 = vld [vmem:[%s3137_s24 + $0x68] sm:$0xff]  ;;  %v283_v13 = vld [vmem:[%s3137_s24 + $0x30] sm:$0xff] }
  0x14   : > { %v822_v29 = vsel %vm806_vm0, %v3156_v24, 0.0  ;;  %v1241_v32 = vmul.f32 %v3161_v26, %v3161_v26  ;;  %v1198_v33 = vsel %vm1191_vm1, %v3169_v30, 0.0  ;;  %v825_v34 = vsel %vm806_vm0, %v267_v31, 0.0  ;;  %v282_v61 = vld [vmem:[%s3137_s24 + $0x28] sm:$0xff] }
  0x15   : > { %v886_v27 = vsel %vm806_vm0, %v860_v25, 0.0  ;;  %v1242_v36 = vmul.f32 %v3169_v30, %v3169_v30  ;;  %v861_v38 = vmul.f32 %v267_v31, %v267_v31  ;;  %v828_v39 = vsel %vm806_vm0, %v268_v37, 0.0  ;;  %v270_v62 = vld [vmem:[%s3099_s21 + $0x48] sm:$0xff]  ;;  %v272_v31 = vld [vmem:[%s3099_s21 + $0x58] sm:$0xff] }
  0x16   : > { %v1259_v35 = vsel %vm1191_vm1, %v1241_v32, 0.0  ;;  %v1243_v43 = vmul.f32 %v280_v42, %v280_v42  ;;  %v862_v44 = vmul.f32 %v268_v37, %v268_v37  ;;  %v1201_v47 = vsel %vm1191_vm1, %v280_v42, 0.0  ;;  %v3233_v42 = vld [vmem:[%s5150_s3 + $0x8] sm:$0xff] }
  0x17   : > { %v1262_v40 = vsel %vm1191_vm1, %v1242_v36, 0.0  ;;  %v889_v41 = vsel %vm806_vm0, %v861_v38, 0.0  ;;  %v1228_v51 = vsel %vm1191_vm1, %v289_v48, 0.0  ;;  %v1204_v52 = vsel %vm1191_vm1, %v281_v49, 0.0  ;;  %1770 = vmatpush.msra.mxu1 %v3233_v42 }
  0x18   : > { %878 = vadd.xlane.f32.xlu2 %v877_v9  ;;  %875 = vadd.xlane.f32.xlu1 %v874_v10  ;;  %v1265_v45 = vsel %vm1191_vm1, %v1243_v43, 0.0  ;;  %v892_v46 = vsel %vm806_vm0, %v862_v44, 0.0  ;;  %v831_v53 = vsel %vm806_vm0, %v269_v50, 0.0  ;;  %v1252_v54 = vmul.f32 %v289_v48, %v289_v48 }
  0x19   : > { %872 = vadd.xlane.f32.xlu0 %v871_v11  ;;  %v1244_v55 = vmul.f32 %v281_v49, %v281_v49  ;;  %v863_v56 = vmul.f32 %v269_v50, %v269_v50  ;;  %v1231_v63 = vsel %vm1191_vm1, %v290_v60, 0.0  ;;  %v1207_v3 = vsel %vm1191_vm1, %v282_v61, 0.0  ;;  %v291_v11 = vld [vmem:[%s3137_s24 + $0x70] sm:$0xff] }
  0x1a   : > { %v1292_v57 = vsel %vm1191_vm1, %v1252_v54, 0.0  ;;  %v834_v4 = vsel %vm806_vm0, %v270_v62, 0.0  ;;  %v1253_v5 = vmul.f32 %v290_v60, %v290_v60  ;;  %v1245_v6 = vmul.f32 %v282_v61, %v282_v61  ;;  %v273_v61 = vld [vmem:[%s3099_s21 + $0x60] sm:$0xff] }
  0x1b   : > { %v1268_v58 = vsel %vm1191_vm1, %v1244_v55, 0.0  ;;  %v895_v59 = vsel %vm806_vm0, %v863_v56, 0.0  ;;  %v864_v7 = vmul.f32 %v270_v62, %v270_v62  ;;  %v1254_v20 = vmul.f32 %v291_v11, %v291_v11  ;;  %v274_v55 = vld [vmem:[%s3099_s21 + $0x68] sm:$0xff]  ;;  %v285_v56 = vld [vmem:[%s3137_s24 + $0x40] sm:$0xff] }
  0x1c   : > { %v1295_v8 = vsel %vm1191_vm1, %v1253_v5, 0.0  ;;  %v1271_v9 = vsel %vm1191_vm1, %v1245_v6, 0.0  ;;  %v866_v37 = vmul.f32 %v272_v31, %v272_v31 }
  0x1d   : > { %v898_v10 = vsel %vm806_vm0, %v864_v7, 0.0 }
  0x1e   : > { %v904_v50 = vsel %vm806_vm0, %v866_v37, 0.0 }
  0x20   : > { %820 = vadd.xlane.f32.xlu2 %v819_v15  ;;  %881 = vadd.xlane.f32.xlu1 %v880_v16  ;;  %v271_v15 = vld [vmem:[%s3099_s21 + $0x50] sm:$0xff]  ;;  %v1234_v16 = vsel %vm1191_vm1, %v291_v11, 0.0 }
  0x21   : > { %817 = vadd.xlane.f32.xlu0 %v816_v17  ;;  %v1210_v17 = vsel %vm1191_vm1, %v283_v13, 0.0  ;;  %v837_v19 = vsel %vm806_vm0, %v271_v15, 0.0 }
  0x28   : > { %1257 = vadd.xlane.f32.xlu2 %v1256_v21  ;;  %884 = vadd.xlane.f32.xlu1 %v883_v22  ;;  %v1246_v21 = vmul.f32 %v283_v13, %v283_v13  ;;  %v865_v22 = vmul.f32 %v271_v15, %v271_v15  ;;  %v843_v13 = vsel %vm806_vm0, %v273_v61, 0.0 }
  0x29   : > { %1193 = vadd.xlane.f32.xlu0 %v1192_v23  ;;  %v1298_v23 = vsel %vm1191_vm1, %v1254_v20, 0.0  ;;  %v868_v20 = vmul.f32 %v274_v55, %v274_v55 }
  0x2a   : > { %v1274_v25 = vsel %vm1191_vm1, %v1246_v21, 0.0  ;;  %v1248_v21 = vmul.f32 %v285_v56, %v285_v56 }
  0x2b   : > { %v910_v37 = vsel %vm806_vm0, %v868_v20, 0.0 }
  0x30   : > { %887 = vadd.xlane.f32.xlu2 %v886_v27  ;;  %1196 = vadd.xlane.f32.xlu1 %v1195_v28  ;;  %v901_v27 = vsel %vm806_vm0, %v865_v22, 0.0  ;;  %v292_v28 = vld [vmem:[%s3137_s24 + $0x78] sm:$0xff]  ;;  %v286_v22 = vld [vmem:[%s3137_s24 + $0x48] sm:$0xff] }
  0x31   : > { %823 = vadd.xlane.f32.xlu0 %v822_v29  ;;  %v284_v29 = vld [vmem:[%s3137_s24 + $0x38] sm:$0xff]  ;;  %v1237_v32 = vsel %vm1191_vm1, %v292_v28, 0.0 }
  0x32   : > { %v1247_v36 = vmul.f32 %v284_v29, %v284_v29 }
  0x38   : > { %1199 = vadd.xlane.f32.xlu2 %v1198_v33  ;;  %826 = vadd.xlane.f32.xlu1 %v825_v34  ;;  %v1213_v33 = vsel %vm1191_vm1, %v284_v29, 0.0  ;;  %v840_v34 = vsel %vm806_vm0, %v272_v31, 0.0  ;;  %v275_v31 = vld [vmem:[%s3099_s21 + $0x70] sm:$0xff] }
  0x39   : > { %1260 = vadd.xlane.f32.xlu0 %v1259_v35  ;;  %v1255_v35 = vmul.f32 %v292_v28, %v292_v28 }
  0x40   : > { %829 = vadd.xlane.f32.xlu2 %v828_v39  ;;  %1263 = vadd.xlane.f32.xlu1 %v1262_v40  ;;  %v3228_v40 = vld [vmem:[%s3225_s27] sm:$0xff] }
  0x41   : > { %890 = vadd.xlane.f32.xlu0 %v889_v41  ;;  %v294_v43 = vsel %vm293_vm2, %v3228_v40, 0.0  ;;  %v406_v44 = vmul.f32 %v3228_v40, %v3228_v40 }
  0x43   : > { %v422_v54 = vsel %vm293_vm2, %v406_v44, 0.0 }
  0x48   : > { %1266 = vadd.xlane.f32.xlu2 %v1265_v45  ;;  %893 = vadd.xlane.f32.xlu1 %v892_v46  ;;  %v1301_v45 = vsel %vm1191_vm1, %v1255_v35, 0.0  ;;  %v1277_v46 = vsel %vm1191_vm1, %v1247_v36, 0.0  ;;  %v1249_v35 = vmul.f32 %v286_v22, %v286_v22 }
  0x49   : > { %1202 = vadd.xlane.f32.xlu0 %v1201_v47  ;;  %v295_v47 = vrot.slane %v294_v43, 4 }
  0x50   : > { %1229 = vadd.xlane.f32.xlu2 %v1228_v51  ;;  %1205 = vadd.xlane.f32.xlu1 %v1204_v52  ;;  %v3250_v51 = vld [vmem:[%s5150_s3] sm:$0xff] }
  0x51   : > { %832 = vadd.xlane.f32.xlu0 %v831_v53  ;;  %1771 = vmatpush.msra.mxu1 %v3250_v51  ;;  %v296_v53 = vadd.f32 %v295_v47, %v294_v43  ;;  %v869_v47 = vmul.f32 %v275_v31, %v275_v31 }
  0x58   : > { %1293 = vadd.xlane.f32.xlu2 %v1292_v57  ;;  %1269 = vadd.xlane.f32.xlu1 %v1268_v58  ;;  %v297_v57 = vrot.slane %v296_v53, 2  ;;  %v423_v58 = vrot.slane %v422_v54, 4 }
  0x59   : > { %896 = vadd.xlane.f32.xlu0 %v895_v59 }
  0x5a   : > { %v424_v5 = vadd.f32 %v423_v58, %v422_v54  ;;  %v1581_v54 = vld [vmem:[%s5150_s3 + $0x28] sm:$0xff] }
  0x60   : > { %1232 = vadd.xlane.f32.xlu2 %v1231_v63  ;;  %1208 = vadd.xlane.f32.xlu1 %v1207_v3 }
  0x61   : > { %835 = vadd.xlane.f32.xlu0 %v834_v4  ;;  %v298_v4 = vadd.f32 %v297_v57, %v296_v53 }
  0x63   : > { %v299_v15 = vrot.slane %v298_v4, 1 }
  0x68   : > { %1296 = vadd.xlane.f32.xlu2 %v1295_v8  ;;  %1272 = vadd.xlane.f32.xlu1 %v1271_v9  ;;  %v846_v9 = vsel %vm806_vm0, %v274_v55, 0.0 }
  0x69   : > { %899 = vadd.xlane.f32.xlu0 %v898_v10  ;;  %v1216_v10 = vsel %vm1191_vm1, %v285_v56, 0.0 }
  0x70   : > { %1235 = vadd.xlane.f32.xlu2 %v1234_v16  ;;  %1211 = vadd.xlane.f32.xlu1 %v1210_v17  ;;  %v425_v16 = vrot.slane %v424_v5, 2 }
  0x71   : > { %838 = vadd.xlane.f32.xlu0 %v837_v19 }
  0x78   : > { %1299 = vadd.xlane.f32.xlu2 %v1298_v23  ;;  %1275 = vadd.xlane.f32.xlu1 %v1274_v25  ;;  %v867_v25 = vmul.f32 %v273_v61, %v273_v61  ;;  %v287_v61 = vld [vmem:[%s3137_s24 + $0x50] sm:$0xff] }
  0x79   : > { %902 = vadd.xlane.f32.xlu0 %v901_v27  ;;  %v300_v27 = vadd.f32 %v299_v15, %v298_v4  ;;  %v3327_v15 = vsel %vm1191_vm1, %v287_v61, 0.0 }
  0x7b   : > { %v3276_v36 = vmul.f32 0.125, %v300_v27  ;;  %v3342_v27 = vmul.f32 %v287_v61, %v287_v61 }
  0x7d   : > { %v566_v56 = vmul.f32 %v3276_v36, %v3276_v36 }
  0x80   : > { %1238 = vadd.xlane.f32.xlu2 %v1237_v32  ;;  %1214 = vadd.xlane.f32.xlu1 %v1213_v33  ;;  %v1583_v32 = vld [vmem:[%s5150_s3 + $0x38] sm:$0xff]  ;;  %v426_v33 = vadd.f32 %v425_v16, %v424_v5  ;;  %v3330_v16 = vsel %vm806_vm0, %v869_v47, 0.0 }
  0x81   : > { %841 = vadd.xlane.f32.xlu0 %v840_v34  ;;  %1653 = vmatpush.msra.mxu0 %v1583_v32 }
  0x82   : > { %2805 = vmatpush.msra.mxu3 %v1583_v32 }
  0x83   : > { %v815_v38 = vpop.xlane.xlu2 %814  ;;  %v812_v39 = vpop.xlane.xlu1 %811 }
  0x84   : > { %v809_v41 = vpop.xlane.xlu0 %808  ;;  %v3242_v48 = vmul.f32 0.0625, %v815_v38  ;;  %v3244_v49 = vmul.f32 0.0625, %v812_v39 }
  0x85   : > { %v3252_v52 = vmul.f32 0.0625, %v809_v41 }
  0x86   : > { %v937_v59 = vmul.f32 %v3242_v48, %v815_v38  ;;  %v936_v60 = vmul.f32 %v3244_v49, %v812_v39  ;;  %v1280_v38 = vsel %vm1191_vm1, %v1248_v21, 0.0  ;;  %v1582_v39 = vld [vmem:[%s5150_s3 + $0x30] sm:$0xff] }
  0x87   : > { %v935_v62 = vmul.f32 %v3252_v52, %v809_v41  ;;  %v427_v41 = vrot.slane %v426_v33, 1  ;;  %1654 = vmatpush.msra.mxu0 %v1582_v39  ;;  %2806 = vmatpush.msra.mxu3 %v1582_v39 }
  0x88   : > { %1302 = vadd.xlane.f32.xlu2 %v1301_v45  ;;  %1278 = vadd.xlane.f32.xlu1 %v1277_v46  ;;  %v907_v45 = vsel %vm806_vm0, %v867_v25, 0.0  ;;  %v3287_v46 = vsel %vm806_vm0, %v275_v31, 0.0 }
  0x89   : > { %905 = vadd.xlane.f32.xlu0 %v904_v50  ;;  %v3290_v50 = vld [vmem:[%s3225_s27 + $0x10] sm:$0xff]  ;;  %v428_v55 = vadd.f32 %v427_v41, %v426_v33  ;;  %1655 = vmatpush.msra.mxu0 %v1581_v54 }
  0x8a   : > { %v308_v57 = vsel %vm293_vm2, %v3290_v50, 0.0  ;;  %2807 = vmatpush.msra.mxu3 %v1581_v54 }
  0x8b   : > { %v879_v63 = vpop.xlane.xlu2 %878  ;;  %v876_v3 = vpop.xlane.xlu1 %875 }
  0x8c   : > { %v953_v6 = vsub.f32 %v879_v63, %v937_v59  ;;  %v952_v7 = vsub.f32 %v876_v3, %v936_v60  ;;  %v873_v8 = vpop.xlane.xlu0 %872  ;;  %v3303_v59 = vsel %vm1191_vm1, %v286_v22, 0.0  ;;  %v3306_v60 = vsel %vm1191_vm1, %v1249_v35, 0.0 }
  0x8d   : > { %v951_v11 = vsub.f32 %v873_v8, %v935_v62  ;;  %v276_v62 = vld [vmem:[%s3099_s21 + $0x78] sm:$0xff]  ;;  %v309_v63 = vrot.slane %v308_v57, 4  ;;  %v985_v3 = vsub.f32 %v3102_v0, %v3242_v48  ;;  %v984_v8 = vsub.f32 %v3105_v1, %v3244_v49 }
  0x8e   : > { %v969_v17 = vmul.f32 0.06666667, %v953_v6  ;;  %v968_v19 = vmul.f32 0.06666667, %v952_v7  ;;  %v870_v5 = vmul.f32 %v276_v62, %v276_v62  ;;  %v1580_v6 = vld [vmem:[%s5150_s3 + $0x20] sm:$0xff]  ;;  %v550_v7 = vmul.f32 0.125, %v428_v55 }
  0x8f   : > { %v967_v23 = vmul.f32 0.06666667, %v951_v11  ;;  %1656 = vmatpush.msra.mxu0 %v1580_v6  ;;  %v408_v11 = vmul.f32 %v3290_v50, %v3290_v50  ;;  %v310_v20 = vadd.f32 %v309_v63, %v308_v57  ;;  %v3340_v25 = vsel %vm806_vm0, %v276_v62, 0.0  ;;  %2808 = vmatpush.msra.mxu3 %v1580_v6  ;;  %v3364_v57 = vld [vmem:[%s3225_s27 + $0x20] sm:$0xff] }
  0x90   : > { %v3266_v28 = vadd.f32 1e-08, %v969_v17  ;;  %v3268_v29 = vadd.f32 1e-08, %v968_v19  ;;  %847 = vadd.xlane.f32.xlu2 %v846_v9  ;;  %1217 = vadd.xlane.f32.xlu1 %v1216_v10  ;;  %v983_v9 = vsub.f32 %v3108_v2, %v3252_v52  ;;  %v1579_v17 = vld [vmem:[%s5150_s3 + $0x18] sm:$0xff]  ;;  %v582_v19 = vsub.f32 %v550_v7, %v566_v56 }
  0x91   : > { %v3274_v34 = vadd.f32 1e-08, %v967_v23  ;;  %844 = vadd.xlane.f32.xlu0 %v843_v13  ;;  %1657 = vmatpush.msra.mxu0 %v1579_v17  ;;  %v3350_v35 = vsel %vm806_vm0, %v870_v5, 0.0  ;;  %v311_v56 = vrot.slane %v310_v20, 2 }
  0x92   : > { %2836 = vrsqrt.f32 %v3266_v28  ;;  %2809 = vmatpush.msra.mxu3 %v1579_v17  ;;  %vm1041_vm3 = vweird.f32 %v3266_v28  ;;  %vm1031_vm4 = vweird.f32 %v3268_v29 }
  0x93   : > { %2838 = vrsqrt.f32 %v3268_v29  ;;  %v821_v43 = vpop.xlane.xlu2 %820  ;;  %v882_v44 = vpop.xlane.xlu1 %881  ;;  %vm1021_vm5 = vweird.f32 %v3274_v34 }
  0x94   : > { %2840 = vrsqrt.f32 %v3274_v34  ;;  %v818_v53 = vpop.xlane.xlu0 %817  ;;  %v3312_v4 = vmul.f32 0.0625, %v821_v43 }
  0x95   : > { %v3300_v58 = vmul.f32 0.0625, %v818_v53 }
  0x96   : > { %v939_v33 = vmul.f32 %v3312_v4, %v821_v43  ;;  %v436_v43 = vsel %vm293_vm2, %v408_v11, 0.0 }
  0x97   : > { %v938_v10 = vmul.f32 %v3300_v58, %v818_v53 }
  0x98   : > { %v3324_v13 = vpop.eup %2836  ;;  %911 = vadd.xlane.f32.xlu2 %v910_v37  ;;  %1281 = vadd.xlane.f32.xlu1 %v1280_v38  ;;  %v1578_v37 = vld [vmem:[%s5150_s3 + $0x10] sm:$0xff]  ;;  %v3355_v38 = vadd.f32 1e-05, %v582_v19  ;;  %v322_v19 = vsel %vm293_vm2, %v3364_v57, 0.0 }
  0x99   : > { %v3335_v21 = vpop.eup %2838  ;;  %v1036_v22 = vmul.f32 %v3324_v13, %v3266_v28  ;;  %v954_v23 = vsub.f32 %v882_v44, %v938_v10  ;;  %908 = vadd.xlane.f32.xlu0 %v907_v45  ;;  %1658 = vmatpush.msra.mxu0 %v1578_v37  ;;  %v437_v10 = vrot.slane %v436_v43, 4  ;;  %vm1042_vm7 = vweird.f32 %v3324_v13 }
  0x9a   : > { %v3344_v31 = vpop.eup %2840  ;;  %v1026_v32 = vmul.f32 %v3335_v21, %v3268_v29  ;;  %2842 = vrsqrt.f32 %v3355_v38  ;;  %2810 = vmatpush.msra.mxu3 %v1578_v37  ;;  %vm1032_vm8 = vweird.f32 %v3335_v21  ;;  %vm3414_vm10 = vmor %vm1041_vm3, %vm1042_vm7  ;;  %vm636_vm3 = vweird.f32 %v3355_v38 }
  0x9b   : > { %v1037_v39 = vmul.f32 %v3324_v13, %v1036_v22  ;;  %v1016_v41 = vmul.f32 %v3344_v31, %v3274_v34  ;;  %v970_v44 = vmul.f32 0.06666667, %v954_v23  ;;  %v1258_v45 = vpop.xlane.xlu2 %1257  ;;  %v885_v47 = vpop.xlane.xlu1 %884  ;;  %vm1022_vm6 = vweird.f32 %v3344_v31  ;;  %vm3429_vm11 = vmor %vm1031_vm4, %vm1032_vm8 }
  0x9c   : > { %v1027_v53 = vmul.f32 %v3335_v21, %v1026_v32  ;;  %v955_v54 = vsub.f32 %v885_v47, %v939_v33  ;;  %v1194_v55 = vpop.xlane.xlu0 %1193  ;;  %2811 = vmatpush.msrb.mxu3 %v3233_v42  ;;  %vm1023_vm9 = vmor %vm1021_vm5, %vm1022_vm6 }
  0x9d   : > { %v1038_v61 = vmul.f32 0.5, %v1037_v39  ;;  %v1017_v62 = vmul.f32 %v3344_v31, %v1016_v41  ;;  %v3368_v63 = vadd.f32 1e-08, %v970_v44  ;;  %v3370_v5 = vmul.f32 0.020833334, %v1194_v55 }
  0x9e   : > { %v1028_v6 = vmul.f32 0.5, %v1027_v53  ;;  %v971_v7 = vmul.f32 0.06666667, %v955_v54  ;;  %v312_v39 = vadd.f32 %v311_v56, %v310_v20  ;;  %2812 = vmatpush.msrb.mxu3 %v3250_v51  ;;  %v987_v41 = vsub.f32 %v3131_v14, %v3312_v4  ;;  %v288_v51 = vld [vmem:[%s3137_s24 + $0x58] sm:$0xff] }
  0x9f   : > { %v1018_v11 = vmul.f32 0.5, %v1017_v62  ;;  %2844 = vrsqrt.f32 %v3368_v63  ;;  %v1320_v17 = vmul.f32 %v3370_v5, %v1194_v55  ;;  %v1039_v22 = vsub.f32 1.5, %v1038_v61 }
  0xa0   : > { %v1029_v23 = vsub.f32 1.5, %v1028_v6  ;;  %v3379_v32 = vadd.f32 1e-08, %v971_v7  ;;  %850 = vadd.xlane.f32.xlu1 %v3287_v46  ;;  %1284 = vadd.xlane.f32.xlu2 %v3306_v60  ;;  %v3386_v42 = vpop.eup %2842  ;;  %v438_v46 = vadd.f32 %v437_v10, %v436_v43  ;;  %v323_v44 = vrot.slane %v322_v19, 4 }
  0xa1   : > { %v1019_v33 = vsub.f32 1.5, %v1018_v11  ;;  %v1336_v37 = vsub.f32 %v1258_v45, %v1320_v17  ;;  %1220 = vadd.xlane.f32.xlu0 %v3303_v59  ;;  %v986_v60 = vsub.f32 %v3126_v12, %v3300_v58  ;;  %v1040_v54 = vmul.f32 %v3324_v13, %v1039_v22 }
  0xa2   : > { %2846 = vrsqrt.f32 %v3379_v32  ;;  %v1030_v53 = vmul.f32 %v3335_v21, %v1029_v23  ;;  %v1251_v55 = vmul.f32 %v288_v51, %v288_v51  ;;  %v313_v7 = vrot.slane %v312_v39, 1 }
  0xa3   : > { %v1352_v45 = vmul.f32 0.021276595, %v1336_v37  ;;  %v888_v47 = vpop.xlane.xlu2 %887  ;;  %v1197_v59 = vpop.xlane.xlu1 %1196  ;;  %v1020_v20 = vmul.f32 %v3344_v31, %v1019_v33  ;;  %v631_v17 = vmul.f32 %v3386_v42, %v3355_v38  ;;  %v3437_v2 = vadd.f32 %v323_v44, %v322_v19 }
  0xa4   : > { %v824_v43 = vpop.xlane.xlu0 %823  ;;  %v3434_v22 = vmul.f32 0.020833334, %v1197_v59  ;;  %v1034_v29 = vsel %vm3429_vm11, %v3335_v21, %v1030_v53  ;;  %v1044_v33 = vsel %vm3414_vm10, %v3324_v13, %v1040_v54  ;;  %v3453_v19 = vmul.f32 %v3364_v57, %v3364_v57 }
  0xa5   : > { %v3403_v56 = vpop.eup %2844  ;;  %v3405_v61 = vadd.f32 1e-08, %v1352_v45  ;;  %v3407_v62 = vmul.f32 0.0625, %v824_v43  ;;  %v1024_v6 = vsel %vm1023_vm9, %v3344_v31, %v1020_v20  ;;  %v439_v31 = vrot.slane %v438_v46, 2 }
  0xa6   : > { %v1046_v10 = vmul.f32 %v3403_v56, %v3368_v63  ;;  %v1175_v11 = vmul.f32 %v1024_v6, %v983_v9  ;;  %v1286_v9 = vsel %vm1191_vm1, %v3342_v27, 0.0  ;;  %v1225_v21 = vsel %vm1191_vm1, %v288_v51, 0.0 }
  0xa7   : > { %2848 = vrsqrt.f32 %v3405_v61  ;;  %v940_v23 = vmul.f32 %v3407_v62, %v824_v43  ;;  %v1368_v27 = vsub.f32 %v3145_v18, %v3370_v5  ;;  %v632_v13 = vmul.f32 %v3386_v42, %v631_v17 }
  0xa8   : > { %v3439_v52 = vpop.eup %2846  ;;  %2771 = vmatmul.msk.f32.vlgmr.msra.gmra.mxu1 %vm806_vm0, %v1175_v11  ;;  %1223 = vadd.xlane.f32.xlu1 %v3327_v15  ;;  %v1047_v37 = vmul.f32 %v3403_v56, %v1046_v10  ;;  %v314_v45 = vadd.f32 %v313_v7, %v312_v39  ;;  %v440_v20 = vadd.f32 %v439_v31, %v438_v46  ;;  %v3477_v46 = vsel %vm1191_vm1, %v1251_v55, 0.0 }
  0xa9   : > { %v1056_v15 = vmul.f32 %v3439_v52, %v3379_v32  ;;  %v956_v44 = vsub.f32 %v888_v47, %v940_v23  ;;  %914 = vadd.xlane.f32.xlu0 %v3330_v16  ;;  %853 = vadd.xlane.f32.xlu2 %v3340_v25  ;;  %v1321_v53 = vmul.f32 %v3434_v22, %v1197_v59  ;;  %v3059_v59 = vmov 0  }
  0xaa   : > { %v1369_v16 = vsub.f32 %v3161_v26, %v3434_v22  ;;  %v1176_v51 = vmul.f32 %v1034_v29, %v984_v8  ;;  %v3474_v39 = vmul.f32 %v1044_v33, %v985_v3  ;;  %2830 = vset.pattern.permute.xlu1 %v3059_v59  ;;  %2832 = vset.pattern.permute.xlu0 %v3059_v59  ;;  %v1048_v34 = vmul.f32 0.5, %v1047_v37 }
  0xab   : > { %v1057_v43 = vmul.f32 %v3439_v52, %v1056_v15  ;;  %v972_v54 = vmul.f32 0.06666667, %v956_v44  ;;  %v1200_v6 = vpop.xlane.xlu2 %1199  ;;  %v827_v47 = vpop.xlane.xlu1 %826  ;;  %vm1051_vm12 = vweird.f32 %v3368_v63  ;;  %v441_v1 = vrot.slane %v440_v20, 1  ;;  %2831 = vset.pattern.permute.xlu2 %v3059_v59 }
  0xac   : > { %v1261_v25 = vpop.xlane.xlu0 %1260  ;;  %v3486_v48 = vmul.f32 0.020833334, %v1200_v6  ;;  %v633_v49 = vmul.f32 0.5, %v632_v13  ;;  %v3488_v3 = vmul.f32 0.125, %v314_v45  ;;  %v3491_v55 = vmul.f32 0.0625, %v827_v47 }
  0xad   : > { %v3479_v7 = vpop.eup %2848  ;;  %v3481_v10 = vadd.f32 1e-08, %v972_v54  ;;  %v1337_v11 = vsub.f32 %v1261_v25, %v1321_v53  ;;  %v1058_v8 = vmul.f32 0.5, %v1057_v43  ;;  %v988_v28 = vsub.f32 %v3156_v24, %v3407_v62 }
  0xae   : > { %v1401_v0 = vmul.f32 %v3479_v7, %v3405_v61  ;;  %vm1406_vm13 = vweird.f32 %v3405_v61  ;;  %vm1052_vm14 = vweird.f32 %v3403_v56  ;;  %vm1061_vm15 = vweird.f32 %v3379_v32 }
  0xaf   : > { %2850 = vrsqrt.f32 %v3481_v10  ;;  %v1353_v17 = vmul.f32 0.021276595, %v1337_v11  ;;  %v1049_v29 = vsub.f32 1.5, %v1048_v34  ;;  %v442_v33 = vadd.f32 %v441_v1, %v440_v20  ;;  %vm3525_vm7 = vmor %vm1051_vm12, %vm1052_vm14 }
  0xb0   : > { %v1402_v31 = vmul.f32 %v3479_v7, %v1401_v0  ;;  %2772 = vmatmul.msk.f32.gmra.mxu1 %vm806_vm0, %v1176_v51  ;;  %917 = vadd.xlane.f32.xlu1 %v3350_v35  ;;  %vm1062_vm4 = vweird.f32 %v3439_v52  ;;  %v1322_v15 = vmul.f32 %v3486_v48, %v1200_v6  ;;  %v634_v35 = vsub.f32 1.5, %v633_v49 }
  0xb1   : > { %v3501_v23 = vadd.f32 1e-08, %v1353_v17  ;;  %1287 = vadd.xlane.f32.xlu0 %v1286_v9  ;;  %1226 = vadd.xlane.f32.xlu2 %v1225_v21  ;;  %v1059_v44 = vsub.f32 1.5, %v1058_v8  ;;  %v941_v13 = vmul.f32 %v3491_v55, %v827_v47  ;;  %v568_v9 = vmul.f32 %v3488_v3, %v3488_v3  ;;  %vm3565_vm10 = vmor %vm1061_vm15, %vm1062_vm4 }
  0xb2   : > { %v1403_v37 = vmul.f32 0.5, %v1402_v31  ;;  %v598_v20 = vsub.f32 %v3228_v40, %v3276_v36  ;;  %vm637_vm5 = vweird.f32 %v3386_v42  ;;  %vm1407_vm6 = vweird.f32 %v3479_v7 }
  0xb3   : > { %2852 = vrsqrt.f32 %v3501_v23  ;;  %v830_v45 = vpop.xlane.xlu2 %829  ;;  %v1264_v43 = vpop.xlane.xlu1 %1263  ;;  %v1050_v47 = vmul.f32 %v3403_v56, %v1049_v29  ;;  %v552_v51 = vmul.f32 0.125, %v442_v33  ;;  %v635_v36 = vmul.f32 %v3386_v42, %v634_v35  ;;  %vm3534_vm8 = vmor %vm636_vm3, %vm637_vm5 }
  0xb4   : > { %v1338_v21 = vsub.f32 %v1264_v43, %v1322_v15  ;;  %v891_v53 = vpop.xlane.xlu0 %890  ;;  %v1404_v54 = vsub.f32 1.5, %v1403_v37  ;;  %v3519_v34 = vmul.f32 0.0625, %v830_v45  ;;  %v1060_v49 = vmul.f32 %v3439_v52, %v1059_v44  ;;  %vm1408_vm9 = vmor %vm1406_vm13, %vm1407_vm6 }
  0xb5   : > { %v3513_v6 = vpop.eup %2850  ;;  %v957_v25 = vsub.f32 %v891_v53, %v941_v13  ;;  %v584_v17 = vsub.f32 %v552_v51, %v568_v9  ;;  %v1370_v31 = vsub.f32 %v3169_v30, %v3486_v48  ;;  %v325_v38 = vrot.slane %v3437_v2, 2 }
  0xb6   : > { %v1066_v59 = vmul.f32 %v3513_v6, %v3481_v10  ;;  %v1354_v11 = vmul.f32 0.021276595, %v1338_v21  ;;  %v1405_v0 = vmul.f32 %v3479_v7, %v1404_v54  ;;  %v1054_v35 = vsel %vm3525_vm7, %v3403_v56, %v1050_v47 }
  0xb7   : > { %v973_v1 = vmul.f32 0.06666667, %v957_v25  ;;  %v1064_v43 = vsel %vm3565_vm10, %v3439_v52, %v1060_v49  ;;  %v639_v9 = vsel %vm3534_vm8, %v3386_v42, %v635_v36  ;;  %v326_v54 = vadd.f32 %v325_v38, %v3437_v2 }
  0xb8   : > { %v1067_v63 = vmul.f32 %v3513_v6, %v1066_v59  ;;  %v3541_v29 = vadd.f32 1e-08, %v1354_v11  ;;  %2773 = vmatmul.msk.f32.gmra.mxu1 %vm806_vm0, %v3474_v39  ;;  %v1409_v15 = vsel %vm1408_vm9, %v3479_v7, %v1405_v0  ;;  %v3559_v39 = vadd.f32 1e-05, %v584_v17 }
  0xb9   : > { %v3550_v33 = vpop.eup %2852  ;;  %v3552_v37 = vadd.f32 1e-08, %v973_v1  ;;  %1290 = vadd.xlane.f32.xlu0 %v3477_v46  ;;  %v942_v7 = vmul.f32 %v3519_v34, %v830_v45  ;;  %v1560_v56 = vmul.f32 %v1409_v15, %v1368_v27  ;;  %vm1416_vm11 = vweird.f32 %v3501_v23 }
  0xba   : > { %v1068_v44 = vmul.f32 0.5, %v1067_v63  ;;  %v1411_v46 = vmul.f32 %v3550_v33, %v3501_v23  ;;  %2854 = vrsqrt.f32 %v3541_v29  ;;  %v1178_v5 = vmul.f32 %v1054_v35, %v986_v60 }
  0xbb   : > { %2856 = vrsqrt.f32 %v3552_v37  ;;  %v1267_v13 = vpop.xlane.xlu2 %1266  ;;  %v894_v32 = vpop.xlane.xlu1 %893  ;;  %2755 = vmatmul.msk.f32.vlgmr.msra.gmra.mxu0 %vm1191_vm1, %v1560_v56  ;;  %vm1071_vm12 = vweird.f32 %v3481_v10  ;;  %v450_v25 = vsel %vm293_vm2, %v3453_v19, 0.0  ;;  %v1179_v47 = vmul.f32 %v1064_v43, %v987_v41 }
  0xbc   : > { %v1412_v45 = vmul.f32 %v3550_v33, %v1411_v46  ;;  %v958_v21 = vsub.f32 %v894_v32, %v942_v7  ;;  %v1203_v53 = vpop.xlane.xlu0 %1202  ;;  %2858 = vrsqrt.f32 %v3559_v39  ;;  %v1069_v27 = vsub.f32 1.5, %v1068_v44 }
  0xbd   : > { %v3588_v18 = vmul.f32 0.020833334, %v1203_v53  ;;  %v790_v51 = vmul.f32 %v639_v9, %v598_v20  ;;  %vm1072_vm13 = vweird.f32 %v3513_v6  ;;  %v600_v19 = vsub.f32 %v3290_v50, %v3488_v3  ;;  %v3614_v20 = vld [vmem:[%s3225_s27 + $0x30] sm:$0xff] }
  0xbe   : > { %v1413_v42 = vmul.f32 0.5, %v1412_v45  ;;  %v974_v52 = vmul.f32 0.06666667, %v958_v21  ;;  %v327_v59 = vrot.slane %v326_v54, 1  ;;  %vm1417_vm14 = vweird.f32 %v3550_v33  ;;  %vm3650_vm5 = vmor %vm1071_vm12, %vm1072_vm13 }
  0xbf   : > { %v1323_v2 = vmul.f32 %v3588_v18, %v1203_v53  ;;  %v451_v41 = vrot.slane %v450_v25, 4  ;;  %vm1426_vm15 = vweird.f32 %v3541_v29  ;;  %v1070_v1 = vmul.f32 %v3513_v6, %v1069_v27  ;;  %vm3630_vm4 = vmor %vm1416_vm11, %vm1417_vm14 }
  0xc0   : > { %v3601_v12 = vpop.eup %2854  ;;  %v1414_v58 = vsub.f32 1.5, %v1413_v42  ;;  %v3603_v60 = vadd.f32 1e-08, %v974_v52  ;;  %2774 = vmatmul.msk.f32.gmra.mxu1 %vm806_vm0, %v1178_v5  ;;  %vm656_vm3 = vweird.f32 %v3559_v39  ;;  %v328_v44 = vadd.f32 %v327_v59, %v326_v54 }
  0xc1   : > { %v3608_v11 = vpop.eup %2856  ;;  %v1421_v14 = vmul.f32 %v3601_v12, %v3541_v29  ;;  %v1339_v4 = vsub.f32 %v1267_v13, %v1323_v2  ;;  %v3639_v46 = vsel %vm293_vm2, %v3614_v20, 0.0  ;;  %v452_v32 = vadd.f32 %v451_v41, %v450_v25 }
  0xc2   : > { %v3616_v40 = vpop.eup %2858  ;;  %v1076_v36 = vmul.f32 %v3608_v11, %v3552_v37  ;;  %2860 = vrsqrt.f32 %v3603_v60  ;;  %v1415_v63 = vmul.f32 %v3550_v33, %v1414_v58  ;;  %v1074_v21 = vsel %vm3650_vm5, %v3513_v6, %v1070_v1 }
  0xc3   : > { %v1422_v0 = vmul.f32 %v3601_v12, %v1421_v14  ;;  %v1355_v49 = vmul.f32 0.021276595, %v1339_v4  ;;  %v1230_v8 = vpop.xlane.xlu2 %1229  ;;  %v1206_v17 = vpop.xlane.xlu1 %1205  ;;  %v651_v61 = vmul.f32 %v3616_v40, %v3559_v39  ;;  %vm1427_vm6 = vweird.f32 %v3601_v12 }
  0xc4   : > { %v1077_v15 = vmul.f32 %v3608_v11, %v1076_v36  ;;  %v833_v35 = vpop.xlane.xlu0 %832  ;;  %v1419_v23 = vsel %vm3630_vm4, %v3550_v33, %v1415_v63  ;;  %v3654_v9 = vmul.f32 0.020833334, %v1230_v8  ;;  %v3656_v45 = vmul.f32 0.020833334, %v1206_v17  ;;  %vm3681_vm7 = vmor %vm1426_vm15, %vm1427_vm6 }
  0xc5   : > { %v1423_v7 = vmul.f32 0.5, %v1422_v0  ;;  %v3641_v56 = vadd.f32 1e-08, %v1355_v49  ;;  %v3663_v10 = vmul.f32 0.0625, %v833_v35  ;;  %v1561_v5 = vmul.f32 %v1419_v23, %v1369_v16 }
  0xc6   : > { %v1078_v43 = vmul.f32 0.5, %v1077_v15  ;;  %v652_v42 = vmul.f32 %v3616_v40, %v651_v61  ;;  %v337_v6 = vrot.slane %v3639_v46, 4  ;;  %v1180_v25 = vmul.f32 %v1074_v21, %v988_v28 }
  0xc7   : > { %v1424_v53 = vsub.f32 1.5, %v1423_v7  ;;  %2862 = vrsqrt.f32 %v3641_v56  ;;  %v453_v2 = vrot.slane %v452_v32, 2  ;;  %v1332_v22 = vmul.f32 %v3654_v9, %v1230_v8  ;;  %2756 = vmatmul.msk.f32.gmra.mxu0 %vm1191_vm1, %v1561_v5 }
  0xc8   : > { %v3665_v33 = vpop.eup %2860  ;;  %v1079_v54 = vsub.f32 1.5, %v1078_v43  ;;  %2775 = vmatmul.msk.f32.gmra.mxu1 %vm806_vm0, %v1179_v47  ;;  %v1324_v16 = vmul.f32 %v3656_v45, %v1206_v17  ;;  %v653_v47 = vmul.f32 0.5, %v652_v42  ;;  %vm657_vm8 = vweird.f32 %v3616_v40 }
  0xc9   : > { %v1086_v52 = vmul.f32 %v3665_v33, %v3603_v60  ;;  %1823 = vperm.xlu1 %2830, %v790_v51   ;;  %v1425_v27 = vmul.f32 %v3601_v12, %v1424_v53  ;;  %v943_v24 = vmul.f32 %v3663_v10, %v833_v35  ;;  %v454_v58 = vadd.f32 %v453_v2, %v452_v32  ;;  %vm3709_vm10 = vmor %vm656_vm3, %vm657_vm8 }
  0xca   : > { %vm1082_vm9 = vweird.f32 %v3608_v11  ;;  %v1080_v41 = vmul.f32 %v3608_v11, %v1079_v54  ;;  %v654_v49 = vsub.f32 1.5, %v653_v47  ;;  %v3701_v8 = vmul.f32 0.125, %v328_v44 }
  0xcb   : > { %v1087_v51 = vmul.f32 %v3665_v33, %v1086_v52  ;;  %v1294_v62 = vpop.xlane.xlu2 %1293  ;;  %v1270_v28 = vpop.xlane.xlu1 %1269  ;;  %v1429_v29 = vsel %vm3681_vm7, %v3601_v12, %v1425_v27  ;;  %v455_v15 = vrot.slane %v454_v58, 1  ;;  %vm1081_vm11 = vweird.f32 %v3552_v37  ;;  %v3028_v52 = vld [vmem:[%s3099_s21 + $0x30] sm:$0xff] }
  0xcc   : > { %v1348_v59 = vsub.f32 %v1294_v62, %v1332_v22  ;;  %v1340_v14 = vsub.f32 %v1270_v28, %v1324_v16  ;;  %v897_v4 = vpop.xlane.xlu0 %896  ;;  %v1562_v0 = vmul.f32 %v1429_v29, %v1370_v31  ;;  %v655_v31 = vmul.f32 %v3616_v40, %v654_v49  ;;  %vm3723_vm12 = vmor %vm1081_vm11, %vm1082_vm9  ;;  %v3029_v22 = vld [vmem:[%s3137_s24 + $0x18] sm:$0xff] }
  0xcd   : > { %v3696_v36 = vpop.eup %2862  ;;  %v959_v1 = vsub.f32 %v897_v4, %v943_v24  ;;  %v1088_v30 = vmul.f32 0.5, %v1087_v51  ;;  %v456_v39 = vadd.f32 %v455_v15, %v454_v58  ;;  %v570_v13 = vmul.f32 %v3701_v8, %v3701_v8  ;;  %v3030_v49 = vld [vmem:[%s3099_s21 + $0x38] sm:$0xff] }
  0xce   : > { %v1431_v12 = vmul.f32 %v3696_v36, %v3641_v56  ;;  %v1364_v17 = vmul.f32 0.021276595, %v1348_v59  ;;  %v1356_v63 = vmul.f32 0.021276595, %v1340_v14  ;;  %v659_v23 = vsel %vm3709_vm10, %v3616_v40, %v655_v31 }
  0xcf   : > { %v975_v48 = vmul.f32 0.06666667, %v959_v1  ;;  %2757 = vmatmul.msk.f32.gmra.mxu0 %vm1191_vm1, %v1562_v0  ;;  %v1084_v43 = vsel %vm3723_vm12, %v3608_v11, %v1080_v41  ;;  %v338_v21 = vadd.f32 %v337_v6, %v3639_v46  ;;  %v1089_v53 = vsub.f32 1.5, %v1088_v30 }
  0xd0   : > { %v1432_v35 = vmul.f32 %v3696_v36, %v1431_v12  ;;  %v3716_v61 = vadd.f32 1e-08, %v1364_v17  ;;  %v3718_v44 = vadd.f32 1e-08, %v1356_v63  ;;  %2776 = vmatmul.msk.f32.gmra.mxu1 %vm806_vm0, %v1180_v25  ;;  %v792_v40 = vmul.f32 %v659_v23, %v600_v19 }
  0xd1   : > { %v3727_v37 = vadd.f32 1e-08, %v975_v48  ;;  %v554_v42 = vmul.f32 0.125, %v456_v39  ;;  %v989_v27 = vsub.f32 %v3028_v52, %v3491_v55  ;;  %vm1437_vm13 = vweird.f32 %v3696_v36 }
  0xd2   : > { %v1433_v32 = vmul.f32 0.5, %v1432_v35  ;;  %2864 = vrsqrt.f32 %v3716_v61  ;;  %1833 = vperm.xlu0 %2832, %v792_v40   ;;  %v339_v2 = vrot.slane %v338_v21, 2  ;;  %vm1092_vm14 = vweird.f32 %v3665_v33 }
  0xd3   : > { %2866 = vrsqrt.f32 %v3718_v44  ;;  %v1233_v54 = vpop.xlane.xlu2 %1232  ;;  %v1209_v5 = vpop.xlane.xlu1 %1208  ;;  %v586_v11 = vsub.f32 %v554_v42, %v570_v13  ;;  %v1181_v6 = vmul.f32 %v1084_v43, %v989_v27  ;;  %v1090_v55 = vmul.f32 %v3665_v33, %v1089_v53  ;;  %v3803_v13 = vld [vmem:[%s3225_s27 + $0x8] sm:$0xff] }
  0xd4   : > { %2868 = vrsqrt.f32 %v3727_v37  ;;  %v1434_v25 = vsub.f32 1.5, %v1433_v32  ;;  %v3747_v46 = vmul.f32 0.020833334, %v1233_v54  ;;  %v836_v50 = vpop.xlane.xlu0 %835  ;;  %v1371_v16 = vsub.f32 %v3029_v22, %v3588_v18 }
  0xd5   : > { %v3751_v3 = vadd.f32 1e-05, %v586_v11  ;;  %v3759_v47 = vmul.f32 0.020833334, %v1209_v5  ;;  %vm1436_vm15 = vweird.f32 %v3641_v56  ;;  %vm1091_vm3 = vweird.f32 %v3603_v60 }
  0xd6   : > { %v1435_v19 = vmul.f32 %v3696_v36, %v1434_v25  ;;  %vm1438_vm4 = vmor %vm1436_vm15, %vm1437_vm13  ;;  %v412_v18 = vmul.f32 %v3614_v20, %v3614_v20  ;;  %v1333_v28 = vmul.f32 %v3747_v46, %v1233_v54  ;;  %v340_v58 = vadd.f32 %v339_v2, %v338_v21 }
  0xd7   : > { %2870 = vrsqrt.f32 %v3751_v3  ;;  %vm3777_vm5 = vmor %vm1091_vm3, %vm1092_vm14  ;;  %v990_v12 = vsub.f32 %v3030_v49, %v3519_v34  ;;  %v3795_v63 = vmul.f32 0.0625, %v836_v50  ;;  %v602_v43 = vsub.f32 %v3364_v57, %v3701_v8 }
  0xd8   : > { %v3755_v26 = vpop.eup %2864  ;;  %2777 = vmatmul.msk.f32.gmra.mxu1 %vm806_vm0, %v1181_v6  ;;  %v1439_v29 = vsel %vm1438_vm4, %v3696_v36, %v1435_v19  ;;  %v1094_v0 = vsel %vm3777_vm5, %v3665_v33, %v1090_v55  ;;  %v1325_v36 = vmul.f32 %v3759_v47, %v1209_v5  ;;  %v464_v15 = vsel %vm293_vm2, %v412_v18, 0.0 }
  0xd9   : > { %v3763_v51 = vpop.eup %2866  ;;  %v1521_v24 = vmul.f32 %v3755_v26, %v3716_v61  ;;  %v1563_v4 = vmul.f32 %v1439_v29, %v1371_v16  ;;  %v1182_v31 = vmul.f32 %v1094_v0, %v990_v12  ;;  %v341_v33 = vrot.slane %v340_v58, 1 }
  0xda   : > { %v3773_v62 = vpop.eup %2868  ;;  %v1441_v60 = vmul.f32 %v3763_v51, %v3718_v44  ;;  %v465_v7 = vrot.slane %v464_v15, 4  ;;  %v944_v32 = vmul.f32 %v3795_v63, %v836_v50  ;;  %v301_v6 = vsel %vm293_vm2, %v3803_v13, 0.0 }
  0xdb   : > { %v1522_v59 = vmul.f32 %v3755_v26, %v1521_v24  ;;  %v1096_v14 = vmul.f32 %v3773_v62, %v3727_v37  ;;  %v1297_v41 = vpop.xlane.xlu2 %1296  ;;  %v1273_v1 = vpop.xlane.xlu1 %1272  ;;  %2758 = vmatmul.msk.f32.gmra.mxu0 %vm1191_vm1, %v1563_v4  ;;  %v342_v52 = vadd.f32 %v341_v33, %v340_v58  ;;  %vm676_vm6 = vweird.f32 %v3751_v3 }
  0xdc   : > { %v1442_v17 = vmul.f32 %v3763_v51, %v1441_v60  ;;  %v1349_v38 = vsub.f32 %v1297_v41, %v1333_v28  ;;  %v1341_v48 = vsub.f32 %v1273_v1, %v1325_v36  ;;  %v900_v53 = vpop.xlane.xlu0 %899  ;;  %v466_v54 = vadd.f32 %v465_v7, %v464_v15  ;;  %v3031_v28 = vld [vmem:[%s3137_s24 + $0x60] sm:$0xff]  ;;  %v3878_v7 = vld [vmem:[%s3137_s24 + $0x68] sm:$0xff] }
  0xdd   : > { %v1097_v30 = vmul.f32 %v3773_v62, %v1096_v14  ;;  %v2871_v35 = vpop.eup %2870  ;;  %v1523_v39 = vmul.f32 0.5, %v1522_v59  ;;  %v960_v50 = vsub.f32 %v900_v53, %v944_v32  ;;  %vm1527_vm8 = vweird.f32 %v3755_v26  ;;  %v3032_v36 = vld [vmem:[%s3137_s24 + $0x20] sm:$0xff] }
  0xde   : > { %v1443_v34 = vmul.f32 0.5, %v1442_v17  ;;  %v671_v23 = vmul.f32 %v2871_v35, %v3751_v3  ;;  %v1365_v21 = vmul.f32 0.021276595, %v1349_v38  ;;  %v1357_v42 = vmul.f32 0.021276595, %v1341_v48  ;;  %v3856_v17 = vld [vmem:[%s3225_s27 + $0x40] sm:$0xff] }
  0xdf   : > { %v1098_v5 = vmul.f32 0.5, %v1097_v30  ;;  %v1524_v27 = vsub.f32 1.5, %v1523_v39  ;;  %v467_v11 = vrot.slane %v466_v54, 2  ;;  %vm677_vm7 = vweird.f32 %v2871_v35 }
  0xe0   : > { %2778 = vmatmul.msk.f32.gmra.mxu1 %vm806_vm0, %v1182_v31  ;;  %v672_v40 = vmul.f32 %v2871_v35, %v671_v23  ;;  %v1444_v25 = vsub.f32 1.5, %v1443_v34  ;;  %vm1447_vm9 = vweird.f32 %v3763_v51  ;;  %v3813_v57 = vadd.f32 1e-08, %v1365_v21  ;;  %vm3819_vm10 = vmor %vm676_vm6, %vm677_vm7  ;;  %v3033_v31 = vld [vmem:[%s3099_s21 + $0x40] sm:$0xff]  ;;  %v3891_v21 = vld [vmem:[%s3225_s27 + $0x68] sm:$0xff] }
  0xe1   : > { %v468_v8 = vadd.f32 %v467_v11, %v466_v54  ;;  %v1099_v19 = vsub.f32 1.5, %v1098_v5  ;;  %v3815_v22 = vadd.f32 1e-08, %v1357_v42  ;;  %v3817_v16 = vmul.f32 0.125, %v342_v52  ;;  %v3902_v42 = vld [vmem:[%s3099_s21 + $0x48] sm:$0xff] }
  0xe2   : > { %v673_v2 = vmul.f32 0.5, %v672_v40  ;;  %v1445_v18 = vmul.f32 %v3763_v51, %v1444_v25  ;;  %v1525_v56 = vmul.f32 %v3755_v26, %v1524_v27  ;;  %v302_v60 = vrot.slane %v301_v6, 4 }
  0xe3   : > { %v469_v3 = vrot.slane %v468_v8, 1  ;;  %v1380_v29 = vsub.f32 %v3031_v28, %v3654_v9  ;;  %vm1526_vm11 = vweird.f32 %v3716_v61  ;;  %v976_v59 = vmul.f32 0.06666667, %v960_v50  ;;  %v1236_v52 = vpop.xlane.xlu2 %1235 }
  0xe4   : > { %v674_v55 = vsub.f32 1.5, %v673_v2  ;;  %vm3830_vm12 = vmor %vm1526_vm11, %vm1527_vm8  ;;  %vm1446_vm13 = vweird.f32 %v3718_v44  ;;  %vm1102_vm14 = vweird.f32 %v3773_v62  ;;  %2872 = vrsqrt.f32 %v3813_v57 }
  0xe5   : > { %v470_v4 = vadd.f32 %v469_v3, %v468_v8  ;;  %vm3839_vm15 = vmor %vm1446_vm13, %vm1447_vm9  ;;  %2874 = vrsqrt.f32 %v3815_v22  ;;  %v572_v44 = vmul.f32 %v3817_v16, %v3817_v16  ;;  %v1100_v41 = vmul.f32 %v3773_v62, %v1099_v19 }
  0xe6   : > { %v675_v58 = vmul.f32 %v2871_v35, %v674_v55  ;;  %v1449_v0 = vsel %vm3839_vm15, %v3763_v51, %v1445_v18  ;;  %v1529_v49 = vsel %vm3830_vm12, %v3755_v26, %v1525_v56  ;;  %v303_v12 = vadd.f32 %v302_v60, %v301_v6  ;;  %v1212_v56 = vpop.xlane.xlu1 %1211 }
  0xe7   : > { %v1372_v38 = vsub.f32 %v3032_v36, %v3656_v45  ;;  %v3860_v15 = vadd.f32 1e-08, %v976_v59  ;;  %v556_v30 = vmul.f32 0.125, %v470_v4  ;;  %v407_v48 = vmul.f32 %v3803_v13, %v3803_v13 }
  0xe8   : > { %v679_v61 = vsel %vm3819_vm10, %v2871_v35, %v675_v58  ;;  %v991_v51 = vsub.f32 %v3033_v31, %v3663_v10  ;;  %vm1101_vm3 = vweird.f32 %v3727_v37  ;;  %v1572_v35 = vmul.f32 %v1529_v49, %v1380_v29  ;;  %v3883_v37 = vld [vmem:[%s3137_s24 + $0x28] sm:$0xff]  ;;  %v839_v29 = vpop.xlane.xlu0 %838 }
  0xe9   : > { %v794_v1 = vmul.f32 %v679_v61, %v602_v43  ;;  %vm3869_vm4 = vmor %vm1101_vm3, %vm1102_vm14  ;;  %v588_v45 = vsub.f32 %v556_v30, %v572_v44  ;;  %v1564_v33 = vmul.f32 %v1449_v0, %v1372_v38  ;;  %v350_v39 = vsel %vm293_vm2, %v3856_v17, 0.0 }
  0xea   : > { %v3875_v34 = vpop.eup %2872  ;;  %v1381_v10 = vsub.f32 %v3878_v7, %v3747_v46  ;;  %v1373_v23 = vsub.f32 %v3883_v37, %v3759_v47  ;;  %v1104_v32 = vsel %vm3869_vm4, %v3773_v62, %v1100_v41  ;;  %v304_v43 = vrot.slane %v303_v12, 2  ;;  %2767 = vmatmul.msk.f32.vlgmr.msra.gmra.mxu3 %vm1191_vm1, %v1572_v35  ;;  %v4078_v46 = vld [vmem:[%s3225_s27 + $0x18] sm:$0xff] }
  0xeb   : > { %1843 = vperm.xlu1 %2830, %v794_v1   ;;  %v3893_v53 = vpop.eup %2874  ;;  %2876 = vrsqrt.f32 %v3860_v15  ;;  %v3896_v54 = vadd.f32 1e-05, %v588_v45  ;;  %2759 = vmatmul.msk.f32.gmra.mxu0 %vm1191_vm1, %v1564_v33  ;;  %v1183_v5 = vmul.f32 %v1104_v32, %v991_v51  ;;  %v429_v40 = vsel %vm293_vm2, %v407_v48, 0.0 }
  0xec   : > { %v992_v62 = vsub.f32 %v3902_v42, %v3795_v63  ;;  %v305_v27 = vadd.f32 %v304_v43, %v303_v12  ;;  %v430_v25 = vrot.slane %v429_v40, 4  ;;  %v351_v11 = vrot.slane %v350_v39, 4 }
  0xed   : > { %2878 = vrsqrt.f32 %v3896_v54  ;;  %v3907_v6 = vmul.f32 0.020833334, %v1236_v52  ;;  %2779 = vmatmul.msk.f32.gmra.mxu1 %vm806_vm0, %v1183_v5  ;;  %v414_v2 = vmul.f32 %v3856_v17, %v3856_v17  ;;  %v385_v50 = vsel %vm293_vm2, %v3891_v21, 0.0 }
  0xee   : > { %v306_v8 = vrot.slane %v305_v27, 1  ;;  %v431_v19 = vadd.f32 %v430_v25, %v429_v40  ;;  %v352_v55 = vadd.f32 %v351_v11, %v350_v39  ;;  %v386_v24 = vrot.slane %v385_v50, 4 }
  0xef   : > { %v1531_v3 = vmul.f32 %v3875_v34, %v3813_v57  ;;  %v1451_v18 = vmul.f32 %v3893_v53, %v3815_v22  ;;  %v478_v60 = vsel %vm293_vm2, %v414_v2, 0.0  ;;  %v419_v28 = vmul.f32 %v3891_v21, %v3891_v21 }
  0xf0   : > { %v307_v58 = vadd.f32 %v306_v8, %v305_v27  ;;  %v432_v59 = vrot.slane %v431_v19, 2  ;;  %v353_v14 = vrot.slane %v352_v55, 2  ;;  %v479_v4 = vrot.slane %v478_v60, 4 }
  0xf1   : > { %v3921_v9 = vpop.eup %2876  ;;  %v604_v61 = vsub.f32 %v3614_v20, %v3817_v16  ;;  %v3925_v44 = vmul.f32 0.020833334, %v1212_v56  ;;  %v387_v41 = vadd.f32 %v386_v24, %v385_v50  ;;  %v513_v1 = vsel %vm293_vm2, %v419_v28, 0.0  ;;  %v1276_v28 = vpop.xlane.xlu1 %1275 }
  0xf2   : > { %v433_v0 = vadd.f32 %v432_v59, %v431_v19  ;;  %v3928_v49 = vmul.f32 0.125, %v307_v58  ;;  %v354_v12 = vadd.f32 %v353_v14, %v352_v55  ;;  %v480_v36 = vadd.f32 %v479_v4, %v478_v60  ;;  %v1300_v55 = vpop.xlane.xlu2 %1299 }
  0xf3   : > { %v2879_v38 = vpop.eup %2878  ;;  %v1532_v30 = vmul.f32 %v3875_v34, %v1531_v3  ;;  %v1334_v48 = vmul.f32 %v3907_v6, %v1236_v52  ;;  %v3932_v31 = vmul.f32 0.0625, %v839_v29  ;;  %v388_v51 = vrot.slane %v387_v41, 2  ;;  %v3945_v3 = vld [vmem:[%s3225_s27 + $0x60] sm:$0xff] }
  0xf4   : > { %v1452_v26 = vmul.f32 %v3893_v53, %v1451_v18  ;;  %v1106_v45 = vmul.f32 %v3921_v9, %v3860_v15  ;;  %v691_v33 = vmul.f32 %v2879_v38, %v3896_v54  ;;  %v434_v35 = vrot.slane %v433_v0, 1 }
  0xf5   : > { %v355_v39 = vrot.slane %v354_v12, 1  ;;  %v481_v32 = vrot.slane %v480_v36, 2  ;;  %v389_v43 = vadd.f32 %v388_v51, %v387_v41  ;;  %v514_v5 = vrot.slane %v513_v1, 4  ;;  %v903_v51 = vpop.xlane.xlu0 %902 }
  0xf6   : > { %v692_v40 = vmul.f32 %v2879_v38, %v691_v33  ;;  %v1326_v27 = vmul.f32 %v3925_v44, %v1212_v56  ;;  %v435_v52 = vadd.f32 %v434_v35, %v433_v0  ;;  %v567_v25 = vmul.f32 %v3928_v49, %v3928_v49 }
  0xf7   : > { %v3941_v11 = vmul.f32 0.5, %v1532_v30  ;;  %vm696_vm5 = vweird.f32 %v3896_v54  ;;  %v356_v2 = vadd.f32 %v355_v39, %v354_v12  ;;  %v482_v50 = vadd.f32 %v481_v32, %v480_v36 }
  0xf8   : > { %v693_v8 = vmul.f32 0.5, %v692_v40  ;;  %vm697_vm6 = vweird.f32 %v2879_v38  ;;  %v551_v19 = vmul.f32 0.125, %v435_v52  ;;  %v390_v24 = vrot.slane %v389_v43, 1 }
  0xf9   : > { %v1453_v18 = vmul.f32 0.5, %v1452_v26  ;;  %v483_v60 = vrot.slane %v482_v50, 1  ;;  %v3947_v56 = vmul.f32 0.125, %v356_v2  ;;  %v515_v58 = vadd.f32 %v514_v5, %v513_v1  ;;  %vm3953_vm7 = vmor %vm696_vm5, %vm697_vm6 }
  0xfa   : > { %v1107_v59 = vmul.f32 %v3921_v9, %v1106_v45  ;;  %v694_v14 = vsub.f32 1.5, %v693_v8  ;;  %v945_v4 = vmul.f32 %v3932_v31, %v839_v29  ;;  %v583_v41 = vsub.f32 %v551_v19, %v567_v25 }
  0xfb   : > { %v484_v12 = vadd.f32 %v483_v60, %v482_v50  ;;  %v574_v36 = vmul.f32 %v3947_v56, %v3947_v56  ;;  %v1350_v30 = vsub.f32 %v1300_v55, %v1334_v48  ;;  %v378_v1 = vsel %vm293_vm2, %v3945_v3, 0.0 }
  0xfc   : > { %v695_v26 = vmul.f32 %v2879_v38, %v694_v14  ;;  %v3961_v45 = vadd.f32 1e-05, %v583_v41  ;;  %v1342_v29 = vsub.f32 %v1276_v28, %v1326_v27  ;;  %v391_v33 = vadd.f32 %v390_v24, %v389_v43 }
  0xfd   : > { %v1454_v35 = vsub.f32 1.5, %v1453_v18  ;;  %v558_v54 = vmul.f32 0.125, %v484_v12  ;;  %v516_v39 = vrot.slane %v515_v58, 2  ;;  %v418_v32 = vmul.f32 %v3945_v3, %v3945_v3  ;;  %v4036_v47 = vpop.xlane.xlu0 %841 }
  0xfe   : > { %v699_v5 = vsel %vm3953_vm7, %v2879_v38, %v695_v26  ;;  %2880 = vrsqrt.f32 %v3961_v45  ;;  %v961_v48 = vsub.f32 %v903_v51, %v945_v4  ;;  %v379_v40 = vrot.slane %v378_v1, 4  ;;  %v1215_v26 = vpop.xlane.xlu1 %1214 }
  0xff   : > { %vm1536_vm8 = vweird.f32 %v3813_v57  ;;  %vm1456_vm9 = vweird.f32 %v3815_v22  ;;  %v796_v43 = vmul.f32 %v699_v5, %v604_v61  ;;  %v590_v27 = vsub.f32 %v558_v54, %v574_v36 }
 0x100   : > { %v1366_v52 = vmul.f32 0.021276595, %v1350_v30  ;;  %vm1457_vm10 = vweird.f32 %v3893_v53  ;;  %v1358_v25 = vmul.f32 0.021276595, %v1342_v29  ;;  %v517_v2 = vadd.f32 %v516_v39, %v515_v58 }
 0x101   : > { %v3974_v50 = vmul.f32 0.125, %v391_v33  ;;  %v1534_v38 = vsub.f32 1.5, %v3941_v11  ;;  %v1108_v8 = vmul.f32 0.5, %v1107_v59  ;;  %1853 = vperm.xlu1 %2830, %v796_v43   ;;  %v3977_v19 = vadd.f32 1e-05, %v590_v27  ;;  %vm3989_vm13 = vmor %vm1456_vm9, %vm1457_vm10 }
 0x102   : > { %v1455_v55 = vmul.f32 %v3893_v53, %v1454_v35  ;;  %vm1111_vm11 = vweird.f32 %v3860_v15  ;;  %v977_v20 = vmul.f32 0.06666667, %v961_v48  ;;  %v518_v16 = vrot.slane %v517_v2, 1 }
 0x103   : > { %v3981_v61 = vadd.f32 %v379_v40, %v378_v1  ;;  %v506_v24 = vsel %vm293_vm2, %v418_v32, 0.0  ;;  %vm1537_vm12 = vweird.f32 %v3875_v34  ;;  %vm1112_vm14 = vweird.f32 %v3921_v9 }
 0x104   : > { %2882 = vrsqrt.f32 %v3977_v19  ;;  %v3995_v18 = vadd.f32 1e-08, %v1366_v52  ;;  %v3997_v60 = vpop.eup %2880  ;;  %v3999_v28 = vadd.f32 1e-08, %v1358_v25  ;;  %v519_v58 = vadd.f32 %v518_v16, %v517_v2  ;;  %vm4024_vm3 = vmor %vm1536_vm8, %vm1537_vm12 }
 0x105   : > { %v579_v59 = vmul.f32 %v3974_v50, %v3974_v50  ;;  %v1459_v22 = vsel %vm3989_vm13, %v3893_v53, %v1455_v55  ;;  %v1109_v14 = vsub.f32 1.5, %v1108_v8  ;;  %v641_v4 = vmul.f32 %v3997_v60, %v3961_v45  ;;  %v1239_v53 = vpop.xlane.xlu2 %1238  ;;  %vm4052_vm5 = vmor %vm1111_vm11, %vm1112_vm14  ;;  %v4099_v55 = vld [vmem:[%s3225_s27 + $0x58] sm:$0xff] }
 0x106   : > { %v1535_v41 = vmul.f32 %v3875_v34, %v1534_v38  ;;  %v507_v0 = vrot.slane %v506_v24, 4  ;;  %v599_v12 = vsub.f32 %v3803_v13, %v3928_v49  ;;  %v4011_v36 = vadd.f32 1e-08, %v977_v20 }
 0x107   : > { %v563_v30 = vmul.f32 0.125, %v519_v58  ;;  %v381_v51 = vrot.slane %v3981_v61, 2  ;;  %v642_v1 = vmul.f32 %v3997_v60, %v641_v4  ;;  %vm646_vm15 = vweird.f32 %v3961_v45 }
 0x108   : > { %2884 = vrsqrt.f32 %v3995_v18  ;;  %v1565_v29 = vmul.f32 %v1459_v22, %v1373_v23  ;;  %v4029_v33 = vmul.f32 0.020833334, %v1239_v53  ;;  %v4031_v35 = vmul.f32 0.020833334, %v1215_v26 }
 0x109   : > { %2886 = vrsqrt.f32 %v3999_v28  ;;  %v595_v49 = vsub.f32 %v563_v30, %v579_v59  ;;  %v643_v39 = vmul.f32 0.5, %v642_v1  ;;  %vm647_vm4 = vweird.f32 %v3997_v60 }
 0x10a   : > { %v4033_v54 = vpop.eup %2882  ;;  %2760 = vmatmul.msk.f32.gmra.mxu0 %vm1191_vm1, %v1565_v29  ;;  %v1539_v57 = vsel %vm4024_vm3, %v3875_v34, %v1535_v41  ;;  %v1110_v37 = vmul.f32 %v3921_v9, %v1109_v14  ;;  %v606_v23 = vsub.f32 %v3856_v17, %v3947_v56  ;;  %2888 = vrsqrt.f32 %v4011_v36  ;;  %vm4065_vm6 = vmor %vm646_vm15, %vm647_vm4  ;;  %v4123_v41 = vld [vmem:[%s3225_s27 + $0x50] sm:$0xff] }
 0x10b   : > { %v711_v32 = vmul.f32 %v4033_v54, %v3977_v19  ;;  %v508_v5 = vadd.f32 %v507_v0, %v506_v24  ;;  %v644_v34 = vsub.f32 1.5, %v643_v39  ;;  %v611_v40 = vsub.f32 %v3891_v21, %v3974_v50 }
 0x10c   : > { %v4058_v43 = vadd.f32 1e-05, %v595_v49  ;;  %v1573_v17 = vmul.f32 %v1539_v57, %v1381_v10  ;;  %vm716_vm7 = vweird.f32 %v3977_v19  ;;  %v4072_v27 = vmul.f32 0.0625, %v4036_v47 }
 0x10d   : > { %v712_v15 = vmul.f32 %v4033_v54, %v711_v32  ;;  %v1114_v52 = vsel %vm4052_vm5, %v3921_v9, %v1110_v37  ;;  %v645_v10 = vmul.f32 %v3997_v60, %v644_v34  ;;  %v4085_v45 = vmul.f32 %v4029_v33, %v1239_v53 }
 0x10e   : > { %v4080_v7 = vpop.eup %2884  ;;  %2890 = vrsqrt.f32 %v4058_v43  ;;  %v4088_v25 = vmul.f32 %v4031_v35, %v1215_v26  ;;  %2768 = vmatmul.msk.f32.gmra.mxu3 %vm1191_vm1, %v1573_v17  ;;  %vm717_vm8 = vweird.f32 %v4033_v54  ;;  %v1184_v9 = vmul.f32 %v1114_v52, %v992_v62 }
 0x10f   : > { %v4091_v2 = vpop.eup %2886  ;;  %v713_v38 = vmul.f32 0.5, %v712_v15  ;;  %v382_v8 = vadd.f32 %v381_v51, %v3981_v61  ;;  %v649_v20 = vsel %vm4065_vm6, %v3997_v60, %v645_v10  ;;  %v509_v16 = vrot.slane %v508_v5, 2  ;;  %vm4113_vm9 = vmor %vm716_vm7, %vm717_vm8 }
 0x110   : > { %v315_v24 = vsel %vm293_vm2, %v4078_v46, 0.0  ;;  %v409_v11 = vmul.f32 %v4078_v46, %v4078_v46  ;;  %v4108_v58 = vpop.eup %2888  ;;  %v791_v63 = vmul.f32 %v649_v20, %v599_v12  ;;  %2780 = vmatmul.msk.f32.gmra.mxu1 %vm806_vm0, %v1184_v9  ;;  %v371_v14 = vsel %vm293_vm2, %v4099_v55, 0.0 }
 0x111   : > { %v714_v42 = vsub.f32 1.5, %v713_v38  ;;  %v383_v62 = vrot.slane %v382_v8, 1  ;;  %v316_v61 = vrot.slane %v315_v24, 4  ;;  %v510_v60 = vadd.f32 %v509_v16, %v508_v5 }
 0x112   : > { %v443_v22 = vsel %vm293_vm2, %v409_v11, 0.0  ;;  %v417_v4 = vmul.f32 %v4099_v55, %v4099_v55  ;;  %1828 = vperm.xlu2 %2831, %v791_v63   ;;  %vm766_vm10 = vweird.f32 %v4058_v43  ;;  %v372_v53 = vrot.slane %v371_v14, 4 }
 0x113   : > { %v715_v0 = vmul.f32 %v4033_v54, %v714_v42  ;;  %v384_v12 = vadd.f32 %v383_v62, %v382_v8  ;;  %v317_v19 = vadd.f32 %v316_v61, %v315_v24  ;;  %v444_v30 = vrot.slane %v443_v22, 4 }
 0x114   : > { %v2891_v51 = vpop.eup %2890  ;;  %v511_v1 = vrot.slane %v510_v60, 1  ;;  %v499_v26 = vsel %vm293_vm2, %v417_v4, 0.0  ;;  %v364_v39 = vsel %vm293_vm2, %v4123_v41, 0.0  ;;  %v373_v17 = vadd.f32 %v372_v53, %v371_v14 }
 0x115   : > { %v719_v29 = vsel %vm4113_vm9, %v4033_v54, %v715_v0  ;;  %v761_v13 = vmul.f32 %v2891_v51, %v4058_v43  ;;  %v4132_v49 = vmul.f32 0.125, %v384_v12  ;;  %v318_v32 = vrot.slane %v317_v19, 2 }
 0x116   : > { %v798_v57 = vmul.f32 %v719_v29, %v606_v23  ;;  %v512_v37 = vadd.f32 %v511_v1, %v510_v60  ;;  %v445_v5 = vadd.f32 %v444_v30, %v443_v22  ;;  %vm767_vm11 = vweird.f32 %v2891_v51  ;;  %v1303_v29 = vpop.xlane.xlu2 %1302 }
 0x117   : > { %v762_v48 = vmul.f32 %v2891_v51, %v761_v13  ;;  %v578_v34 = vmul.f32 %v4132_v49, %v4132_v49  ;;  %v319_v54 = vadd.f32 %v318_v32, %v317_v19  ;;  %v500_v52 = vrot.slane %v499_v26, 4  ;;  %vm4145_vm12 = vmor %vm766_vm10, %vm767_vm11  ;;  %v1279_v13 = vpop.xlane.xlu1 %1278 }
 0x118   : > { %1863 = vperm.xlu1 %2830, %v798_v57   ;;  %v562_v56 = vmul.f32 0.125, %v512_v37  ;;  %v446_v15 = vrot.slane %v445_v5, 2  ;;  %v374_v38 = vrot.slane %v373_v17, 2  ;;  %v365_v9 = vrot.slane %v364_v39, 4 }
 0x119   : > { %v763_v10 = vmul.f32 0.5, %v762_v48  ;;  %v416_v23 = vmul.f32 %v4123_v41, %v4123_v41  ;;  %v320_v20 = vrot.slane %v319_v54, 1  ;;  %v501_v24 = vadd.f32 %v500_v52, %v499_v26 }
 0x11a   : > { %v594_v8 = vsub.f32 %v562_v56, %v578_v34  ;;  %v447_v16 = vadd.f32 %v446_v15, %v445_v5  ;;  %v946_v63 = vmul.f32 %v4072_v27, %v4036_v47  ;;  %v375_v42 = vadd.f32 %v374_v38, %v373_v17  ;;  %v906_v5 = vpop.xlane.xlu0 %905 }
 0x11b   : > { %v764_v11 = vsub.f32 1.5, %v763_v10  ;;  %v366_v62 = vadd.f32 %v365_v9, %v364_v39  ;;  %v321_v60 = vadd.f32 %v320_v20, %v319_v54  ;;  %v502_v14 = vrot.slane %v501_v24, 2  ;;  %v4169_v54 = vld [vmem:[%s3137_s24 + $0x70] sm:$0xff] }
 0x11c   : > { %v4149_v59 = vadd.f32 1e-05, %v594_v8  ;;  %v448_v22 = vrot.slane %v447_v16, 1  ;;  %v376_v0 = vrot.slane %v375_v42, 1  ;;  %v492_v19 = vsel %vm293_vm2, %v416_v23, 0.0  ;;  %v4181_v20 = vld [vmem:[%s3137_s24 + $0x30] sm:$0xff] }
 0x11d   : > { %v765_v4 = vmul.f32 %v2891_v51, %v764_v11  ;;  %v367_v12 = vrot.slane %v366_v62, 2  ;;  %v1541_v47 = vmul.f32 %v4080_v7, %v3995_v18  ;;  %v4155_v30 = vmul.f32 0.125, %v321_v60 }
 0x11e   : > { %2892 = vrsqrt.f32 %v4149_v59  ;;  %v449_v43 = vadd.f32 %v448_v22, %v447_v16  ;;  %v377_v53 = vadd.f32 %v376_v0, %v375_v42  ;;  %v503_v26 = vadd.f32 %v502_v14, %v501_v24  ;;  %v4187_v42 = vld [vmem:[%s3099_s21 + $0x50] sm:$0xff] }
 0x11f   : > { %v769_v1 = vsel %vm4145_vm12, %v2891_v51, %v765_v4  ;;  %v368_v39 = vadd.f32 %v367_v12, %v366_v62  ;;  %v569_v32 = vmul.f32 %v4155_v30, %v4155_v30  ;;  %v493_v48 = vrot.slane %v492_v19, 4  ;;  %v4196_v12 = vld [vmem:[%s3225_s27 + $0x28] sm:$0xff] }
 0x120   : > { %v803_v57 = vmul.f32 %v769_v1, %v611_v40  ;;  %v553_v37 = vmul.f32 0.125, %v449_v43  ;;  %v504_v34 = vrot.slane %v503_v26, 1  ;;  %v4164_v17 = vmul.f32 0.125, %v377_v53 }
 0x121   : > { %v1351_v51 = vsub.f32 %v1303_v29, %v4085_v45  ;;  %v1343_v56 = vsub.f32 %v1279_v13, %v4088_v25  ;;  %v1382_v21 = vsub.f32 %v4169_v54, %v3907_v6  ;;  %v962_v40 = vsub.f32 %v906_v5, %v946_v63 }
 0x122   : > { %1888 = vperm.xlu1 %2830, %v803_v57   ;;  %v585_v50 = vsub.f32 %v553_v37, %v569_v32  ;;  %v1461_v15 = vmul.f32 %v4091_v2, %v3999_v28  ;;  %v505_v52 = vadd.f32 %v504_v34, %v503_v26  ;;  %v577_v10 = vmul.f32 %v4164_v17, %v4164_v17 }
 0x123   : > { %v369_v45 = vrot.slane %v368_v39, 1  ;;  %v1542_v25 = vmul.f32 %v4080_v7, %v1541_v47  ;;  %v1367_v23 = vmul.f32 0.021276595, %v1351_v51  ;;  %v494_v8 = vadd.f32 %v493_v48, %v492_v19 }
 0x124   : > { %v2893_v38 = vpop.eup %2892  ;;  %v4178_v9 = vadd.f32 1e-05, %v585_v50  ;;  %v1374_v16 = vsub.f32 %v4181_v20, %v3925_v44  ;;  %v561_v11 = vmul.f32 0.125, %v505_v52  ;;  %v1359_v63 = vmul.f32 0.021276595, %v1343_v56 }
 0x125   : > { %v751_v24 = vmul.f32 %v2893_v38, %v4149_v59  ;;  %v993_v62 = vsub.f32 %v4187_v42, %v3932_v31  ;;  %v1116_v61 = vmul.f32 %v4108_v58, %v4011_v36  ;;  %v978_v60 = vmul.f32 0.06666667, %v962_v40 }
 0x126   : > { %2894 = vrsqrt.f32 %v4178_v9  ;;  %v1462_v22 = vmul.f32 %v4091_v2, %v1461_v15  ;;  %v593_v4 = vsub.f32 %v561_v11, %v577_v10  ;;  %v370_v0 = vadd.f32 %v369_v45, %v368_v39 }
 0x127   : > { %v752_v14 = vmul.f32 %v2893_v38, %v751_v24  ;;  %v4198_v19 = vmul.f32 0.5, %v1542_v25  ;;  %vm756_vm13 = vweird.f32 %v4149_v59  ;;  %v4201_v47 = vadd.f32 1e-08, %v1367_v23 }
 0x128   : > { %v495_v43 = vrot.slane %v494_v8, 2  ;;  %vm757_vm14 = vweird.f32 %v2893_v38  ;;  %v4203_v53 = vadd.f32 1e-05, %v593_v4  ;;  %v4205_v26 = vadd.f32 1e-08, %v1359_v63 }
 0x129   : > { %v753_v1 = vmul.f32 0.5, %v752_v14  ;;  %v4207_v29 = vadd.f32 1e-08, %v978_v60  ;;  %v329_v39 = vsel %vm293_vm2, %v4196_v12, 0.0  ;;  %v411_v57 = vmul.f32 %v4196_v12, %v4196_v12  ;;  %vm4223_vm15 = vmor %vm756_vm13, %vm757_vm14  ;;  %v4245_v60 = vld [vmem:[%s3225_s27 + $0x78] sm:$0xff] }
 0x12a   : > { %v496_v13 = vadd.f32 %v495_v43, %v494_v8  ;;  %v1117_v37 = vmul.f32 %v4108_v58, %v1116_v61  ;;  %2896 = vrsqrt.f32 %v4203_v53  ;;  %v4215_v5 = vmul.f32 0.125, %v370_v0 }
 0x12b   : > { %v754_v32 = vsub.f32 1.5, %v753_v1  ;;  %v610_v34 = vsub.f32 %v3945_v3, %v4132_v49  ;;  %2898 = vrsqrt.f32 %v4201_v47  ;;  %v330_v50 = vrot.slane %v329_v39, 4 }
 0x12c   : > { %v4217_v48 = vpop.eup %2894  ;;  %v497_v56 = vrot.slane %v496_v13, 1  ;;  %2900 = vrsqrt.f32 %v4205_v26  ;;  %v457_v52 = vsel %vm293_vm2, %v411_v57, 0.0  ;;  %v1463_v10 = vmul.f32 0.5, %v1462_v22 }
 0x12d   : > { %v755_v40 = vmul.f32 %v2893_v38, %v754_v32  ;;  %v661_v15 = vmul.f32 %v4217_v48, %v4178_v9  ;;  %2902 = vrsqrt.f32 %v4207_v29  ;;  %v331_v49 = vadd.f32 %v330_v50, %v329_v39 }
 0x12e   : > { %v498_v3 = vadd.f32 %v497_v56, %v496_v13  ;;  %vm1466_vm3 = vweird.f32 %v3999_v28  ;;  %v576_v25 = vmul.f32 %v4215_v5, %v4215_v5  ;;  %vm1467_vm4 = vweird.f32 %v4091_v2 }
 0x12f   : > { %v759_v59 = vsel %vm4223_vm15, %v2893_v38, %v755_v40  ;;  %v662_v45 = vmul.f32 %v4217_v48, %v661_v15  ;;  %vm666_vm5 = vweird.f32 %v4178_v9  ;;  %v458_v8 = vrot.slane %v457_v52, 4  ;;  %vm4294_vm14 = vmor %vm1466_vm3, %vm1467_vm4 }
 0x130   : > { %v802_v23 = vmul.f32 %v759_v59, %v610_v34  ;;  %v4241_v24 = vpop.eup %2896  ;;  %vm667_vm6 = vweird.f32 %v4217_v48  ;;  %v560_v63 = vmul.f32 0.125, %v498_v3  ;;  %v332_v61 = vrot.slane %v331_v49, 2 }
 0x131   : > { %v663_v11 = vmul.f32 0.5, %v662_v45  ;;  %v4247_v38 = vpop.eup %2898  ;;  %v1544_v22 = vsub.f32 1.5, %v4198_v19  ;;  %vm1547_vm7 = vweird.f32 %v4080_v7  ;;  %v1464_v14 = vsub.f32 1.5, %v1463_v10  ;;  %vm4266_vm9 = vmor %vm666_vm5, %vm667_vm6  ;;  %v4335_v19 = vld [vmem:[%s3225_s27 + $0x38] sm:$0xff] }
 0x132   : > { %v4251_v4 = vmul.f32 0.5, %v1117_v37  ;;  %1883 = vperm.xlu0 %2832, %v802_v23   ;;  %v741_v0 = vmul.f32 %v4241_v24, %v4203_v53  ;;  %v4255_v43 = vpop.eup %2900  ;;  %v601_v1 = vsub.f32 %v4078_v46, %v4155_v30  ;;  %v592_v39 = vsub.f32 %v560_v63, %v576_v25 }
 0x133   : > { %v664_v13 = vsub.f32 1.5, %v663_v11  ;;  %v333_v57 = vadd.f32 %v332_v61, %v331_v49  ;;  %v4259_v32 = vpop.eup %2902  ;;  %vm1546_vm8 = vweird.f32 %v3995_v18  ;;  %vm746_vm10 = vweird.f32 %v4203_v53  ;;  %v845_v49 = vpop.xlane.xlu0 %844 }
 0x134   : > { %v742_v37 = vmul.f32 %v4241_v24, %v741_v0  ;;  %v459_v46 = vadd.f32 %v458_v8, %v457_v52  ;;  %v399_v30 = vsel %vm293_vm2, %v4245_v60, 0.0  ;;  %vm1122_vm11 = vweird.f32 %v4108_v58  ;;  %vm1548_vm4 = vmor %vm1546_vm8, %vm1547_vm7 }
 0x135   : > { %v665_v34 = vmul.f32 %v4217_v48, %v664_v13  ;;  %v1551_v51 = vmul.f32 %v4247_v38, %v4201_v47  ;;  %v4278_v9 = vadd.f32 1e-05, %v592_v39  ;;  %v334_v56 = vrot.slane %v333_v57, 1  ;;  %v848_v39 = vpop.xlane.xlu2 %847 }
 0x136   : > { %v743_v50 = vmul.f32 0.5, %v742_v37  ;;  %vm747_vm12 = vweird.f32 %v4241_v24  ;;  %v1471_v40 = vmul.f32 %v4255_v43, %v4205_v26  ;;  %v460_v15 = vrot.slane %v459_v46, 2 }
 0x137   : > { %vm1121_vm13 = vweird.f32 %v4011_v36  ;;  %v669_v52 = vsel %vm4266_vm9, %v4217_v48, %v665_v34  ;;  %v1126_v10 = vmul.f32 %v4259_v32, %v4207_v29  ;;  %2904 = vrsqrt.f32 %v4278_v9  ;;  %vm4306_vm15 = vmor %vm746_vm10, %vm747_vm12 }
 0x138   : > { %v335_v3 = vadd.f32 %v334_v56, %v333_v57  ;;  %v793_v59 = vmul.f32 %v669_v52, %v601_v1  ;;  %v744_v45 = vsub.f32 1.5, %v743_v50  ;;  %v461_v25 = vadd.f32 %v460_v15, %v459_v46  ;;  %v1218_v57 = vpop.xlane.xlu1 %1217  ;;  %v4351_v15 = vld [vmem:[%s3225_s27 + $0x48] sm:$0xff]  ;;  %vm1123_vm6 = vmor %vm1121_vm13, %vm1122_vm11 }
 0x139   : > { %v1465_v23 = vmul.f32 %v4091_v2, %v1464_v14  ;;  %v1119_v48 = vsub.f32 1.5, %v4251_v4  ;;  %v609_v8 = vsub.f32 %v4099_v55, %v4164_v17  ;;  %v608_v11 = vsub.f32 %v4123_v41, %v4215_v5 }
 0x13a   : > { %v4312_v63 = vmul.f32 0.125, %v335_v3  ;;  %1838 = vperm.xlu2 %2831, %v793_v59   ;;  %v745_v61 = vmul.f32 %v4241_v24, %v744_v45  ;;  %v462_v14 = vrot.slane %v461_v25, 1  ;;  %v1545_v17 = vmul.f32 %v4080_v7, %v1544_v22 }
 0x13b   : > { %v1469_v55 = vsel %vm4294_vm14, %v4091_v2, %v1465_v23  ;;  %v4320_v53 = vmul.f32 %v4247_v38, %v1551_v51  ;;  %v4323_v4 = vmul.f32 %v4255_v43, %v1471_v40  ;;  %v4326_v0 = vmul.f32 %v4259_v32, %v1126_v10  ;;  %v909_v5 = vpop.xlane.xlu0 %908 }
 0x13c   : > { %v400_v1 = vrot.slane %v399_v30, 4  ;;  %v749_v13 = vsel %vm4306_vm15, %v4241_v24, %v745_v61  ;;  %vm736_vm3 = vweird.f32 %v4278_v9  ;;  %v463_v2 = vadd.f32 %v462_v14, %v461_v25 }
 0x13d   : > { %v571_v22 = vmul.f32 %v4312_v63, %v4312_v63  ;;  %v2905_v37 = vpop.eup %2904  ;;  %v801_v46 = vmul.f32 %v749_v13, %v609_v8  ;;  %v4341_v34 = vmul.f32 0.0625, %v848_v39  ;;  %v4343_v24 = vmul.f32 0.020833334, %v1218_v57 }
 0x13e   : > { %v1566_v51 = vmul.f32 %v1469_v55, %v1374_v16  ;;  %v731_v56 = vmul.f32 %v2905_v37, %v4278_v9  ;;  %vm737_vm5 = vweird.f32 %v2905_v37  ;;  %v555_v50 = vmul.f32 0.125, %v463_v2  ;;  %v4394_v9 = vld [vmem:[%s3225_s27 + $0x70] sm:$0xff] }
 0x13f   : > { %v1549_v40 = vsel %vm1548_vm4, %v4080_v7, %v1545_v17  ;;  %1878 = vperm.xlu1 %2830, %v801_v46   ;;  %v1120_v52 = vmul.f32 %v4108_v58, %v1119_v48  ;;  %v401_v10 = vadd.f32 %v400_v1, %v399_v30  ;;  %v343_v44 = vsel %vm293_vm2, %v4335_v19, 0.0  ;;  %vm4386_vm7 = vmor %vm736_vm3, %vm737_vm5 }
 0x140   : > { %2761 = vmatmul.msk.f32.gmra.mxu0 %vm1191_vm1, %v1566_v51  ;;  %v1574_v18 = vmul.f32 %v1549_v40, %v1382_v21  ;;  %v732_v7 = vmul.f32 %v2905_v37, %v731_v56  ;;  %v587_v20 = vsub.f32 %v555_v50, %v571_v22  ;;  %v421_v16 = vmul.f32 %v4245_v60, %v4245_v60 }
 0x141   : > { %v344_v3 = vrot.slane %v343_v44, 4  ;;  %v1124_v6 = vsel %vm1123_vm6, %v4108_v58, %v1120_v52  ;;  %v402_v54 = vrot.slane %v401_v10, 2  ;;  %v413_v21 = vmul.f32 %v4335_v19, %v4335_v19 }
 0x142   : > { %2769 = vmatmul.msk.f32.gmra.mxu3 %vm1191_vm1, %v1574_v18  ;;  %v357_v30 = vsel %vm293_vm2, %v4351_v15, 0.0  ;;  %v733_v36 = vmul.f32 0.5, %v732_v7  ;;  %v4372_v59 = vadd.f32 1e-05, %v587_v20  ;;  %v1185_v45 = vmul.f32 %v1124_v6, %v993_v62  ;;  %v912_v6 = vpop.xlane.xlu2 %911 }
 0x143   : > { %v527_v25 = vsel %vm293_vm2, %v421_v16, 0.0  ;;  %v403_v23 = vadd.f32 %v402_v54, %v401_v10  ;;  %v345_v8 = vadd.f32 %v344_v3, %v343_v44  ;;  %v471_v58 = vsel %vm293_vm2, %v413_v21, 0.0  ;;  %v1282_v54 = vpop.xlane.xlu1 %1281 }
 0x144   : > { %v528_v48 = vrot.slane %v527_v25, 4  ;;  %v734_v28 = vsub.f32 1.5, %v733_v36  ;;  %2906 = vrsqrt.f32 %v4372_v59  ;;  %v4380_v61 = vmul.f32 0.0625, %v845_v49  ;;  %2781 = vmatmul.msk.f32.gmra.mxu1 %vm806_vm0, %v1185_v45 }
 0x145   : > { %v472_v14 = vrot.slane %v471_v58, 4  ;;  %v404_v42 = vrot.slane %v403_v23, 1  ;;  %v346_v55 = vrot.slane %v345_v8, 2  ;;  %v358_v17 = vrot.slane %v357_v30, 4 }
 0x146   : > { %v529_v62 = vadd.f32 %v528_v48, %v527_v25  ;;  %v735_v1 = vmul.f32 %v2905_v37, %v734_v28  ;;  %v948_v13 = vmul.f32 %v4341_v34, %v848_v39  ;;  %v415_v22 = vmul.f32 %v4351_v15, %v4351_v15 }
 0x147   : > { %v473_v2 = vadd.f32 %v472_v14, %v471_v58  ;;  %v405_v46 = vadd.f32 %v404_v42, %v403_v23  ;;  %v347_v56 = vadd.f32 %v346_v55, %v345_v8  ;;  %v359_v50 = vadd.f32 %v358_v17, %v357_v30 }
 0x148   : > { %v530_v51 = vrot.slane %v529_v62, 2  ;;  %v739_v40 = vsel %vm4386_vm7, %v2905_v37, %v735_v1  ;;  %v1328_v18 = vmul.f32 %v4343_v24, %v1218_v57  ;;  %v947_v52 = vmul.f32 %v4380_v61, %v845_v49 }
 0x149   : > { %v474_v10 = vrot.slane %v473_v2, 2  ;;  %v800_v39 = vmul.f32 %v739_v40, %v608_v11  ;;  %v4403_v7 = vmul.f32 0.125, %v405_v46  ;;  %v348_v20 = vrot.slane %v347_v56, 1 }
 0x14a   : > { %v531_v44 = vadd.f32 %v530_v51, %v529_v62  ;;  %v2907_v16 = vpop.eup %2906  ;;  %vm686_vm8 = vweird.f32 %v4372_v59  ;;  %v360_v37 = vrot.slane %v359_v50, 2  ;;  %v392_v57 = vsel %vm293_vm2, %v4394_v9, 0.0 }
 0x14b   : > { %v475_v3 = vadd.f32 %v474_v10, %v473_v2  ;;  %1873 = vperm.xlu0 %2832, %v800_v39   ;;  %v681_v49 = vmul.f32 %v2907_v16, %v4372_v59  ;;  %vm687_vm9 = vweird.f32 %v2907_v16  ;;  %v485_v11 = vsel %vm293_vm2, %v415_v22, 0.0 }
 0x14c   : > { %v532_v41 = vrot.slane %v531_v44, 1  ;;  %v581_v21 = vmul.f32 %v4403_v7, %v4403_v7  ;;  %v349_v30 = vadd.f32 %v348_v20, %v347_v56  ;;  %v964_v45 = vsub.f32 %v912_v6, %v948_v13  ;;  %vm4427_vm10 = vmor %vm686_vm8, %vm687_vm9 }
 0x14d   : > { %v476_v36 = vrot.slane %v475_v3, 1  ;;  %v682_v25 = vmul.f32 %v2907_v16, %v681_v49  ;;  %v1344_v48 = vsub.f32 %v1282_v54, %v1328_v18  ;;  %v963_v8 = vsub.f32 %v909_v5, %v947_v52 }
 0x14e   : > { %v533_v23 = vadd.f32 %v532_v41, %v531_v44  ;;  %v4412_v28 = vmul.f32 0.125, %v349_v30  ;;  %v980_v14 = vmul.f32 0.06666667, %v964_v45  ;;  %v361_v31 = vadd.f32 %v360_v37, %v359_v50  ;;  %v4458_v30 = vld [vmem:[%s3099_s21 + $0x58] sm:$0xff] }
 0x14f   : > { %v477_v58 = vadd.f32 %v476_v36, %v475_v3  ;;  %v683_v42 = vmul.f32 0.5, %v682_v25  ;;  %v1360_v55 = vmul.f32 0.021276595, %v1344_v48  ;;  %v979_v17 = vmul.f32 0.06666667, %v963_v8 }
 0x150   : > { %v565_v62 = vmul.f32 0.125, %v533_v23  ;;  %v573_v2 = vmul.f32 %v4412_v28, %v4412_v28  ;;  %v4416_v22 = vadd.f32 1e-08, %v980_v14  ;;  %v486_v13 = vrot.slane %v485_v11, 4 }
 0x151   : > { %v557_v1 = vmul.f32 0.125, %v477_v58  ;;  %v684_v46 = vsub.f32 1.5, %v683_v42  ;;  %v4418_v56 = vadd.f32 1e-08, %v1360_v55  ;;  %v4420_v40 = vadd.f32 1e-08, %v979_v17 }
 0x152   : > { %v597_v51 = vsub.f32 %v565_v62, %v581_v21  ;;  %v603_v50 = vsub.f32 %v4196_v12, %v4312_v63  ;;  %2908 = vrsqrt.f32 %v4416_v22  ;;  %v362_v10 = vrot.slane %v361_v31, 1  ;;  %v4436_v12 = vld [vmem:[%s3137_s24 + $0x78] sm:$0xff] }
 0x153   : > { %v589_v52 = vsub.f32 %v557_v1, %v573_v2  ;;  %v685_v39 = vmul.f32 %v2907_v16, %v684_v46  ;;  %2910 = vrsqrt.f32 %v4418_v56  ;;  %v393_v20 = vrot.slane %v392_v57, 4 }
 0x154   : > { %v4432_v44 = vadd.f32 1e-05, %v597_v51  ;;  %v1383_v63 = vsub.f32 %v4436_v12, %v4029_v33  ;;  %v1553_v59 = vmul.f32 0.5, %v4320_v53  ;;  %2912 = vrsqrt.f32 %v4420_v40  ;;  %v4453_v53 = vld [vmem:[%s3137_s24 + $0x38] sm:$0xff] }
 0x155   : > { %v4441_v3 = vadd.f32 1e-05, %v589_v52  ;;  %v1473_v6 = vmul.f32 0.5, %v4323_v4  ;;  %v689_v54 = vsel %vm4427_vm10, %v2907_v16, %v685_v39  ;;  %v487_v37 = vadd.f32 %v486_v13, %v485_v11 }
 0x156   : > { %2914 = vrsqrt.f32 %v4432_v44  ;;  %v4449_v49 = vmul.f32 0.5, %v4326_v0  ;;  %v795_v41 = vmul.f32 %v689_v54, %v603_v50  ;;  %v363_v5 = vadd.f32 %v362_v10, %v361_v31 }
 0x157   : > { %2916 = vrsqrt.f32 %v4441_v3  ;;  %v1375_v21 = vsub.f32 %v4453_v53, %v4031_v35  ;;  %v994_v4 = vsub.f32 %v4458_v30, %v4072_v27  ;;  %v488_v16 = vrot.slane %v487_v37, 2 }
 0x158   : > { %v394_v36 = vadd.f32 %v393_v20, %v392_v57  ;;  %v4462_v11 = vpop.eup %2908  ;;  %vm1556_vm11 = vweird.f32 %v4201_v47  ;;  %vm1557_vm12 = vweird.f32 %v4247_v38  ;;  %vm1476_vm13 = vweird.f32 %v4205_v26  ;;  %1848 = vperm.xlu2 %2831, %v795_v41  }
 0x159   : > { %vm1477_vm14 = vweird.f32 %v4255_v43  ;;  %vm1132_vm15 = vweird.f32 %v4259_v32  ;;  %v4469_v0 = vpop.eup %2910  ;;  %v1554_v45 = vsub.f32 1.5, %v1553_v59  ;;  %v1474_v25 = vsub.f32 1.5, %v1473_v6  ;;  %vm4513_vm9 = vmor %vm1556_vm11, %vm1557_vm12 }
 0x15a   : > { %vm1131_vm3 = vweird.f32 %v4207_v29  ;;  %v1146_v57 = vmul.f32 %v4462_v11, %v4416_v22  ;;  %v489_v23 = vadd.f32 %v488_v16, %v487_v37  ;;  %v4474_v48 = vpop.eup %2912  ;;  %v1129_v8 = vsub.f32 1.5, %v4449_v49  ;;  %vm4503_vm7 = vmor %vm1476_vm13, %vm1477_vm14 }
 0x15b   : > { %v613_v58 = vsub.f32 %v4245_v60, %v4403_v7  ;;  %v1481_v14 = vmul.f32 %v4469_v0, %v4418_v56  ;;  %v4481_v31 = vmul.f32 0.125, %v363_v5  ;;  %v605_v62 = vsub.f32 %v4335_v19, %v4412_v28  ;;  %v1221_v28 = vpop.xlane.xlu0 %1220  ;;  %vm4527_vm10 = vmor %vm1131_vm3, %vm1132_vm15 }
 0x15c   : > { %v2915_v42 = vpop.eup %2914  ;;  %v1147_v55 = vmul.f32 %v4462_v11, %v1146_v57  ;;  %v490_v17 = vrot.slane %v489_v23, 1  ;;  %v395_v1 = vrot.slane %v394_v36, 2  ;;  %vm786_vm4 = vweird.f32 %v4432_v44 }
 0x15d   : > { %v2917_v2 = vpop.eup %2916  ;;  %v781_v13 = vmul.f32 %v2915_v42, %v4432_v44  ;;  %vm706_vm5 = vweird.f32 %v4441_v3  ;;  %v420_v46 = vmul.f32 %v4394_v9, %v4394_v9  ;;  %v1482_v50 = vmul.f32 %v4469_v0, %v1481_v14 }
 0x15e   : > { %v701_v51 = vmul.f32 %v2917_v2, %v4441_v3  ;;  %v1136_v19 = vmul.f32 %v4474_v48, %v4420_v40  ;;  %v1475_v18 = vmul.f32 %v4255_v43, %v1474_v25  ;;  %v1148_v10 = vmul.f32 0.5, %v1147_v55 }
 0x15f   : > { %v782_v52 = vmul.f32 %v2915_v42, %v781_v13  ;;  %v491_v39 = vadd.f32 %v490_v17, %v489_v23  ;;  %v575_v20 = vmul.f32 %v4481_v31, %v4481_v31  ;;  %vm787_vm6 = vweird.f32 %v2915_v42 }
 0x160   : > { %v702_v59 = vmul.f32 %v2917_v2, %v701_v51  ;;  %v1555_v6 = vmul.f32 %v4247_v38, %v1554_v45  ;;  %v396_v54 = vadd.f32 %v395_v1, %v394_v36  ;;  %vm707_vm8 = vweird.f32 %v2917_v2  ;;  %vm4535_vm11 = vmor %vm786_vm4, %vm787_vm6  ;;  %v1285_v1 = vpop.xlane.xlu2 %1284 }
 0x161   : > { %v783_v49 = vmul.f32 0.5, %v782_v52  ;;  %v559_v41 = vmul.f32 0.125, %v491_v39  ;;  %v4507_v5 = vmul.f32 0.020833334, %v1221_v28  ;;  %v4517_v45 = vmul.f32 0.5, %v1482_v50  ;;  %vm4549_vm12 = vmor %vm706_vm5, %vm707_vm8 }
 0x162   : > { %v703_v36 = vmul.f32 0.5, %v702_v59  ;;  %v1137_v26 = vmul.f32 %v4474_v48, %v1136_v19  ;;  %v1479_v25 = vsel %vm4503_vm7, %v4255_v43, %v1475_v18  ;;  %v1149_v23 = vsub.f32 1.5, %v1148_v10 }
 0x163   : > { %v784_v47 = vsub.f32 1.5, %v783_v49  ;;  %v591_v14 = vsub.f32 %v559_v41, %v575_v20  ;;  %v1329_v55 = vmul.f32 %v4507_v5, %v1221_v28  ;;  %v1567_v29 = vmul.f32 %v1479_v25, %v1375_v21  ;;  %v851_v28 = vpop.xlane.xlu1 %850  ;;  %v915_v41 = vpop.xlane.xlu0 %914 }
 0x164   : > { %v704_v43 = vsub.f32 1.5, %v703_v36  ;;  %v1559_v13 = vsel %vm4513_vm9, %v4247_v38, %v1555_v6  ;;  %v1130_v51 = vmul.f32 %v4259_v32, %v1129_v8  ;;  %v397_v3 = vrot.slane %v396_v54, 1 }
 0x165   : > { %v785_v50 = vmul.f32 %v2915_v42, %v784_v47  ;;  %v4553_v19 = vadd.f32 1e-05, %v591_v14  ;;  %v1345_v18 = vsub.f32 %v1285_v1, %v1329_v55  ;;  %v1575_v35 = vmul.f32 %v1559_v13, %v1383_v63  ;;  %2762 = vmatmul.msk.f32.gmra.mxu0 %vm1191_vm1, %v1567_v29 }
 0x166   : > { %v705_v53 = vmul.f32 %v2917_v2, %v704_v43  ;;  %v1134_v38 = vsel %vm4527_vm10, %v4259_v32, %v1130_v51  ;;  %v520_v21 = vsel %vm293_vm2, %v420_v46, 0.0  ;;  %v1138_v52 = vmul.f32 0.5, %v1137_v26  ;;  %v3045_v51 = vld [vmem:[%s3099_s21 + $0x60] sm:$0xff] }
 0x167   : > { %v789_v8 = vsel %vm4535_vm11, %v2915_v42, %v785_v50  ;;  %2918 = vrsqrt.f32 %v4553_v19  ;;  %v1361_v10 = vmul.f32 0.021276595, %v1345_v18  ;;  %2770 = vmatmul.msk.f32.gmra.mxu3 %vm1191_vm1, %v1575_v35  ;;  %v1186_v32 = vmul.f32 %v1134_v38, %v994_v4  ;;  %v1591_v18 = vld [vmem:[%s5150_s3 + $0x78] sm:$0xff]  ;;  %v1590_v35 = vld [vmem:[%s5150_s3 + $0x70] sm:$0xff] }
 0x168   : > { %v805_v33 = vmul.f32 %v789_v8, %v613_v58  ;;  %v709_v12 = vsel %vm4549_vm12, %v2917_v2, %v705_v53  ;;  %v521_v46 = vrot.slane %v520_v21, 4  ;;  %vm1152_vm2 = vweird.f32 %v4462_v11  ;;  %v3043_v58 = vld [vmem:[%s3099_s21 + $0x68] sm:$0xff]  ;;  %v3044_v2 = vld [vmem:[%s3137_s24 + $0x40] sm:$0xff]  ;;  %v854_v47 = vpop.xlane.xlu2 %853  ;;  %2008 = vmatpush.msra.mxu2 %v1591_v18  ;;  %2813 = vmatpush.msra.mxu3 %v1591_v18 }
 0x169   : > { %v797_v63 = vmul.f32 %v709_v12, %v605_v62  ;;  %v4575_v42 = vadd.f32 1e-08, %v1361_v10  ;;  %v1484_v39 = vsub.f32 1.5, %v4517_v45  ;;  %v4579_v60 = vmul.f32 0.0625, %v851_v28  ;;  %2782 = vmatmul.msk.f32.gmra.mxu1 %vm806_vm0, %v1186_v32  ;;  %v4668_v10 = vpop.f32.mrf.mxu0 }
 0x16a   : > { %1898 = vperm.xlu0 %2832, %v805_v33   ;;  %v398_v7 = vadd.f32 %v397_v3, %v396_v54  ;;  %v1150_v27 = vmul.f32 %v4462_v11, %v1149_v23  ;;  %v1139_v30 = vsub.f32 1.5, %v1138_v52  ;;  %v522_v4 = vadd.f32 %v521_v46, %v520_v21  ;;  %v1589_v33 = vld [vmem:[%s5150_s3 + $0x68] sm:$0xff]  ;;  %2009 = vmatpush.msra.mxu2 %v1590_v35 }
 0x16b   : > { %1858 = vperm.xlu2 %2831, %v797_v63   ;;  %2920 = vrsqrt.f32 %v4575_v42  ;;  %v996_v62 = vsub.f32 %v3043_v58, %v4341_v34  ;;  %v1376_v20 = vsub.f32 %v3044_v2, %v4343_v24  ;;  %vm1151_vm13 = vweird.f32 %v4416_v22  ;;  %v1224_v49 = vpop.xlane.xlu1 %1223  ;;  %v1288_v46 = vpop.xlane.xlu0 %1287  ;;  %2814 = vmatpush.msra.mxu3 %v1590_v35 }
 0x16c   : > { %vm1486_vm14 = vweird.f32 %v4418_v56  ;;  %vm1487_vm15 = vweird.f32 %v4469_v0  ;;  %vm1141_vm3 = vweird.f32 %v4420_v40  ;;  %v523_v6 = vrot.slane %v522_v4, 2  ;;  %vm4596_vm4 = vmor %vm1151_vm13, %vm1152_vm2  ;;  %v4639_v40 = vpop.f32.mrf.mxu1  ;;  %2010 = vmatpush.msra.mxu2 %v1589_v33 }
 0x16d   : > { %v4589_v59 = vpop.eup %2918  ;;  %vm1142_vm5 = vweird.f32 %v4474_v48  ;;  %v949_v24 = vmul.f32 %v4579_v60, %v851_v28  ;;  %v4604_v22 = vmul.f32 0.125, %v398_v7  ;;  %v1485_v16 = vmul.f32 %v4469_v0, %v1484_v39  ;;  %vm4613_vm6 = vmor %vm1486_vm14, %vm1487_vm15  ;;  %v1588_v39 = vld [vmem:[%s5150_s3 + $0x60] sm:$0xff]  ;;  %2815 = vmatpush.msra.mxu3 %v1589_v33 }
 0x16e   : > { %v721_v34 = vmul.f32 %v4589_v59, %v4553_v19  ;;  %v524_v37 = vadd.f32 %v523_v6, %v522_v4  ;;  %v1140_v36 = vmul.f32 %v4474_v48, %v1139_v30  ;;  %v1154_v45 = vsel %vm4596_vm4, %v4462_v11, %v1150_v27  ;;  %vm4625_vm8 = vmor %vm1141_vm3, %vm1142_vm5  ;;  %2011 = vmatpush.msra.mxu2 %v1588_v39 }
 0x16f   : > { %vm726_vm7 = vweird.f32 %v4553_v19  ;;  %v965_v57 = vsub.f32 %v915_v41, %v949_v24  ;;  %v1188_v23 = vmul.f32 %v1154_v45, %v996_v62  ;;  %vm727_vm9 = vweird.f32 %v4589_v59  ;;  %v3046_v24 = vld [vmem:[%s3137_s24 + $0x48] sm:$0xff]  ;;  %2816 = vmatpush.msra.mxu3 %v1588_v39 }
 0x170   : > { %v722_v25 = vmul.f32 %v4589_v59, %v721_v34  ;;  %v525_v11 = vrot.slane %v524_v37, 1  ;;  %v4630_v55 = vmul.f32 0.020833334, %v1224_v49  ;;  %v1489_v17 = vsel %vm4613_vm6, %v4469_v0, %v1485_v16  ;;  %vm4662_vm10 = vmor %vm726_vm7, %vm727_vm9  ;;  %v1227_v58 = vpop.xlane.xlu2 %1226 }
 0x171   : > { %v4619_v14 = vpop.eup %2920  ;;  %v4637_v29 = vmul.f32 0.0625, %v854_v47  ;;  %v1144_v13 = vsel %vm4625_vm8, %v4474_v48, %v1140_v36  ;;  %2784 = vmatmul.msk.f32.vlgmr.msrb.gmra.mxu3 %vm806_vm0, %v1188_v23  ;;  %v995_v50 = vsub.f32 %v3045_v51, %v4380_v61  ;;  %v580_v0 = vmul.f32 %v4604_v22, %v4604_v22 }
 0x172   : > { %v723_v43 = vmul.f32 0.5, %v722_v25  ;;  %v1491_v1 = vmul.f32 %v4619_v14, %v4575_v42  ;;  %v526_v44 = vadd.f32 %v525_v11, %v524_v37  ;;  %v981_v28 = vmul.f32 0.06666667, %v965_v57  ;;  %v1585_v25 = vld [vmem:[%s5150_s3 + $0x48] sm:$0xff]  ;;  %v1663_v57 = vpop.f32.mrf.mxu0  ;;  %v1584_v11 = vld [vmem:[%s5150_s3 + $0x40] sm:$0xff] }
 0x173   : > { %v1568_v38 = vmul.f32 %v1489_v17, %v1376_v20  ;;  %v607_v61 = vsub.f32 %v4351_v15, %v4481_v31  ;;  %v1187_v52 = vmul.f32 %v1144_v13, %v995_v50  ;;  %v1330_v12 = vmul.f32 %v4630_v55, %v1224_v49  ;;  %v918_v63 = vpop.xlane.xlu1 %917  ;;  %v1587_v20 = vld [vmem:[%s5150_s3 + $0x58] sm:$0xff] }
 0x174   : > { %v724_v53 = vsub.f32 1.5, %v723_v43  ;;  %v1492_v48 = vmul.f32 %v4619_v14, %v1491_v1  ;;  %v564_v21 = vmul.f32 0.125, %v526_v44  ;;  %v4666_v8 = vadd.f32 1e-08, %v981_v28  ;;  %v1776_v16 = vpop.f32.mrf.mxu1  ;;  %2012 = vmatpush.msra.mxu2 %v1587_v20  ;;  %2817 = vmatpush.msra.mxu3 %v1587_v20 }
 0x175   : > { %v950_v19 = vmul.f32 %v4637_v29, %v854_v47  ;;  %2763 = vmatmul.msk.f32.gmra.mxu0 %vm1191_vm1, %v1568_v38  ;;  %vm1497_vm11 = vweird.f32 %v4619_v14  ;;  %2783 = vmatmul.msk.f32.gmra.mxu1 %vm806_vm0, %v1187_v52  ;;  %v1346_v4 = vsub.f32 %v1288_v46, %v1330_v12  ;;  %vm1496_vm12 = vweird.f32 %v4575_v42  ;;  %v1586_v42 = vld [vmem:[%s5150_s3 + $0x50] sm:$0xff] }
 0x176   : > { %v725_v15 = vmul.f32 %v4589_v59, %v724_v53  ;;  %v1493_v31 = vmul.f32 0.5, %v1492_v48  ;;  %v596_v32 = vsub.f32 %v564_v21, %v580_v0  ;;  %2922 = vrsqrt.f32 %v4666_v8  ;;  %vm1498_vm2 = vmor %vm1496_vm12, %vm1497_vm11  ;;  %2013 = vmatpush.msra.mxu2 %v1586_v42  ;;  %2818 = vmatpush.msra.mxu3 %v1586_v42 }
 0x177   : > { %v966_v30 = vsub.f32 %v918_v63, %v950_v19  ;;  %v1362_v54 = vmul.f32 0.021276595, %v1346_v4  ;;  %v4692_v34 = vmul.f32 0.020833334, %v1227_v58  ;;  %v1377_v37 = vsub.f32 %v3046_v24, %v4507_v5  ;;  %v4711_v5 = vld [vmem:[%s5150_s3 + $0x80] ss:$0 sm:$0xff] }
 0x178   : > { %v729_v7 = vsel %vm4662_vm10, %v4589_v59, %v725_v15  ;;  %v1494_v27 = vsub.f32 1.5, %v1493_v31  ;;  %v4687_v2 = vadd.f32 1e-05, %v596_v32  ;;  %2014 = vmatpush.msra.mxu2 %v1585_v25  ;;  %v4732_v13 = vpop.permute.xlu2 %1828  ;;  %v1774_v50 = vadd.f32 %v4639_v40, %v4668_v10  ;;  %2819 = vmatpush.msra.mxu3 %v1585_v25  ;;  %v3047_v63 = vld [vmem:[%s3099_s21 + $0x70] sm:$0xff] }
 0x179   : > { %v799_v62 = vmul.f32 %v729_v7, %v607_v61  ;;  %v982_v6 = vmul.f32 0.06666667, %v966_v30  ;;  %v4705_v41 = vadd.f32 1e-08, %v1362_v54  ;;  %v1331_v23 = vmul.f32 %v4692_v34, %v1227_v58 }
 0x17a   : > { %v1495_v59 = vmul.f32 %v4619_v14, %v1494_v27  ;;  %2924 = vrsqrt.f32 %v4687_v2  ;;  %2015 = vmatpush.msra.mxu2 %v1584_v11  ;;  %v1777_v35 = vadd.f32 %v1776_v16, %v1663_v57  ;;  %v1903_v53 = vmul.f32 %v4711_v5, %v4732_v13  ;;  %2820 = vmatpush.msra.mxu3 %v1584_v11  ;;  %v1666_v32 = vpop.f32.mrf.mxu0 }
 0x17b   : > { %1868 = vperm.xlu2 %2831, %v799_v62   ;;  %v4703_v49 = vadd.f32 1e-08, %v982_v6  ;;  %v4724_v56 = vpop.permute.xlu1 %1823  ;;  %vm1951_vm13 = vcmask 523264   ;;  %vm776_vm14 = vweird.f32 %v4687_v2  ;;  %vm1161_vm4 = vweird.f32 %v4666_v8 }
 0x17c   : > { %v1499_v36 = vsel %vm1498_vm2, %v4619_v14, %v1495_v59  ;;  %v4713_v45 = vpop.eup %2922  ;;  %v1291_v14 = vpop.xlane.xlu0 %1290  ;;  %v1902_v1 = vmul.f32 %v4711_v5, %v4724_v56  ;;  %v1919_v19 = vadd.f32 %v1903_v53, %v1777_v35  ;;  %v997_v46 = vsub.f32 %v3047_v63, %v4579_v60 }
 0x17d   : > { %v1569_v26 = vmul.f32 %v1499_v36, %v1377_v37  ;;  %v1156_v47 = vmul.f32 %v4713_v45, %v4666_v8  ;;  %2926 = vrsqrt.f32 %v4703_v49  ;;  %v1347_v43 = vsub.f32 %v1291_v14, %v1331_v23  ;;  %v1779_v15 = vpop.f32.mrf.mxu1  ;;  %v3048_v36 = vld [vmem:[%s3137_s24 + $0x50] sm:$0xff] }
 0x17e   : > { %2928 = vrsqrt.f32 %v4705_v41  ;;  %v1918_v18 = vadd.f32 %v1902_v1, %v1774_v50  ;;  %vm1162_vm15 = vweird.f32 %v4713_v45  ;;  %v612_v8 = vsub.f32 %v4394_v9, %v4604_v22 }
 0x17f   : > { %2764 = vmatmul.msk.f32.gmra.mxu0 %vm1191_vm1, %v1569_v26  ;;  %v1157_v17 = vmul.f32 %v4713_v45, %v1156_v47  ;;  %v1363_v28 = vmul.f32 0.021276595, %v1347_v43  ;;  %vm1163_vm5 = vmor %vm1161_vm4, %vm1162_vm15  ;;  %v1780_v6 = vadd.f32 %v1779_v15, %v1666_v32  ;;  %v1935_v9 = vmax.f32 %v1919_v19, 0.0  ;;  %v3049_v26 = vld [vmem:[%s3099_s21 + $0x78] sm:$0xff] }
 0x180   : > { %v2925_v51 = vpop.eup %2924  ;;  %v1934_v52 = vmax.f32 %v1918_v18, 0.0  ;;  %vm1171_vm9 = vweird.f32 %v4703_v49  ;;  %v998_v25 = vsub.f32 %v3049_v26, %v4637_v29  ;;  %vm1506_vm11 = vweird.f32 %v4705_v41 }
 0x181   : > { %v771_v44 = vmul.f32 %v2925_v51, %v4687_v2  ;;  %v1158_v0 = vmul.f32 0.5, %v1157_v17  ;;  %v4741_v3 = vadd.f32 1e-08, %v1363_v28  ;;  %vm777_vm3 = vweird.f32 %v2925_v51 }
 0x182   : > { %2787 = vmatmul.msk.f32.vlgmr.msra.gmra.mxu2 %vm1951_vm13, %v1934_v52  ;;  %vm4764_vm6 = vmor %vm776_vm14, %vm777_vm3  ;;  %v1669_v17 = vpop.f32.mrf.mxu0 }
 0x183   : > { %v4739_v48 = vpop.eup %2926  ;;  %v772_v38 = vmul.f32 %v2925_v51, %v771_v44  ;;  %v1159_v61 = vsub.f32 1.5, %v1158_v0  ;;  %2930 = vrsqrt.f32 %v4741_v3  ;;  %vm1516_vm14 = vweird.f32 %v4741_v3  ;;  %v3050_v0 = vld [vmem:[%s3137_s24 + $0x58] sm:$0xff] }
 0x184   : > { %v2929_v40 = vpop.eup %2928  ;;  %v1166_v21 = vmul.f32 %v4739_v48, %v4703_v49  ;;  %v4757_v27 = vpop.permute.xlu0 %1833  ;;  %vm1172_vm7 = vweird.f32 %v4739_v48  ;;  %v1379_v28 = vsub.f32 %v3050_v0, %v4692_v34 }
 0x185   : > { %v773_v10 = vmul.f32 0.5, %v772_v38  ;;  %v1501_v33 = vmul.f32 %v2929_v40, %v4705_v41  ;;  %v1160_v12 = vmul.f32 %v4713_v45, %v1159_v61  ;;  %v1904_v22 = vmul.f32 %v4711_v5, %v4757_v27  ;;  %vm1173_vm10 = vmor %vm1171_vm9, %vm1172_vm7  ;;  %v1782_v14 = vpop.f32.mrf.mxu1 }
 0x186   : > { %v1167_v31 = vmul.f32 %v4739_v48, %v1166_v21  ;;  %vm1507_vm8 = vweird.f32 %v2929_v40 }
 0x187   : > { %v774_v39 = vsub.f32 1.5, %v773_v10  ;;  %v1502_v7 = vmul.f32 %v2929_v40, %v1501_v33  ;;  %v1164_v60 = vsel %vm1163_vm5, %v4713_v45, %v1160_v12  ;;  %v1378_v45 = vsub.f32 %v3048_v36, %v4630_v55  ;;  %vm1508_vm12 = vmor %vm1506_vm11, %vm1507_vm8 }
 0x188   : > { %v1168_v4 = vmul.f32 0.5, %v1167_v31  ;;  %v1189_v20 = vmul.f32 %v1164_v60, %v997_v46  ;;  %v1920_v23 = vadd.f32 %v1904_v22, %v1780_v6  ;;  %vm2645_vm5 = vcmask 15360  }
 0x189   : > { %v775_v58 = vmul.f32 %v2925_v51, %v774_v39  ;;  %v1503_v62 = vmul.f32 0.5, %v1502_v7  ;;  %v2931_v2 = vpop.eup %2930 }
 0x18a   : > { %v1169_v54 = vsub.f32 1.5, %v1168_v4  ;;  %2785 = vmatmul.msk.f32.gmra.mxu3 %vm806_vm0, %v1189_v20  ;;  %v1511_v42 = vmul.f32 %v2931_v2, %v4741_v3  ;;  %2788 = vmatmul.msk.f32.gmra.mxu2 %vm1951_vm13, %v1935_v9  ;;  %vm1517_vm2 = vweird.f32 %v2931_v2  ;;  %v1936_v41 = vmax.f32 %v1920_v23, 0.0  ;;  %v1672_v38 = vpop.f32.mrf.mxu0  ;;  %v1696_v20 = vpop.f32.mrf.mxu3 }
 0x18b   : > { %v779_v59 = vsel %vm4764_vm6, %v2925_v51, %v775_v58  ;;  %v1504_v24 = vsub.f32 1.5, %v1503_v62  ;;  %v1783_v51 = vadd.f32 %v1782_v14, %v1669_v17  ;;  %vm1518_vm15 = vmor %vm1516_vm14, %vm1517_vm2 }
 0x18c   : > { %v804_v37 = vmul.f32 %v779_v59, %v612_v8  ;;  %v1170_v16 = vmul.f32 %v4739_v48, %v1169_v54  ;;  %v1512_v47 = vmul.f32 %v2931_v2, %v1511_v42 }
 0x18d   : > { %v1505_v57 = vmul.f32 %v2929_v40, %v1504_v24  ;;  %v1785_v61 = vpop.f32.mrf.mxu1 }
 0x18e   : > { %1893 = vperm.xlu2 %2831, %v804_v37   ;;  %v1174_v49 = vsel %vm1173_vm10, %v4739_v48, %v1170_v16  ;;  %v1513_v29 = vmul.f32 0.5, %v1512_v47  ;;  %v1786_v34 = vadd.f32 %v1785_v61, %v1672_v38 }
 0x18f   : > { %v1509_v55 = vsel %vm1508_vm12, %v2929_v40, %v1505_v57  ;;  %v1190_v11 = vmul.f32 %v1174_v49, %v998_v25  ;;  %v4797_v40 = vpop.permute.xlu1 %1843 }
 0x190   : > { %v1570_v43 = vmul.f32 %v1509_v55, %v1378_v45  ;;  %v1514_v1 = vsub.f32 1.5, %v1513_v29  ;;  %v1906_v3 = vmul.f32 %v4711_v5, %v4797_v40 }
 0x192   : > { %2765 = vmatmul.msk.f32.gmra.mxu0 %vm1191_vm1, %v1570_v43  ;;  %2786 = vmatmul.msk.f32.gmra.mxu3 %vm806_vm0, %v1190_v11  ;;  %v1515_v50 = vmul.f32 %v2931_v2, %v1514_v1  ;;  %v1922_v52 = vadd.f32 %v1906_v3, %v1786_v34  ;;  %v1675_v12 = vpop.f32.mrf.mxu0  ;;  %v1699_v54 = vpop.f32.mrf.mxu3  ;;  %v4844_v3 = vld [vmem:[%s5150_s3 + $0x88] ss:$0 sm:$0xff] }
 0x193   : > { %2789 = vmatmul.msk.f32.gmra.mxu2 %vm1951_vm13, %v1936_v41 }
 0x194   : > { %v4790_v44 = vpop.permute.xlu2 %1838  ;;  %v1519_v35 = vsel %vm1518_vm15, %v2931_v2, %v1515_v50  ;;  %v1938_v10 = vmax.f32 %v1922_v52, 0.0 }
 0x195   : > { %v1905_v18 = vmul.f32 %v4711_v5, %v4790_v44  ;;  %v1571_v53 = vmul.f32 %v1519_v35, %v1379_v28  ;;  %v1788_v31 = vpop.f32.mrf.mxu1 }
 0x196   : > { %v1789_v19 = vadd.f32 %v1788_v31, %v1675_v12 }
 0x197   : > { %v1921_v48 = vadd.f32 %v1905_v18, %v1783_v51  ;;  %v4809_v39 = vpop.permute.xlu1 %1853 }
 0x198   : > { %v1908_v30 = vmul.f32 %v4711_v5, %v4809_v39 }
 0x199   : > { %v1937_v21 = vmax.f32 %v1921_v48, 0.0 }
 0x19a   : > { %2766 = vmatmul.msk.f32.gmra.mxu0 %vm1191_vm1, %v1571_v53 }
 0x19b   : > { %2790 = vmatmul.msk.f32.gmra.mxu2 %vm1951_vm13, %v1937_v21 }
 0x19d   : > { %v1791_v46 = vpop.f32.mrf.mxu1 }
 0x19f   : > { %v4821_v26 = vpop.permute.xlu1 %1863 }
 0x1a0   : > { %v1910_v57 = vmul.f32 %v4711_v5, %v4821_v26 }
 0x1a3   : > { %2791 = vmatmul.msk.f32.gmra.mxu2 %vm1951_vm13, %v1938_v10 }
 0x1a4   : > { %v4825_v47 = vpop.permute.xlu0 %1883 }
 0x1a5   : > { %v1794_v7 = vpop.f32.mrf.mxu1  ;;  %v1914_v14 = vmul.f32 %v4711_v5, %v4825_v47 }
 0x1a7   : > { %v4829_v51 = vpop.permute.xlu1 %1888 }
 0x1a8   : > { %v1915_v50 = vmul.f32 %v4711_v5, %v4829_v51 }
 0x1ad   : > { %v1797_v62 = vpop.f32.mrf.mxu1 }
 0x1b2   : > { %v4804_v33 = vpop.permute.xlu2 %1848 }
 0x1b3   : > { %v1907_v15 = vmul.f32 %v4711_v5, %v4804_v33 }
 0x1b5   : > { %v1923_v32 = vadd.f32 %v1907_v15, %v1789_v19  ;;  %v1800_v6 = vpop.f32.mrf.mxu1 }
 0x1b7   : > { %v1939_v63 = vmax.f32 %v1923_v32, 0.0  ;;  %v4856_v32 = vld [vmem:[%s5150_s3 + $0x90] ss:$0 sm:$0xff] }
 0x1b9   : > { %2792 = vmatmul.msk.f32.gmra.mxu2 %vm1951_vm13, %v1939_v63 }
 0x1bd   : > { %v1678_v8 = vpop.f32.mrf.mxu0  ;;  %v4846_v34 = vpop.permute.xlu0 %1873 }
 0x1be   : > { %v1792_v4 = vadd.f32 %v1791_v46, %v1678_v8  ;;  %v1912_v63 = vmul.f32 %v4711_v5, %v4846_v34 }
 0x1c0   : > { %v1924_v60 = vadd.f32 %v1908_v30, %v1792_v4 }
 0x1c1   : > { %v1803_v59 = vpop.f32.mrf.mxu1 }
 0x1c2   : > { %v1940_v58 = vmax.f32 %v1924_v60, 0.0 }
 0x1c4   : > { %2793 = vmatmul.msk.f32.gmra.mxu2 %vm1951_vm13, %v1940_v58 }
 0x1c5   : > { %v4814_v9 = vpop.permute.xlu2 %1858  ;;  %v1702_v37 = vpop.f32.mrf.mxu3 }
 0x1c6   : > { %v1909_v2 = vmul.f32 %v4711_v5, %v4814_v9 }
 0x1d5   : > { %v4835_v0 = vpop.permute.xlu2 %1868 }
 0x1d6   : > { %v1911_v18 = vmul.f32 %v4711_v5, %v4835_v0 }
 0x1e2   : > { %v1681_v22 = vpop.f32.mrf.mxu0 }
 0x1e3   : > { %v1795_v24 = vadd.f32 %v1794_v7, %v1681_v22 }
 0x1e5   : > { %v1925_v42 = vadd.f32 %v1909_v2, %v1795_v24 }
 0x1e6   : > { %v4819_v36 = vpop.f32.mrf.mxu1 }
 0x1e7   : > { %v1941_v16 = vmax.f32 %v1925_v42, 0.0 }
 0x1e8   : > { %v4849_v10 = vpop.permute.xlu2 %1893 }
 0x1e9   : > { %2794 = vmatmul.msk.f32.gmra.mxu2 %vm1951_vm13, %v1941_v16  ;;  %v1916_v31 = vmul.f32 %v4711_v5, %v4849_v10 }
 0x1ea   : > { %v1705_v45 = vpop.f32.mrf.mxu3 }
 0x1f2   : > { %v1684_v25 = vpop.f32.mrf.mxu0  ;;  %v1809_v23 = vpop.f32.mrf.mxu1 }
 0x1f3   : > { %v1798_v49 = vadd.f32 %v1797_v62, %v1684_v25  ;;  %v1810_v55 = vadd.f32 %v1809_v23, %v1696_v20  ;;  %v4862_v20 = vpop.permute.xlu0 %1898 }
 0x1f4   : > { %v1812_v17 = vpop.f32.mrf.mxu3 }
 0x1f5   : > { %v1926_v11 = vadd.f32 %v1910_v57, %v1798_v49  ;;  %v1930_v29 = vadd.f32 %v1914_v14, %v1810_v55  ;;  %v1813_v41 = vadd.f32 %v1812_v17, %v1699_v54  ;;  %v4864_v54 = vpop.permute.xlu1 %1878 }
 0x1f6   : > { %v1913_v42 = vmul.f32 %v4711_v5, %v4864_v54 }
 0x1f7   : > { %v1942_v43 = vmax.f32 %v1926_v11, 0.0  ;;  %v1946_v1 = vmax.f32 %v1930_v29, 0.0  ;;  %v1931_v35 = vadd.f32 %v1915_v50, %v1813_v41 }
 0x1f9   : > { %2795 = vmatmul.msk.f32.gmra.mxu2 %vm1951_vm13, %v1942_v43  ;;  %2799 = vmatmul.msk.f32.vlgmr.msra.gmra.mxu3 %vm1951_vm13, %v1946_v1  ;;  %v1947_v38 = vmax.f32 %v1931_v35, 0.0 }
 0x1fc   : > { %v1687_v28 = vpop.f32.mrf.mxu0 }
 0x1fd   : > { %v1801_v53 = vadd.f32 %v1800_v6, %v1687_v28 }
 0x1ff   : > { %v1927_v48 = vadd.f32 %v1911_v18, %v1801_v53 }
 0x201   : > { %v1943_v61 = vmax.f32 %v1927_v48, 0.0  ;;  %2800 = vmatmul.msk.f32.gmra.mxu3 %vm1951_vm13, %v1947_v38 }
 0x203   : > { %2796 = vmatmul.msk.f32.gmra.mxu2 %vm1951_vm13, %v1943_v61 }
 0x205   : > { %v2017_v21 = vpop.f32.mrf.mxu2 }
 0x206   : > { %v2018_v52 = vadd.f32 %v4844_v3, %v2017_v21 }
 0x208   : > { %2932 = vtanh.f32 %v2018_v52 }
 0x20d   : > { %v1815_v15 = vpop.f32.mrf.mxu3  ;;  %v2020_v8 = vpop.f32.mrf.mxu2 }
 0x20e   : > { %v1816_v12 = vadd.f32 %v1815_v15, %v1702_v37  ;;  %v2933_v30 = vpop.eup %2932  ;;  %v2021_v60 = vadd.f32 %v4844_v3, %v2020_v8 }
 0x20f   : > { %v1690_v19 = vpop.f32.mrf.mxu0  ;;  %v2082_v62 = vmul.f32 %v2933_v30, %v4856_v32 }
 0x210   : > { %v1804_v46 = vadd.f32 %v1803_v59, %v1690_v19  ;;  %v1932_v7 = vadd.f32 %v1916_v31, %v1816_v12  ;;  %2934 = vtanh.f32 %v2021_v60  ;;  %v1917_v59 = vmul.f32 %v4711_v5, %v4862_v20 }
 0x211   : > { %v2098_v22 = vsel %vm1951_vm13, %v2082_v62, 0.0 }
 0x212   : > { %v1928_v4 = vadd.f32 %v1912_v63, %v1804_v46  ;;  %v1948_v58 = vmax.f32 %v1932_v7, 0.0  ;;  %2099 = vadd.xlane.f32.xlu2 %v2098_v22 }
 0x214   : > { %v1944_v6 = vmax.f32 %v1928_v4, 0.0  ;;  %2801 = vmatmul.msk.f32.gmra.mxu3 %vm1951_vm13, %v1948_v58 }
 0x215   : > { %v1818_v2 = vpop.f32.mrf.mxu3 }
 0x216   : > { %2797 = vmatmul.msk.f32.gmra.mxu2 %vm1951_vm13, %v1944_v6  ;;  %v1819_v24 = vadd.f32 %v1818_v2, %v1705_v45  ;;  %v2023_v57 = vpop.f32.mrf.mxu2  ;;  %v2935_v49 = vpop.eup %2934 }
 0x217   : > { %v1693_v37 = vpop.f32.mrf.mxu0  ;;  %v2024_v14 = vadd.f32 %v4844_v3, %v2023_v57  ;;  %v2083_v11 = vmul.f32 %v2935_v49, %v4856_v32 }
 0x218   : > { %v1807_v16 = vadd.f32 %v4819_v36, %v1693_v37  ;;  %v1933_v25 = vadd.f32 %v1917_v59, %v1819_v24 }
 0x219   : > { %2936 = vtanh.f32 %v2024_v14  ;;  %v2101_v45 = vsel %vm1951_vm13, %v2083_v11, 0.0 }
 0x21a   : > { %v1929_v23 = vadd.f32 %v1913_v42, %v1807_v16  ;;  %v1949_v55 = vmax.f32 %v1933_v25, 0.0  ;;  %2102 = vadd.xlane.f32.xlu1 %v2101_v45 }
 0x21c   : > { %v1945_v17 = vmax.f32 %v1929_v23, 0.0  ;;  %2802 = vmatmul.msk.f32.gmra.mxu3 %vm1951_vm13, %v1949_v55 }
 0x21e   : > { %2798 = vmatmul.msk.f32.gmra.mxu2 %vm1951_vm13, %v1945_v17  ;;  %v2026_v5 = vpop.f32.mrf.mxu2 }
 0x21f   : > { %v2937_v36 = vpop.eup %2936  ;;  %v2027_v29 = vadd.f32 %v4844_v3, %v2026_v5 }
 0x220   : > { %v2084_v43 = vmul.f32 %v2937_v36, %v4856_v32 }
 0x221   : > { %2938 = vtanh.f32 %v2027_v29 }
 0x222   : > { %v2104_v1 = vsel %vm1951_vm13, %v2084_v43, 0.0 }
 0x223   : > { %2105 = vadd.xlane.f32.xlu0 %v2104_v1 }
 0x226   : > { %v2029_v41 = vpop.f32.mrf.mxu2 }
 0x227   : > { %v2939_v50 = vpop.eup %2938  ;;  %v2030_v28 = vadd.f32 %v4844_v3, %v2029_v41 }
 0x228   : > { %v2085_v18 = vmul.f32 %v2939_v50, %v4856_v32 }
 0x229   : > { %2940 = vtanh.f32 %v2030_v28 }
 0x22a   : > { %v2107_v35 = vsel %vm1951_vm13, %v2085_v18, 0.0 }
 0x22b   : > { %2108 = vadd.xlane.f32.xlu2 %v2107_v35 }
 0x22f   : > { %v2941_v53 = vpop.eup %2940 }
 0x230   : > { %v2086_v48 = vmul.f32 %v2941_v53, %v4856_v32 }
 0x232   : > { %v2110_v38 = vsel %vm1951_vm13, %v2086_v48, 0.0 }
 0x233   : > { %2111 = vadd.xlane.f32.xlu1 %v2110_v38 }
 0x23c   : > { %v2032_v61 = vpop.f32.mrf.mxu2 }
 0x23d   : > { %v2033_v21 = vadd.f32 %v4844_v3, %v2032_v61 }
 0x23f   : > { %2942 = vtanh.f32 %v2033_v21 }
 0x245   : > { %v2943_v52 = vpop.eup %2942 }
 0x246   : > { %v2087_v15 = vmul.f32 %v2943_v52, %v4856_v32 }
 0x247   : > { %v2035_v12 = vpop.f32.mrf.mxu2 }
 0x248   : > { %v2113_v31 = vsel %vm1951_vm13, %v2087_v15, 0.0  ;;  %v2036_v19 = vadd.f32 %v4844_v3, %v2035_v12 }
 0x249   : > { %2114 = vadd.xlane.f32.xlu2 %v2113_v31 }
 0x24a   : > { %2944 = vtanh.f32 %v2036_v19 }
 0x250   : > { %v2945_v63 = vpop.eup %2944 }
 0x251   : > { %v2088_v46 = vmul.f32 %v2945_v63, %v4856_v32 }
 0x253   : > { %v2116_v7 = vsel %vm1951_vm13, %v2088_v46, 0.0 }
 0x254   : > { %2117 = vadd.xlane.f32.xlu0 %v2116_v7 }
 0x26c   : > { %v2038_v8 = vpop.f32.mrf.mxu2 }
 0x26d   : > { %v2039_v30 = vadd.f32 %v4844_v3, %v2038_v8 }
 0x26f   : > { %2946 = vtanh.f32 %v2039_v30 }
 0x275   : > { %v2947_v4 = vpop.eup %2946 }
 0x276   : > { %v2089_v60 = vmul.f32 %v2947_v4, %v4856_v32 }
 0x278   : > { %v2119_v58 = vsel %vm1951_vm13, %v2089_v60, 0.0 }
 0x279   : > { %2120 = vadd.xlane.f32.xlu1 %v2119_v58 }
 0x27c   : > { %v2041_v62 = vpop.f32.mrf.mxu2  ;;  %v2053_v2 = vpop.f32.mrf.mxu3 }
 0x27d   : > { %v2042_v6 = vadd.f32 %v4844_v3, %v2041_v62  ;;  %v2054_v55 = vadd.f32 %v4844_v3, %v2053_v2 }
 0x27f   : > { %2948 = vtanh.f32 %v2042_v6 }
 0x284   : > { %v2056_v23 = vpop.f32.mrf.mxu3 }
 0x285   : > { %v2949_v22 = vpop.eup %2948  ;;  %v2100_v42 = vpop.xlane.xlu2 %2099  ;;  %v2057_v18 = vadd.f32 %v4844_v3, %v2056_v23 }
 0x286   : > { %v2090_v59 = vmul.f32 %v2949_v22, %v4856_v32  ;;  %v2044_v24 = vpop.f32.mrf.mxu2  ;;  %v2146_v16 = vrot.slane %v2100_v42, 4 }
 0x287   : > { %v2045_v25 = vadd.f32 %v4844_v3, %v2044_v24 }
 0x288   : > { %v2122_v37 = vsel %vm1951_vm13, %v2090_v59, 0.0  ;;  %v2147_v57 = vmax.f32 %v2100_v42, %v2146_v16 }
 0x289   : > { %2123 = vadd.xlane.f32.xlu2 %v2122_v37  ;;  %2950 = vtanh.f32 %v2045_v25 }
 0x28a   : > { %v2148_v49 = vrot.slane %v2147_v57, 2  ;;  %2952 = vtanh.f32 %v2054_v55 }
 0x28c   : > { %v2149_v14 = vmax.f32 %v2147_v57, %v2148_v49 }
 0x28d   : > { %v2103_v21 = vpop.xlane.xlu1 %2102 }
 0x28e   : > { %v2150_v11 = vrot.slane %v2149_v14, 1  ;;  %v2152_v15 = vrot.slane %v2103_v21, 4 }
 0x28f   : > { %v2951_v45 = vpop.eup %2950 }
 0x290   : > { %v2151_v17 = vmax.f32 %v2149_v14, %v2150_v11  ;;  %v2091_v43 = vmul.f32 %v2951_v45, %v4856_v32  ;;  %v2953_v50 = vpop.eup %2952  ;;  %v2153_v46 = vmax.f32 %v2103_v21, %v2152_v15 }
 0x291   : > { %v2094_v35 = vmul.f32 %v2953_v50, %v4856_v32 }
 0x292   : > { %v2242_v5 = vsub.f32 %v2100_v42, %v2151_v17  ;;  %v2125_v41 = vsel %vm1951_vm13, %v2091_v43, 0.0  ;;  %v2154_v4 = vrot.slane %v2153_v46, 2 }
 0x293   : > { %2126 = vadd.xlane.f32.xlu0 %v2125_v41  ;;  %v2134_v31 = vsel %vm1951_vm13, %v2094_v35, 0.0 }
 0x294   : > { %v2258_v29 = vmul.f32 1.442695, %v2242_v5  ;;  %v2155_v6 = vmax.f32 %v2153_v46, %v2154_v4 }
 0x296   : > { %2954 = vpow2.f32 %v2258_v29  ;;  %v2156_v59 = vrot.slane %v2155_v6, 1  ;;  %v2106_v24 = vpop.xlane.xlu0 %2105 }
 0x297   : > { %v2059_v36 = vpop.f32.mrf.mxu3  ;;  %v2158_v25 = vrot.slane %v2106_v24, 4 }
 0x298   : > { %v2060_v8 = vadd.f32 %v4844_v3, %v2059_v36  ;;  %v2157_v57 = vmax.f32 %v2155_v6, %v2156_v59 }
 0x299   : > { %v2047_v1 = vpop.f32.mrf.mxu2  ;;  %v2159_v55 = vmax.f32 %v2106_v24, %v2158_v25 }
 0x29a   : > { %v2048_v28 = vadd.f32 %v4844_v3, %v2047_v1  ;;  %v2243_v14 = vsub.f32 %v2103_v21, %v2157_v57 }
 0x29b   : > { %2135 = vadd.xlane.f32.xlu0 %v2134_v31  ;;  %v2160_v36 = vrot.slane %v2159_v55, 2 }
 0x29c   : > { %2956 = vtanh.f32 %v2048_v28  ;;  %v4906_v53 = vpop.eup %2954  ;;  %v2260_v5 = vmul.f32 1.442695, %v2243_v14  ;;  %v2626_v28 = vlaneseq }
 0x29d   : > { %2958 = vtanh.f32 %v2057_v18  ;;  %v2290_v38 = vrot.slane %v4906_v53, 4  ;;  %v2161_v29 = vmax.f32 %v2159_v55, %v2160_v36 }
 0x29f   : > { %v2062_v48 = vpop.f32.mrf.mxu3  ;;  %v2291_v19 = vadd.f32 %v4906_v53, %v2290_v38  ;;  %v2162_v50 = vrot.slane %v2161_v29, 1 }
 0x2a0   : > { %v2063_v61 = vadd.f32 %v4844_v3, %v2062_v48  ;;  %v2109_v48 = vpop.xlane.xlu2 %2108 }
 0x2a1   : > { %v2050_v52 = vpop.f32.mrf.mxu2  ;;  %v2292_v30 = vrot.slane %v2291_v19, 2  ;;  %v2163_v35 = vmax.f32 %v2161_v29, %v2162_v50  ;;  %v2164_v21 = vrot.slane %v2109_v48, 4 }
 0x2a2   : > { %v2957_v12 = vpop.eup %2956  ;;  %2960 = vtanh.f32 %v2063_v61  ;;  %v2051_v63 = vadd.f32 %v4844_v3, %v2050_v52 }
 0x2a3   : > { %v2092_v7 = vmul.f32 %v2957_v12, %v4856_v32  ;;  %v2959_v58 = vpop.eup %2958  ;;  %v2293_v62 = vadd.f32 %v2292_v30, %v2291_v19  ;;  %v2244_v12 = vsub.f32 %v2106_v24, %v2163_v35  ;;  %v4926_v19 = vand.u32 127, %v2626_v28 }
 0x2a4   : > { %2962 = vtanh.f32 %v2051_v63  ;;  %v2095_v42 = vmul.f32 %v2959_v58, %v4856_v32  ;;  %v2165_v63 = vmax.f32 %v2109_v48, %v2164_v21 }
 0x2a5   : > { %v2128_v60 = vsel %vm1951_vm13, %v2092_v7, 0.0  ;;  %2964 = vtanh.f32 %v2060_v8  ;;  %v2294_v2 = vrot.slane %v2293_v62, 1  ;;  %v2262_v7 = vmul.f32 1.442695, %v2244_v12 }
 0x2a6   : > { %2129 = vadd.xlane.f32.xlu1 %v2128_v60  ;;  %v2137_v11 = vsel %vm1951_vm13, %v2095_v42, 0.0  ;;  %v2166_v4 = vrot.slane %v2165_v63, 2  ;;  %vm2628_vm4 = vcmp.eq.s32.totalorder %v4926_v19, 0 }
 0x2a7   : > { %v2295_v3 = vadd.f32 %v2294_v2, %v2293_v62 }
 0x2a8   : > { %v2961_v22 = vpop.eup %2960  ;;  %v2167_v6 = vmax.f32 %v2165_v63, %v2166_v4 }
 0x2a9   : > { %v2097_v37 = vmul.f32 %v2961_v22, %v4856_v32  ;;  %2966 = vrcp.f32 %v2295_v3  ;;  %v2397_v61 = vand.u32 2147483648, %v2295_v3  ;;  %v2395_v31 = vand.u32 2147483647, %v2295_v3 }
 0x2aa   : > { %v2963_v16 = vpop.eup %2962  ;;  %2968 = vpow2.f32 %v2260_v5  ;;  %vm2391_vm1 = vweird.f32 %v2295_v3  ;;  %v2168_v59 = vrot.slane %v2167_v6, 1 }
 0x2ab   : > { %v2143_v49 = vsel %vm1951_vm13, %v2097_v37, 0.0  ;;  %v2093_v23 = vmul.f32 %v2963_v16, %v4856_v32  ;;  %v2965_v45 = vpop.eup %2964  ;;  %v2398_v8 = vor.u32 1.1754944e-38, %v2397_v61  ;;  %2970 = vpow2.f32 %v2262_v7 }
 0x2ac   : > { %2144 = vadd.xlane.f32.xlu0 %v2143_v49  ;;  %v2096_v43 = vmul.f32 %v2965_v45, %v4856_v32  ;;  %v2169_v42 = vmax.f32 %v2167_v6, %v2168_v59 }
 0x2ad   : > { %v2131_v17 = vsel %vm1951_vm13, %v2093_v23, 0.0 }
 0x2ae   : > { %2138 = vadd.xlane.f32.xlu1 %v2137_v11  ;;  %2132 = vadd.xlane.f32.xlu2 %v2131_v17  ;;  %v2140_v38 = vsel %vm1951_vm13, %v2096_v43, 0.0  ;;  %vm2396_vm13 = vcmp.eq.f32.partialorder %v2395_v31, 8.507059e+37  ;;  %v2245_v49 = vsub.f32 %v2109_v48, %v2169_v42 }
 0x2af   : > { %v2967_v1 = vpop.eup %2966 }
 0x2b0   : > { %v2387_v41 = vmul.f32 %v2967_v1, %v2295_v3  ;;  %v4924_v52 = vpop.eup %2968  ;;  %vm2392_vm0 = vweird.f32 %v2967_v1  ;;  %v2112_v3 = vpop.xlane.xlu1 %2111  ;;  %v2264_v14 = vmul.f32 1.442695, %v2245_v49 }
 0x2b1   : > { %v2296_v32 = vrot.slane %v4924_v52, 4  ;;  %vm2393_vm3 = vmor %vm2391_vm1, %vm2392_vm0  ;;  %v4943_v16 = vpop.eup %2970  ;;  %v2170_v23 = vrot.slane %v2112_v3, 4 }
 0x2b2   : > { %v2388_v18 = vsub.f32 1.0, %v2387_v41  ;;  %v2302_v57 = vrot.slane %v4943_v16, 4 }
 0x2b3   : > { %v2297_v30 = vadd.f32 %v4924_v52, %v2296_v32  ;;  %v2171_v55 = vmax.f32 %v2112_v3, %v2170_v23 }
 0x2b4   : > { %v2389_v15 = vmul.f32 %v2967_v1, %v2388_v18 }
 0x2b5   : > { %v2298_v62 = vrot.slane %v2297_v30, 2 }
 0x2b6   : > { %2141 = vadd.xlane.f32.xlu2 %v2140_v38  ;;  %v2390_v46 = vadd.f32 %v2967_v1, %v2389_v15 }
 0x2b7   : > { %v2299_v2 = vadd.f32 %v2298_v62, %v2297_v30 }
 0x2b8   : > { %v2394_v60 = vsel %vm2393_vm3, %v2967_v1, %v2390_v46 }
 0x2b9   : > { %v2399_v58 = vsel %vm2396_vm13, %v2398_v8, %v2394_v60  ;;  %v2300_v37 = vrot.slane %v2299_v2, 1 }
 0x2ba   : > { %v2610_v22 = vmul.f32 %v4906_v53, %v2399_v58  ;;  %v2303_v53 = vadd.f32 %v4943_v16, %v2302_v57 }
 0x2bb   : > { %v2301_v25 = vadd.f32 %v2300_v37, %v2299_v2 }
 0x2bc   : > { %v2629_v24 = vsel %vm2628_vm4, %v2610_v22, %v4724_v56  ;;  %v2304_v11 = vrot.slane %v2303_v53, 2  ;;  %v2172_v56 = vrot.slane %v2171_v55, 2  ;;  %v2115_v31 = vpop.xlane.xlu2 %2114 }
 0x2bd   : > { %2646 = vst.msk [vmem:[%s4935_s20] sm:$0xff] %vm2645_vm5, %v2629_v24  ;;  %2972 = vrcp.f32 %v2301_v25  ;;  %v2411_v18 = vand.u32 2147483648, %v2301_v25  ;;  %v2409_v38 = vand.u32 2147483647, %v2301_v25  ;;  %vm2405_vm7 = vweird.f32 %v2301_v25 }
 0x2be   : > { %2974 = vpow2.f32 %v2264_v14  ;;  %v2305_v17 = vadd.f32 %v2304_v11, %v2303_v53  ;;  %v2173_v45 = vmax.f32 %v2171_v55, %v2172_v56  ;;  %v2176_v46 = vrot.slane %v2115_v31, 4 }
 0x2bf   : > { %v2412_v12 = vor.u32 1.1754944e-38, %v2411_v18  ;;  %vm2410_vm9 = vcmp.eq.f32.partialorder %v2409_v38, 8.507059e+37 }
 0x2c0   : > { %v2306_v29 = vrot.slane %v2305_v17, 1  ;;  %v2174_v43 = vrot.slane %v2173_v45, 1  ;;  %v2177_v4 = vmax.f32 %v2115_v31, %v2176_v46 }
 0x2c2   : > { %v2307_v50 = vadd.f32 %v2306_v29, %v2305_v17  ;;  %v2175_v28 = vmax.f32 %v2173_v45, %v2174_v43  ;;  %v2178_v22 = vrot.slane %v2177_v4, 2 }
 0x2c3   : > { %v2973_v5 = vpop.eup %2972 }
 0x2c4   : > { %v2401_v36 = vmul.f32 %v2973_v5, %v2301_v25  ;;  %v4947_v1 = vpop.eup %2974  ;;  %vm2406_vm6 = vweird.f32 %v2973_v5  ;;  %2976 = vrcp.f32 %v2307_v50  ;;  %v2246_v21 = vsub.f32 %v2112_v3, %v2175_v28 }
 0x2c5   : > { %v2308_v35 = vrot.slane %v4947_v1, 4  ;;  %vm2407_vm8 = vmor %vm2405_vm7, %vm2406_vm6  ;;  %v2179_v37 = vmax.f32 %v2177_v4, %v2178_v22  ;;  %v2425_v42 = vand.u32 2147483648, %v2307_v50  ;;  %v2423_v57 = vand.u32 2147483647, %v2307_v50 }
 0x2c6   : > { %v2402_v41 = vsub.f32 1.0, %v2401_v36  ;;  %v2266_v63 = vmul.f32 1.442695, %v2246_v21  ;;  %vm2419_vm11 = vweird.f32 %v2307_v50 }
 0x2c7   : > { %v2309_v61 = vadd.f32 %v4947_v1, %v2308_v35  ;;  %v2180_v49 = vrot.slane %v2179_v37, 1  ;;  %v2426_v53 = vor.u32 1.1754944e-38, %v2425_v42  ;;  %vm2424_vm2 = vcmp.eq.f32.partialorder %v2423_v57, 8.507059e+37 }
 0x2c8   : > { %v2403_v48 = vmul.f32 %v2973_v5, %v2402_v41  ;;  %2978 = vpow2.f32 %v2266_v63  ;;  %v2118_v41 = vpop.xlane.xlu0 %2117 }
 0x2c9   : > { %v2310_v32 = vrot.slane %v2309_v61, 2  ;;  %v2181_v14 = vmax.f32 %v2179_v37, %v2180_v49  ;;  %v2182_v28 = vrot.slane %v2118_v41, 4 }
 0x2ca   : > { %v2404_v15 = vadd.f32 %v2973_v5, %v2403_v48  ;;  %v2977_v60 = vpop.eup %2976 }
 0x2cb   : > { %v2311_v30 = vadd.f32 %v2310_v32, %v2309_v61  ;;  %v2415_v62 = vmul.f32 %v2977_v60, %v2307_v50  ;;  %vm2420_vm10 = vweird.f32 %v2977_v60  ;;  %v2247_v17 = vsub.f32 %v2115_v31, %v2181_v14 }
 0x2cc   : > { %v2408_v7 = vsel %vm2407_vm8, %v2973_v5, %v2404_v15  ;;  %vm2421_vm12 = vmor %vm2419_vm11, %vm2420_vm10  ;;  %v2183_v38 = vmax.f32 %v2118_v41, %v2182_v28 }
 0x2cd   : > { %v2413_v8 = vsel %vm2410_vm9, %v2412_v12, %v2408_v7  ;;  %v2312_v6 = vrot.slane %v2311_v30, 1  ;;  %v2416_v59 = vsub.f32 1.0, %v2415_v62  ;;  %v2268_v43 = vmul.f32 1.442695, %v2247_v17 }
 0x2ce   : > { %v2611_v58 = vmul.f32 %v4924_v52, %v2413_v8  ;;  %v4957_v3 = vpop.eup %2978  ;;  %v2184_v15 = vrot.slane %v2183_v38, 2 }
 0x2cf   : > { %v2313_v24 = vadd.f32 %v2312_v6, %v2311_v30  ;;  %v2417_v25 = vmul.f32 %v2977_v60, %v2416_v59  ;;  %v2314_v52 = vrot.slane %v4957_v3, 4 }
 0x2d0   : > { %v2630_v2 = vsel %vm2628_vm4, %v2611_v58, %v4732_v13 }
 0x2d1   : > { %2647 = vst.msk [vmem:[%s4935_s20 + $0x8] sm:$0xff] %vm2645_vm5, %v2630_v2  ;;  %2980 = vrcp.f32 %v2313_v24  ;;  %v2418_v23 = vadd.f32 %v2977_v60, %v2417_v25  ;;  %v2315_v13 = vadd.f32 %v4957_v3, %v2314_v52  ;;  %v2439_v48 = vand.u32 2147483648, %v2313_v24 }
 0x2d2   : > { %2982 = vpow2.f32 %v2268_v43  ;;  %v2437_v21 = vand.u32 2147483647, %v2313_v24  ;;  %vm2433_vm15 = vweird.f32 %v2313_v24 }
 0x2d3   : > { %v2422_v55 = vsel %vm2421_vm12, %v2977_v60, %v2418_v23  ;;  %v2316_v56 = vrot.slane %v2315_v13, 2  ;;  %v2440_v12 = vor.u32 1.1754944e-38, %v2439_v48 }
 0x2d4   : > { %v2427_v11 = vsel %vm2424_vm2, %v2426_v53, %v2422_v55  ;;  %vm2438_vm1 = vcmp.eq.f32.partialorder %v2437_v21, 8.507059e+37 }
 0x2d5   : > { %v2612_v5 = vmul.f32 %v4943_v16, %v2427_v11  ;;  %v2317_v29 = vadd.f32 %v2316_v56, %v2315_v13 }
 0x2d7   : > { %v2981_v45 = vpop.eup %2980  ;;  %v2631_v50 = vsel %vm2628_vm4, %v2612_v5, %v4757_v27  ;;  %v2318_v35 = vrot.slane %v2317_v29, 1  ;;  %v2185_v27 = vmax.f32 %v2183_v38, %v2184_v15 }
 0x2d8   : > { %v2429_v36 = vmul.f32 %v2981_v45, %v2313_v24  ;;  %2648 = vst.msk [vmem:[%s4935_s20 + $0x10] sm:$0xff] %vm2645_vm5, %v2631_v50  ;;  %vm2434_vm14 = vweird.f32 %v2981_v45  ;;  %v4967_v32 = vpop.eup %2982 }
 0x2d9   : > { %v2319_v16 = vadd.f32 %v2318_v35, %v2317_v29  ;;  %vm2435_vm0 = vmor %vm2433_vm15, %vm2434_vm14  ;;  %v2320_v7 = vrot.slane %v4967_v32, 4  ;;  %v2186_v8 = vrot.slane %v2185_v27, 1 }
 0x2da   : > { %v2430_v18 = vsub.f32 1.0, %v2429_v36 }
 0x2db   : > { %2984 = vrcp.f32 %v2319_v16  ;;  %v2321_v4 = vadd.f32 %v4967_v32, %v2320_v7  ;;  %v2187_v60 = vmax.f32 %v2185_v27, %v2186_v8  ;;  %v2451_v42 = vand.u32 2147483647, %v2319_v16 }
 0x2dc   : > { %v2431_v61 = vmul.f32 %v2981_v45, %v2430_v18  ;;  %v2453_v25 = vand.u32 2147483648, %v2319_v16  ;;  %vm2447_vm13 = vweird.f32 %v2319_v16 }
 0x2dd   : > { %v2322_v22 = vrot.slane %v2321_v4, 2  ;;  %v2248_v2 = vsub.f32 %v2118_v41, %v2187_v60  ;;  %vm2452_vm7 = vcmp.eq.f32.partialorder %v2451_v42, 8.507059e+37 }
 0x2de   : > { %v2432_v31 = vadd.f32 %v2981_v45, %v2431_v61  ;;  %v2454_v13 = vor.u32 1.1754944e-38, %v2453_v25 }
 0x2df   : > { %v2323_v24 = vadd.f32 %v2322_v22, %v2321_v4  ;;  %v2270_v37 = vmul.f32 1.442695, %v2248_v2 }
 0x2e0   : > { %v2436_v63 = vsel %vm2435_vm0, %v2981_v45, %v2432_v31 }
 0x2e1   : > { %v2441_v46 = vsel %vm2438_vm1, %v2440_v12, %v2436_v63  ;;  %v2985_v58 = vpop.eup %2984  ;;  %v2324_v52 = vrot.slane %v2323_v24, 1  ;;  %2986 = vpow2.f32 %v2270_v37 }
 0x2e2   : > { %v2613_v30 = vmul.f32 %v4947_v1, %v2441_v46  ;;  %v2443_v6 = vmul.f32 %v2985_v58, %v2319_v16  ;;  %vm2448_vm3 = vweird.f32 %v2985_v58 }
 0x2e3   : > { %vm2449_vm6 = vmor %vm2447_vm13, %vm2448_vm3 }
 0x2e4   : > { %v2632_v62 = vsel %vm2628_vm4, %v2613_v30, %v4790_v44  ;;  %v2444_v59 = vsub.f32 1.0, %v2443_v6  ;;  %v2325_v44 = vadd.f32 %v2324_v52, %v2323_v24 }
 0x2e5   : > { %2649 = vst.msk [vmem:[%s4935_s20 + $0x18] sm:$0xff] %vm2645_vm5, %v2632_v62 }
 0x2e6   : > { %v2445_v57 = vmul.f32 %v2985_v58, %v2444_v59  ;;  %2988 = vrcp.f32 %v2325_v44  ;;  %v2467_v61 = vand.u32 2147483648, %v2325_v44  ;;  %vm2461_vm9 = vweird.f32 %v2325_v44 }
 0x2e7   : > { %v4977_v56 = vpop.eup %2986 }
 0x2e8   : > { %v2446_v23 = vadd.f32 %v2985_v58, %v2445_v57  ;;  %v2326_v45 = vrot.slane %v4977_v56, 4  ;;  %v2468_v63 = vor.u32 1.1754944e-38, %v2467_v61 }
 0x2ea   : > { %v2450_v14 = vsel %vm2449_vm6, %v2985_v58, %v2446_v23  ;;  %v2327_v29 = vadd.f32 %v4977_v56, %v2326_v45 }
 0x2eb   : > { %v2455_v55 = vsel %vm2452_vm7, %v2454_v13, %v2450_v14 }
 0x2ec   : > { %v2121_v1 = vpop.xlane.xlu1 %2120  ;;  %v2614_v17 = vmul.f32 %v4957_v3, %v2455_v55  ;;  %v2989_v41 = vpop.eup %2988  ;;  %v2328_v28 = vrot.slane %v2327_v29, 2  ;;  %v2465_v3 = vand.u32 2147483647, %v2325_v44 }
 0x2ed   : > { %v2188_v49 = vrot.slane %v2121_v1, 4  ;;  %v2457_v50 = vmul.f32 %v2989_v41, %v2325_v44  ;;  %vm2462_vm8 = vweird.f32 %v2989_v41 }
 0x2ee   : > { %v2633_v36 = vsel %vm2628_vm4, %v2614_v17, %v4797_v40  ;;  %v2329_v48 = vadd.f32 %v2328_v28, %v2327_v29  ;;  %vm2463_vm10 = vmor %vm2461_vm9, %vm2462_vm8  ;;  %vm2466_vm11 = vcmp.eq.f32.partialorder %v2465_v3, 8.507059e+37 }
 0x2ef   : > { %v2189_v53 = vmax.f32 %v2121_v1, %v2188_v49  ;;  %2650 = vst.msk [vmem:[%s4935_s20 + $0x20] sm:$0xff] %vm2645_vm5, %v2633_v36  ;;  %v2458_v35 = vsub.f32 1.0, %v2457_v50 }
 0x2f0   : > { %v2330_v16 = vrot.slane %v2329_v48, 1 }
 0x2f1   : > { %v2190_v11 = vrot.slane %v2189_v53, 2  ;;  %v2459_v21 = vmul.f32 %v2989_v41, %v2458_v35 }
 0x2f2   : > { %v2331_v27 = vadd.f32 %v2330_v16, %v2329_v48 }
 0x2f3   : > { %v2191_v5 = vmax.f32 %v2189_v53, %v2190_v11  ;;  %v2460_v12 = vadd.f32 %v2989_v41, %v2459_v21 }
 0x2f4   : > { %v2479_v52 = vand.u32 2147483647, %v2331_v27  ;;  %v2481_v49 = vand.u32 2147483648, %v2331_v27  ;;  %vm2475_vm2 = vweird.f32 %v2331_v27 }
 0x2f5   : > { %v2192_v43 = vrot.slane %v2191_v5, 1  ;;  %v2464_v7 = vsel %vm2463_vm10, %v2989_v41, %v2460_v12 }
 0x2f6   : > { %v2469_v8 = vsel %vm2466_vm11, %v2468_v63, %v2464_v7  ;;  %v2482_v11 = vor.u32 1.1754944e-38, %v2481_v49  ;;  %vm2480_vm15 = vcmp.eq.f32.partialorder %v2479_v52, 8.507059e+37 }
 0x2f7   : > { %v2193_v18 = vmax.f32 %v2191_v5, %v2192_v43  ;;  %v2615_v4 = vmul.f32 %v4967_v32, %v2469_v8 }
 0x2f9   : > { %v2249_v38 = vsub.f32 %v2121_v1, %v2193_v18  ;;  %v2634_v62 = vsel %vm2628_vm4, %v2615_v4, %v4804_v33 }
 0x2fa   : > { %2651 = vst.msk [vmem:[%s4935_s20 + $0x28] sm:$0xff] %vm2645_vm5, %v2634_v62 }
 0x2fb   : > { %v2272_v15 = vmul.f32 1.442695, %v2249_v38 }
 0x2fc   : > { %v2124_v31 = vpop.xlane.xlu2 %2123 }
 0x2fd   : > { %v2194_v40 = vrot.slane %v2124_v31, 4  ;;  %2990 = vpow2.f32 %v2272_v15 }
 0x2fe   : > { %2992 = vrcp.f32 %v2331_v27 }
 0x2ff   : > { %v2195_v46 = vmax.f32 %v2124_v31, %v2194_v40 }
 0x301   : > { %v2196_v30 = vrot.slane %v2195_v46, 2 }
 0x303   : > { %v2197_v60 = vmax.f32 %v2195_v46, %v2196_v30  ;;  %v4988_v58 = vpop.eup %2990 }
 0x304   : > { %v2332_v6 = vrot.slane %v4988_v58, 4  ;;  %v2993_v2 = vpop.eup %2992 }
 0x305   : > { %v2198_v22 = vrot.slane %v2197_v60, 1  ;;  %v2471_v59 = vmul.f32 %v2993_v2, %v2331_v27  ;;  %vm2476_vm12 = vweird.f32 %v2993_v2 }
 0x306   : > { %v2333_v24 = vadd.f32 %v4988_v58, %v2332_v6  ;;  %v2127_v42 = vpop.xlane.xlu0 %2126  ;;  %vm2477_vm14 = vmor %vm2475_vm2, %vm2476_vm12 }
 0x307   : > { %v2199_v37 = vmax.f32 %v2197_v60, %v2198_v22  ;;  %v2472_v25 = vsub.f32 1.0, %v2471_v59  ;;  %v2200_v57 = vrot.slane %v2127_v42, 4 }
 0x308   : > { %v2334_v32 = vrot.slane %v2333_v24, 2 }
 0x309   : > { %v2250_v1 = vsub.f32 %v2124_v31, %v2199_v37  ;;  %v2473_v23 = vmul.f32 %v2993_v2, %v2472_v25  ;;  %v2201_v53 = vmax.f32 %v2127_v42, %v2200_v57 }
 0x30a   : > { %v2335_v33 = vadd.f32 %v2334_v32, %v2333_v24 }
 0x30b   : > { %v2274_v44 = vmul.f32 1.442695, %v2250_v1  ;;  %v2474_v13 = vadd.f32 %v2993_v2, %v2473_v23  ;;  %v2202_v55 = vrot.slane %v2201_v53, 2 }
 0x30c   : > { %v2336_v14 = vrot.slane %v2335_v33, 1 }
 0x30d   : > { %2994 = vpow2.f32 %v2274_v44  ;;  %v2478_v17 = vsel %vm2477_vm14, %v2993_v2, %v2474_v13  ;;  %v2203_v5 = vmax.f32 %v2201_v53, %v2202_v55 }
 0x30e   : > { %v2337_v45 = vadd.f32 %v2336_v14, %v2335_v33  ;;  %v2483_v36 = vsel %vm2480_vm15, %v2482_v11, %v2478_v17  ;;  %v2136_v29 = vpop.xlane.xlu0 %2135 }
 0x30f   : > { %v2616_v43 = vmul.f32 %v4977_v56, %v2483_v36  ;;  %v2204_v41 = vrot.slane %v2203_v5, 1  ;;  %v2218_v50 = vrot.slane %v2136_v29, 4 }
 0x310   : > { %2996 = vrcp.f32 %v2337_v45  ;;  %v2495_v7 = vand.u32 2147483648, %v2337_v45  ;;  %v2493_v22 = vand.u32 2147483647, %v2337_v45  ;;  %vm2489_vm1 = vweird.f32 %v2337_v45 }
 0x311   : > { %v2635_v18 = vsel %vm2628_vm4, %v2616_v43, %v4809_v39  ;;  %v2205_v48 = vmax.f32 %v2203_v5, %v2204_v41  ;;  %v2219_v38 = vmax.f32 %v2136_v29, %v2218_v50 }
 0x312   : > { %2652 = vst.msk [vmem:[%s4935_s20 + $0x30] sm:$0xff] %vm2645_vm5, %v2635_v18  ;;  %v2496_v57 = vor.u32 1.1754944e-38, %v2495_v7  ;;  %vm2494_vm13 = vcmp.eq.f32.partialorder %v2493_v22, 8.507059e+37 }
 0x313   : > { %v4998_v28 = vpop.eup %2994  ;;  %v2251_v56 = vsub.f32 %v2127_v42, %v2205_v48  ;;  %v2220_v16 = vrot.slane %v2219_v38, 2 }
 0x314   : > { %v2338_v35 = vrot.slane %v4998_v28, 4 }
 0x315   : > { %v2276_v27 = vmul.f32 1.442695, %v2251_v56  ;;  %v2221_v63 = vmax.f32 %v2219_v38, %v2220_v16 }
 0x316   : > { %v2339_v21 = vadd.f32 %v4998_v28, %v2338_v35  ;;  %v2997_v15 = vpop.eup %2996 }
 0x317   : > { %v2485_v40 = vmul.f32 %v2997_v15, %v2337_v45  ;;  %2998 = vpow2.f32 %v2276_v27  ;;  %v2222_v4 = vrot.slane %v2221_v63, 1  ;;  %vm2490_vm0 = vweird.f32 %v2997_v15 }
 0x318   : > { %v2340_v12 = vrot.slane %v2339_v21, 2  ;;  %vm2491_vm3 = vmor %vm2489_vm1, %vm2490_vm0 }
 0x319   : > { %v2130_v3 = vpop.xlane.xlu1 %2129  ;;  %v2486_v39 = vsub.f32 1.0, %v2485_v40  ;;  %v2223_v24 = vmax.f32 %v2221_v63, %v2222_v4 }
 0x31a   : > { %v2206_v61 = vrot.slane %v2130_v3, 4  ;;  %v2341_v8 = vadd.f32 %v2340_v12, %v2339_v21 }
 0x31b   : > { %v2487_v6 = vmul.f32 %v2997_v15, %v2486_v39  ;;  %v2254_v49 = vsub.f32 %v2136_v29, %v2223_v24 }
 0x31c   : > { %v2207_v31 = vmax.f32 %v2130_v3, %v2206_v61  ;;  %v2342_v2 = vrot.slane %v2341_v8, 1 }
 0x31d   : > { %v2488_v1 = vadd.f32 %v2997_v15, %v2487_v6  ;;  %v5019_v53 = vpop.eup %2998  ;;  %v2282_v17 = vmul.f32 1.442695, %v2254_v49 }
 0x31e   : > { %v2208_v46 = vrot.slane %v2207_v31, 2  ;;  %v5016_v52 = vadd.f32 %v2342_v2, %v2341_v8  ;;  %v2344_v11 = vrot.slane %v5019_v53, 4 }
 0x31f   : > { %v5007_v30 = vpop.xlane.xlu0 %2144  ;;  %v2492_v13 = vsel %vm2491_vm3, %v2997_v15, %v2488_v1 }
 0x320   : > { %v2209_v60 = vmax.f32 %v2207_v31, %v2208_v46  ;;  %v2236_v62 = vrot.slane %v5007_v30, 4  ;;  %3000 = vrcp.f32 %v5016_v52  ;;  %v2497_v55 = vsel %vm2494_vm13, %v2496_v57, %v2492_v13 }
 0x321   : > { %v5010_v59 = vpop.xlane.xlu2 %2132  ;;  %v5014_v32 = vpop.xlane.xlu1 %2138  ;;  %v2617_v45 = vmul.f32 %v4988_v58, %v2497_v55  ;;  %v2345_v29 = vadd.f32 %v5019_v53, %v2344_v11  ;;  %3002 = vpow2.f32 %v2282_v17  ;;  %v2507_v31 = vand.u32 2147483647, %v5016_v52 }
 0x322   : > { %v2210_v37 = vrot.slane %v2209_v60, 1  ;;  %v2237_v42 = vmax.f32 %v5007_v30, %v2236_v62  ;;  %v2212_v25 = vrot.slane %v5010_v59, 4  ;;  %v2224_v14 = vrot.slane %v5014_v32, 4 }
 0x323   : > { %v2636_v41 = vsel %vm2628_vm4, %v2617_v45, %v4814_v9  ;;  %v2346_v38 = vrot.slane %v2345_v29, 2  ;;  %v2509_v39 = vand.u32 2147483648, %v5016_v52  ;;  %vm2503_vm7 = vweird.f32 %v5016_v52 }
 0x324   : > { %v2211_v23 = vmax.f32 %v2209_v60, %v2210_v37  ;;  %v2238_v33 = vrot.slane %v2237_v42, 2  ;;  %v2213_v44 = vmax.f32 %v5010_v59, %v2212_v25  ;;  %v2225_v35 = vmax.f32 %v5014_v32, %v2224_v14  ;;  %2653 = vst.msk [vmem:[%s4935_s20 + $0x38] sm:$0xff] %vm2645_vm5, %v2636_v41 }
 0x325   : > { %v2347_v15 = vadd.f32 %v2346_v38, %v2345_v29  ;;  %v2510_v57 = vor.u32 1.1754944e-38, %v2509_v39  ;;  %vm2508_vm9 = vcmp.eq.f32.partialorder %v2507_v31, 8.507059e+37 }
 0x326   : > { %v2252_v5 = vsub.f32 %v2130_v3, %v2211_v23  ;;  %v2239_v36 = vmax.f32 %v2237_v42, %v2238_v33  ;;  %v2214_v43 = vrot.slane %v2213_v44, 2  ;;  %v3001_v61 = vpop.eup %3000  ;;  %v2226_v56 = vrot.slane %v2225_v35, 2 }
 0x327   : > { %v2499_v16 = vmul.f32 %v3001_v61, %v5016_v52  ;;  %v5039_v63 = vpop.eup %3002  ;;  %v2348_v7 = vrot.slane %v2347_v15, 1  ;;  %vm2504_vm6 = vweird.f32 %v3001_v61 }
 0x328   : > { %v2278_v50 = vmul.f32 1.442695, %v2252_v5  ;;  %v2240_v18 = vrot.slane %v2239_v36, 1  ;;  %v2215_v58 = vmax.f32 %v2213_v44, %v2214_v43  ;;  %v2227_v12 = vmax.f32 %v2225_v35, %v2226_v56  ;;  %vm2505_vm8 = vmor %vm2503_vm7, %vm2504_vm6 }
 0x329   : > { %v5030_v48 = vpop.xlane.xlu2 %2141  ;;  %v2500_v46 = vsub.f32 1.0, %v2499_v16  ;;  %v2362_v4 = vrot.slane %v5039_v63, 4  ;;  %v2349_v2 = vadd.f32 %v2348_v7, %v2347_v15 }
 0x32a   : > { %v2230_v3 = vrot.slane %v5030_v48, 4  ;;  %3004 = vpow2.f32 %v2278_v50  ;;  %v2241_v21 = vmax.f32 %v2239_v36, %v2240_v18  ;;  %v2216_v9 = vrot.slane %v2215_v58, 1 }
 0x32b   : > { %v2228_v62 = vrot.slane %v2227_v12, 1  ;;  %v2501_v22 = vmul.f32 %v3001_v61, %v2500_v46  ;;  %v2363_v37 = vadd.f32 %v5039_v63, %v2362_v4  ;;  %v2523_v56 = vand.u32 2147483648, %v2349_v2 }
 0x32c   : > { %v2257_v40 = vsub.f32 %v5007_v30, %v2241_v21  ;;  %v2231_v27 = vmax.f32 %v5030_v48, %v2230_v3  ;;  %v2217_v8 = vmax.f32 %v2215_v58, %v2216_v9  ;;  %vm2517_vm11 = vweird.f32 %v2349_v2 }
 0x32d   : > { %v2229_v42 = vmax.f32 %v2227_v12, %v2228_v62  ;;  %v2502_v1 = vadd.f32 %v3001_v61, %v2501_v22  ;;  %v2364_v49 = vrot.slane %v2363_v37, 2  ;;  %v2524_v39 = vor.u32 1.1754944e-38, %v2523_v56 }
 0x32e   : > { %v2288_v60 = vmul.f32 1.442695, %v2257_v40  ;;  %v2232_v6 = vrot.slane %v2231_v27, 2  ;;  %v2253_v30 = vsub.f32 %v5010_v59, %v2217_v8 }
 0x32f   : > { %v2506_v44 = vsel %vm2505_vm8, %v3001_v61, %v2502_v1  ;;  %v2255_v59 = vsub.f32 %v5014_v32, %v2229_v42  ;;  %v2365_v55 = vadd.f32 %v2364_v49, %v2363_v37  ;;  %v2521_v61 = vand.u32 2147483647, %v2349_v2 }
 0x330   : > { %v5044_v24 = vpop.eup %3004  ;;  %3006 = vpow2.f32 %v2288_v60  ;;  %v2233_v25 = vmax.f32 %v2231_v27, %v2232_v6  ;;  %v2280_v33 = vmul.f32 1.442695, %v2253_v30  ;;  %v2511_v14 = vsel %vm2508_vm9, %v2510_v57, %v2506_v44 }
 0x331   : > { %3008 = vrcp.f32 %v2349_v2  ;;  %v2350_v23 = vrot.slane %v5044_v24, 4  ;;  %v2618_v17 = vmul.f32 %v4998_v28, %v2511_v14  ;;  %v2284_v52 = vmul.f32 1.442695, %v2255_v59 }
 0x332   : > { %v2234_v13 = vrot.slane %v2233_v25, 1  ;;  %3010 = vpow2.f32 %v2280_v33  ;;  %v2366_v36 = vrot.slane %v2365_v55, 1  ;;  %vm2522_vm2 = vcmp.eq.f32.partialorder %v2521_v61, 8.507059e+37 }
 0x333   : > { %v2351_v11 = vadd.f32 %v5044_v24, %v2350_v23  ;;  %v2637_v32 = vsel %vm2628_vm4, %v2618_v17, %v4821_v26  ;;  %3012 = vpow2.f32 %v2284_v52 }
 0x334   : > { %v2235_v45 = vmax.f32 %v2233_v25, %v2234_v13  ;;  %2654 = vst.msk [vmem:[%s4935_s20 + $0x40] sm:$0xff] %vm2645_vm5, %v2637_v32  ;;  %v2367_v18 = vadd.f32 %v2366_v36, %v2365_v55 }
 0x335   : > { %v2352_v29 = vrot.slane %v2351_v11, 2 }
 0x336   : > { %v5052_v5 = vpop.eup %3006  ;;  %v2256_v50 = vsub.f32 %v5030_v48, %v2235_v45  ;;  %3014 = vrcp.f32 %v2367_v18  ;;  %v2563_v23 = vand.u32 2147483647, %v2367_v18  ;;  %v2565_v33 = vand.u32 2147483648, %v2367_v18 }
 0x337   : > { %v3009_v43 = vpop.eup %3008  ;;  %v2380_v41 = vrot.slane %v5052_v5, 4  ;;  %v2353_v35 = vadd.f32 %v2352_v29, %v2351_v11  ;;  %vm2559_vm15 = vweird.f32 %v2367_v18 }
 0x338   : > { %v2513_v28 = vmul.f32 %v3009_v43, %v2349_v2  ;;  %v2286_v58 = vmul.f32 1.442695, %v2256_v50  ;;  %v5062_v21 = vpop.eup %3010  ;;  %vm2518_vm10 = vweird.f32 %v3009_v43  ;;  %vm2564_vm1 = vcmp.eq.f32.partialorder %v2563_v23, 8.507059e+37 }
 0x339   : > { %v2381_v38 = vadd.f32 %v5052_v5, %v2380_v41  ;;  %v2354_v26 = vrot.slane %v2353_v35, 1  ;;  %v2356_v48 = vrot.slane %v5062_v21, 4  ;;  %v5065_v9 = vpop.eup %3012  ;;  %vm2519_vm12 = vmor %vm2517_vm11, %vm2518_vm10  ;;  %v2566_v52 = vor.u32 1.1754944e-38, %v2565_v33 }
 0x33a   : > { %v2514_v3 = vsub.f32 1.0, %v2513_v28  ;;  %3016 = vpow2.f32 %v2286_v58  ;;  %v2368_v46 = vrot.slane %v5065_v9, 4 }
 0x33b   : > { %v2382_v16 = vrot.slane %v2381_v38, 2  ;;  %v5067_v31 = vadd.f32 %v2354_v26, %v2353_v35  ;;  %v2357_v27 = vadd.f32 %v5062_v21, %v2356_v48 }
 0x33c   : > { %v2515_v15 = vmul.f32 %v3009_v43, %v2514_v3  ;;  %v3015_v7 = vpop.eup %3014  ;;  %v2369_v62 = vadd.f32 %v5065_v9, %v2368_v46 }
 0x33d   : > { %v2383_v40 = vadd.f32 %v2382_v16, %v2381_v38  ;;  %3018 = vrcp.f32 %v5067_v31  ;;  %v2358_v60 = vrot.slane %v2357_v27, 2  ;;  %v2555_v2 = vmul.f32 %v3015_v7, %v2367_v18 }
 0x33e   : > { %v2516_v12 = vadd.f32 %v3009_v43, %v2515_v15  ;;  %v2370_v1 = vrot.slane %v2369_v62, 2  ;;  %vm2560_vm14 = vweird.f32 %v3015_v7  ;;  %v2535_v36 = vand.u32 2147483647, %v5067_v31 }
 0x33f   : > { %v2384_v4 = vrot.slane %v2383_v40, 1  ;;  %v2359_v42 = vadd.f32 %v2358_v60, %v2357_v27  ;;  %v2556_v25 = vsub.f32 1.0, %v2555_v2  ;;  %vm2561_vm0 = vmor %vm2559_vm15, %vm2560_vm14  ;;  %vm2531_vm13 = vweird.f32 %v5067_v31 }
 0x340   : > { %v2520_v8 = vsel %vm2519_vm12, %v3009_v43, %v2516_v12  ;;  %v5073_v6 = vpop.eup %3016  ;;  %v2371_v13 = vadd.f32 %v2370_v1, %v2369_v62  ;;  %v2537_v43 = vand.u32 2147483648, %v5067_v31  ;;  %vm2536_vm7 = vcmp.eq.f32.partialorder %v2535_v36, 8.507059e+37 }
 0x341   : > { %v2525_v22 = vsel %vm2522_vm2, %v2524_v39, %v2520_v8  ;;  %v5076_v37 = vadd.f32 %v2384_v4, %v2383_v40  ;;  %v2374_v57 = vrot.slane %v5073_v6, 4  ;;  %v2557_v59 = vmul.f32 %v3015_v7, %v2556_v25 }
 0x342   : > { %v2619_v30 = vmul.f32 %v5019_v53, %v2525_v22  ;;  %v2360_v53 = vrot.slane %v2359_v42, 1  ;;  %v2538_v61 = vor.u32 1.1754944e-38, %v2537_v43 }
 0x343   : > { %3020 = vrcp.f32 %v5076_v37  ;;  %v3019_v44 = vpop.eup %3018  ;;  %v2375_v55 = vadd.f32 %v5073_v6, %v2374_v57  ;;  %v2558_v11 = vadd.f32 %v3015_v7, %v2557_v59  ;;  %v2607_v26 = vand.u32 2147483648, %v5076_v37 }
 0x344   : > { %v2638_v49 = vsel %vm2628_vm4, %v2619_v30, %v4835_v0  ;;  %v2527_v14 = vmul.f32 %v3019_v44, %v5067_v31  ;;  %v5087_v17 = vadd.f32 %v2360_v53, %v2359_v42  ;;  %v2372_v0 = vrot.slane %v2371_v13, 1 }
 0x345   : > { %2655 = vst.msk [vmem:[%s4935_s20 + $0x48] sm:$0xff] %vm2645_vm5, %v2638_v49  ;;  %v2562_v29 = vsel %vm2561_vm0, %v3015_v7, %v2558_v11  ;;  %vm2532_vm3 = vweird.f32 %v3019_v44  ;;  %v2376_v18 = vrot.slane %v2375_v55, 2  ;;  %v2605_v40 = vand.u32 2147483647, %v5076_v37 }
 0x346   : > { %v2528_v45 = vsub.f32 1.0, %v2527_v14  ;;  %3022 = vrcp.f32 %v5087_v17  ;;  %v2567_v41 = vsel %vm2564_vm1, %v2566_v52, %v2562_v29  ;;  %v5092_v28 = vadd.f32 %v2372_v0, %v2371_v13  ;;  %vm2533_vm6 = vmor %vm2531_vm13, %vm2532_vm3 }
 0x347   : > { %v2622_v35 = vmul.f32 %v5039_v63, %v2567_v41  ;;  %v2377_v63 = vadd.f32 %v2376_v18, %v2375_v55  ;;  %vm2601_vm9 = vweird.f32 %v5076_v37  ;;  %v2608_v39 = vor.u32 1.1754944e-38, %v2607_v26 }
 0x348   : > { %v2529_v50 = vmul.f32 %v3019_v44, %v2528_v45  ;;  %3024 = vrcp.f32 %v5092_v28  ;;  %v2551_v60 = vand.u32 2147483648, %v5087_v17  ;;  %vm2606_vm11 = vcmp.eq.f32.partialorder %v2605_v40, 8.507059e+37 }
 0x349   : > { %v3021_v32 = vpop.eup %3020  ;;  %v2641_v3 = vsel %vm2628_vm4, %v2622_v35, %v4825_v47  ;;  %v2378_v27 = vrot.slane %v2377_v63, 1  ;;  %v2549_v22 = vand.u32 2147483647, %v5087_v17  ;;  %vm2545_vm2 = vweird.f32 %v5087_v17 }
 0x34a   : > { %v2597_v38 = vmul.f32 %v3021_v32, %v5076_v37  ;;  %v2530_v58 = vadd.f32 %v3019_v44, %v2529_v50  ;;  %2658 = vst.msk [vmem:[%s4935_s20 + $0x60] sm:$0xff] %vm2645_vm5, %v2641_v3  ;;  %vm2602_vm8 = vweird.f32 %v3021_v32  ;;  %v2552_v1 = vor.u32 1.1754944e-38, %v2551_v60 }
 0x34b   : > { %vm2603_vm10 = vmor %vm2601_vm9, %vm2602_vm8  ;;  %v2379_v62 = vadd.f32 %v2378_v27, %v2377_v63  ;;  %v2579_v57 = vand.u32 2147483648, %v5092_v28  ;;  %v2577_v33 = vand.u32 2147483647, %v5092_v28  ;;  %vm2550_vm0 = vcmp.eq.f32.partialorder %v2549_v22, 8.507059e+37 }
 0x34c   : > { %v2598_v56 = vsub.f32 1.0, %v2597_v38  ;;  %v2534_v16 = vsel %vm2533_vm6, %v3019_v44, %v2530_v58  ;;  %v3023_v15 = vpop.eup %3022  ;;  %vm2573_vm1 = vweird.f32 %v5092_v28 }
 0x34d   : > { %v2539_v48 = vsel %vm2536_vm7, %v2538_v61, %v2534_v16  ;;  %v2541_v47 = vmul.f32 %v3023_v15, %v5087_v17  ;;  %vm2546_vm12 = vweird.f32 %v3023_v15  ;;  %3026 = vrcp.f32 %v2379_v62 }
 0x34e   : > { %v2599_v31 = vmul.f32 %v3021_v32, %v2598_v56  ;;  %v2620_v12 = vmul.f32 %v5044_v24, %v2539_v48  ;;  %v3025_v7 = vpop.eup %3024  ;;  %vm2547_vm14 = vmor %vm2545_vm2, %vm2546_vm12  ;;  %vm2578_vm13 = vcmp.eq.f32.partialorder %v2577_v33, 8.507059e+37  ;;  %v2593_v45 = vand.u32 2147483648, %v2379_v62 }
 0x34f   : > { %v2542_v4 = vsub.f32 1.0, %v2541_v47  ;;  %v2569_v2 = vmul.f32 %v3025_v7, %v5092_v28  ;;  %vm2574_vm15 = vweird.f32 %v3025_v7  ;;  %v2591_v29 = vand.u32 2147483647, %v2379_v62 }
 0x350   : > { %v2600_v46 = vadd.f32 %v3021_v32, %v2599_v31  ;;  %v2639_v8 = vsel %vm2628_vm4, %v2620_v12, %v4846_v34  ;;  %vm2575_vm3 = vmor %vm2573_vm1, %vm2574_vm15  ;;  %vm2587_vm7 = vweird.f32 %v2379_v62 }
 0x351   : > { %2656 = vst.msk [vmem:[%s4935_s20 + $0x50] sm:$0xff] %vm2645_vm5, %v2639_v8  ;;  %v2543_v37 = vmul.f32 %v3023_v15, %v2542_v4  ;;  %v2570_v42 = vsub.f32 1.0, %v2569_v2  ;;  %vm2592_vm9 = vcmp.eq.f32.partialorder %v2591_v29, 8.507059e+37 }
 0x352   : > { %v2604_v24 = vsel %vm2603_vm10, %v3021_v32, %v2600_v46 }
 0x353   : > { %v2609_v30 = vsel %vm2606_vm11, %v2608_v39, %v2604_v24  ;;  %v2544_v25 = vadd.f32 %v3023_v15, %v2543_v37  ;;  %v2571_v23 = vmul.f32 %v3025_v7, %v2570_v42  ;;  %v3027_v53 = vpop.eup %3026 }
 0x354   : > { %v2625_v34 = vmul.f32 %v5052_v5, %v2609_v30  ;;  %v2583_v55 = vmul.f32 %v3027_v53, %v2379_v62  ;;  %vm2588_vm6 = vweird.f32 %v3027_v53 }
 0x355   : > { %v2548_v5 = vsel %vm2547_vm14, %v3023_v15, %v2544_v25  ;;  %v2572_v59 = vadd.f32 %v3025_v7, %v2571_v23  ;;  %vm2589_vm8 = vmor %vm2587_vm7, %vm2588_vm6 }
 0x356   : > { %v2644_v49 = vsel %vm2628_vm4, %v2625_v34, %v4862_v20  ;;  %v2553_v44 = vsel %vm2550_vm0, %v2552_v1, %v2548_v5  ;;  %v2580_v20 = vor.u32 1.1754944e-38, %v2579_v57  ;;  %v2584_v52 = vsub.f32 1.0, %v2583_v55 }
 0x357   : > { %2661 = vst.msk [vmem:[%s4935_s20 + $0x78] sm:$0xff] %vm2645_vm5, %v2644_v49  ;;  %v2621_v13 = vmul.f32 %v5062_v21, %v2553_v44  ;;  %v2576_v14 = vsel %vm2575_vm3, %v3025_v7, %v2572_v59 }
 0x358   : > { %v2581_v17 = vsel %vm2578_vm13, %v2580_v20, %v2576_v14  ;;  %v2585_v36 = vmul.f32 %v3027_v53, %v2584_v52 }
 0x359   : > { %v2640_v11 = vsel %vm2628_vm4, %v2621_v13, %v4864_v54  ;;  %v2623_v0 = vmul.f32 %v5065_v9, %v2581_v17  ;;  %v2594_v54 = vor.u32 1.1754944e-38, %v2593_v45 }
 0x35a   : > { %2657 = vst.msk [vmem:[%s4935_s20 + $0x58] sm:$0xff] %vm2645_vm5, %v2640_v11  ;;  %v2586_v43 = vadd.f32 %v3027_v53, %v2585_v36 }
 0x35b   : > { %v2642_v21 = vsel %vm2628_vm4, %v2623_v0, %v4829_v51 }
 0x35c   : > { %2659 = vst.msk [vmem:[%s4935_s20 + $0x68] sm:$0xff] %vm2645_vm5, %v2642_v21  ;;  %v2590_v32 = vsel %vm2589_vm8, %v3027_v53, %v2586_v43 }
 0x35d   : > { %v2595_v41 = vsel %vm2592_vm9, %v2594_v54, %v2590_v32 }
 0x35e   : > { %v2624_v9 = vmul.f32 %v5073_v6, %v2595_v41 }
 0x360   : > { %v2643_v50 = vsel %vm2628_vm4, %v2624_v9, %v4849_v10 }
 0x361   : > { %2660 = vst.msk [vmem:[%s4935_s20 + $0x70] sm:$0xff] %vm2645_vm5, %v2643_v50 }
 0x362 PF: > { %s14_s15 = sadd.s32 1, %s3057_s15  }
 0x363   : > { %p11_p4 = scmp.ge.s32.totalorder %s14_s15, 4  }
 0x365   :  { %13 = sbr.rel (!%p11_p4) target bundleno = 1 (0x1), region = 72 }

</bundles_post_ra>
